<compile_context>
chip_gen: v5e
topology: v5e:2x2
jax: 0.10.0
libtpu: 0.0.40
codegen_flags: <defaults>
</compile_context>

<pallas_src>
import functools

import jax
import jax.numpy as jnp
from jax.experimental import pallas as pl
from jax.experimental.pallas import tpu as pltpu

EPS = 1e-5  # PyTorch BatchNorm default eps

# Flip to jnp.bfloat16 on v6e/v7x for 2x MXU throughput / half the A-matrix bytes if the
# ~1e-3 relative error is acceptable; kept float32 here for exactness on all generations.
GEMM_DTYPE = jnp.float32

_VMEM_SPEC = pl.BlockSpec(memory_space=pltpu.MemorySpace.VMEM)


# ----------------------------- Pallas kernel ------------------------------- #

def _gemm_bn_kernel(a_ref, b_ref, g_ref, be_ref, o_ref, *, bn_axis, relu):
    """Fused  Y = A @ B ; batch-stat BatchNorm along `bn_axis` ; optional ReLU.

    conv layers:  A = W (Cout, K), B = A^T (K, M), bn_axis=1  -> lane-dense (Cout, M) output.
    fc layer:     A = X (N, F),    B = Wfc^T (F, L), bn_axis=0 -> (N, L) output.
    Biases are intentionally absent (they cancel in batch-stat BN).
    """
    a = a_ref[...].astype(GEMM_DTYPE)
    b = b_ref[...].astype(GEMM_DTYPE)
    y = jnp.dot(a, b, preferred_element_type=jnp.float32)

    m = y.shape[bn_axis]
    inv_m = 1.0 / m
    s1 = jnp.sum(y, axis=bn_axis, keepdims=True)          # one pass: sum
    s2 = jnp.sum(y * y, axis=bn_axis, keepdims=True)      #           sum of squares
    mean = s1 * inv_m
    var = s2 * inv_m - mean * mean                         # biased variance (training BN)
    y = (y - mean) * jax.lax.rsqrt(var + EPS)
    y = y * g_ref[...] + be_ref[...]
    if relu:
        y = jnp.maximum(y, 0.0)
    o_ref[...] = y.astype(o_ref.dtype)


def gemm_bn(a, b, gamma, beta, *, bn_axis, relu):
    out_shape = (a.shape[0], b.shape[1])
    return pl.pallas_call(
        functools.partial(_gemm_bn_kernel, bn_axis=bn_axis, relu=relu),
        out_shape=jax.ShapeDtypeStruct(out_shape, jnp.float32),
        in_specs=[_VMEM_SPEC] * 4,
        out_specs=_VMEM_SPEC,
        compiler_params=pltpu.CompilerParams(vmem_limit_bytes=32 * 1024 * 1024),
    )(a, b, gamma, beta)


# ------------------------------ JAX glue ----------------------------------- #

def conv3d_bn_relu(act, w, gamma, beta, *, pad_value=0.0):
    """Conv3d(k=3, s=2, p=1) + batch-stat BatchNorm3d + ReLU.

    act: (Cin, N, D, H, W) channels-first  ->  (Cout, N, D//2, H//2, W//2).
    The im2col gather builds A^T (K, M) directly: K = Cin*27 on sublanes, M = N*Do*Ho*Wo
    on lanes, so no lane padding of K and no transpose of the activation between layers.
    """
    cout, cin, k, _, _ = w.shape
    _, n, d, h, wd = act.shape
    do, ho, wo = d // 2, h // 2, wd // 2
    ap = jnp.pad(act, ((0, 0), (0, 0), (1, 1), (1, 1), (1, 1)), constant_values=pad_value)
    taps = []
    for kd in range(k):
        for kh in range(k):
            for kw in range(k):
                taps.append(ap[:, :, kd:kd + 2 * do:2, kh:kh + 2 * ho:2, kw:kw + 2 * wo:2])
    at = jnp.stack(taps, axis=1).reshape(cin * k * k * k, n * do * ho * wo)   # (K, M)
    wmat = w.reshape(cout, cin * k * k * k)                                    # (Cout, K)
    y = gemm_bn(wmat, at, gamma.reshape(cout, 1), beta.reshape(cout, 1),
                bn_axis=1, relu=True)                                          # (Cout, M)
    return y.reshape(cout, n, do, ho, wo)


def encoder_forward(x, params, vmin=0.5, vmax=2.5):
    n = x.shape[0]
    act = jnp.transpose(x, (1, 0, 2, 3, 4))                 # (Cin=1, N, D, H, W)

    # Fold the multiplicative part of the input scaling into W1; pad the raw input with
    # vmin (== scaled value 0).  The additive constant and conv biases cancel in BN.
    w1 = params["w1"] * (1.0 / (vmax - vmin))
    act = conv3d_bn_relu(act, w1, params["g1"], params["be1"], pad_value=vmin)
    act = conv3d_bn_relu(act, params["w2"], params["g2"], params["be2"])
    act = conv3d_bn_relu(act, params["w3"], params["g3"], params["be3"])

    # Flatten in torch .view order (c, d, h, w) per sample, then fc + BN1d (batch stats).
    cch = act.shape[0]
    fc_in = act.reshape(cch, n, -1).transpose(1, 0, 2).reshape(n, -1)          # (N, 4c*64)
    latent = params["wfc"].shape[0]
    return gemm_bn(fc_in, params["wfc"].T,
                   params["g4"].reshape(1, latent), params["be4"].reshape(1, latent),
                   bn_axis=0, relu=False)


# -------- Pure-JAX reference (mirrors the PyTorch module, incl. biases) ----- #

def _bn_ref(y, gamma, beta, axes, shape):
    mean = jnp.mean(y, axis=axes, keepdims=True)
    var = jnp.mean((y - mean) ** 2, axis=axes, keepdims=True)
    return (y - mean) * jax.lax.rsqrt(var + EPS) * gamma.reshape(shape) + beta.reshape(shape)


def encoder_forward_ref(x, params, vmin=0.5, vmax=2.5):
    x = (x - vmin) / (vmax - vmin)
    for i in (1, 2, 3):
        w, b = params[f"w{i}"], params[f"b{i}"]
        x = jax.lax.conv_general_dilated(
            x, w, window_strides=(2, 2, 2), padding=((1, 1), (1, 1), (1, 1)),
            dimension_numbers=("NCDHW", "OIDHW", "NCDHW"))
        x = x + b.reshape(1, -1, 1, 1, 1)
        x = _bn_ref(x, params[f"g{i}"], params[f"be{i}"], (0, 2, 3, 4), (1, -1, 1, 1, 1))
        x = jnp.maximum(x, 0.0)
    x = x.reshape(x.shape[0], -1)
    y = x @ params["wfc"].T + params["bfc"]
    return _bn_ref(y, params["g4"], params["be4"], (0,), (1, -1))


# --------------------------------- main ------------------------------------ #

if __name__ == "__main__":
    capacity, latent_dims = 8, 2
    c = capacity
    N = 2
    # fc in_features = 4c*4*4*4 implies three stride-2 convs from 32^3 -> 4^3.
    D = H = W = 32

    key = jax.random.PRNGKey(0)
    ks = jax.random.split(key, 10)
    x = jax.random.uniform(ks[0], (N, 1, D, H, W), jnp.float32, minval=0.5, maxval=2.5)

    def winit(k, shape, scale):
        return (jax.random.normal(k, shape, jnp.float32) * scale).astype(jnp.float32)

    params = {
        "w1": winit(ks[1], (c, 1, 3, 3, 3), 0.2),          "b1": winit(ks[2], (c,), 0.05),
        "g1": jnp.ones((c,), jnp.float32),                 "be1": jnp.zeros((c,), jnp.float32),
        "w2": winit(ks[3], (2 * c, c, 3, 3, 3), 0.1),      "b2": winit(ks[4], (2 * c,), 0.05),
        "g2": jnp.ones((2 * c,), jnp.float32),             "be2": jnp.zeros((2 * c,), jnp.float32),
        "w3": winit(ks[5], (4 * c, 2 * c, 3, 3, 3), 0.07), "b3": winit(ks[6], (4 * c,), 0.05),
        "g3": jnp.ones((4 * c,), jnp.float32),             "be3": jnp.zeros((4 * c,), jnp.float32),
        "wfc": winit(ks[7], (latent_dims, 4 * c * 4 * 4 * 4), 0.02),
        "bfc": winit(ks[8], (latent_dims,), 0.05),
        "g4": jnp.ones((latent_dims,), jnp.float32),       "be4": jnp.zeros((latent_dims,), jnp.float32),
    }

    fwd = jax.jit(encoder_forward)
    out = jax.block_until_ready(fwd(x, params))

    assert out.shape == (N, latent_dims), out.shape
    assert bool(jnp.all(jnp.isfinite(out)))

    ref = jax.block_until_ready(jax.jit(encoder_forward_ref)(x, params))
    max_diff = float(jnp.max(jnp.abs(out - ref)))
    assert max_diff < 1e-2, f"max diff vs reference too large: {max_diff}"

    print("KERNEL_OK")
</pallas_src>

<mosaic_0001>
module attributes {stable_mosaic.version = 11 : i64} {
  func.func @_gemm_bn_kernel(%arg0: memref<8x27xf32, #tpu.memory_space<vmem>>, %arg1: memref<27x8192xf32, #tpu.memory_space<vmem>>, %arg2: memref<8x1xf32, #tpu.memory_space<vmem>>, %arg3: memref<8x1xf32, #tpu.memory_space<vmem>>, %arg4: memref<8x8192xf32, #tpu.memory_space<vmem>>) attributes {dimension_semantics = [], scalar_prefetch = 0 : i64, scratch_operands = 0 : i64, tpu.core_type = #tpu.core_type<tc>} {
    %c0 = arith.constant 0 : index
    %c0_0 = arith.constant 0 : index
    %0 = vector.load %arg0[%c0, %c0_0] : memref<8x27xf32, #tpu.memory_space<vmem>>, vector<8x27xf32>
    %c0_1 = arith.constant 0 : index
    %c0_2 = arith.constant 0 : index
    %1 = vector.load %arg1[%c0_1, %c0_2] : memref<27x8192xf32, #tpu.memory_space<vmem>>, vector<27x8192xf32>
    %cst = arith.constant dense<0.000000e+00> : vector<8x8192xf32>
    %2 = tpu.matmul %0, %1, %cst {dimension_numbers = #tpu.dot_dimension_numbers<[1], [0], [0], [1], [0, 0, 1, 1], [], []>} : vector<8x27xf32>, vector<27x8192xf32>, vector<8x8192xf32> -> vector<8x8192xf32>
    %cst_3 = arith.constant dense<0.000000e+00> : vector<8xf32>
    %3 = vector.multi_reduction <add>, %2, %cst_3 [1] : vector<8x8192xf32> to vector<8xf32>
    %4 = vector.shape_cast %3 : vector<8xf32> to vector<8x1xf32>
    %5 = arith.mulf %2, %2 : vector<8x8192xf32>
    %cst_4 = arith.constant dense<0.000000e+00> : vector<8xf32>
    %6 = vector.multi_reduction <add>, %5, %cst_4 [1] : vector<8x8192xf32> to vector<8xf32>
    %7 = vector.shape_cast %6 : vector<8xf32> to vector<8x1xf32>
    %cst_5 = arith.constant 1.22070313E-4 : f32
    %8 = vector.broadcast %cst_5 : f32 to vector<8x1xf32>
    %9 = arith.mulf %4, %8 : vector<8x1xf32>
    %cst_6 = arith.constant 1.22070313E-4 : f32
    %10 = vector.broadcast %cst_6 : f32 to vector<8x1xf32>
    %11 = arith.mulf %7, %10 : vector<8x1xf32>
    %12 = arith.mulf %9, %9 : vector<8x1xf32>
    %13 = arith.subf %11, %12 : vector<8x1xf32>
    %14 = vector.broadcast %9 : vector<8x1xf32> to vector<8x8192xf32>
    %15 = arith.subf %2, %14 : vector<8x8192xf32>
    %cst_7 = arith.constant 9.99999974E-6 : f32
    %16 = vector.broadcast %cst_7 : f32 to vector<8x1xf32>
    %17 = arith.addf %13, %16 : vector<8x1xf32>
    %18 = math.rsqrt %17 : vector<8x1xf32>
    %19 = vector.broadcast %18 : vector<8x1xf32> to vector<8x8192xf32>
    %20 = arith.mulf %15, %19 : vector<8x8192xf32>
    %c0_8 = arith.constant 0 : index
    %c0_9 = arith.constant 0 : index
    %21 = vector.load %arg2[%c0_8, %c0_9] : memref<8x1xf32, #tpu.memory_space<vmem>>, vector<8x1xf32>
    %22 = vector.broadcast %21 : vector<8x1xf32> to vector<8x8192xf32>
    %23 = arith.mulf %20, %22 : vector<8x8192xf32>
    %c0_10 = arith.constant 0 : index
    %c0_11 = arith.constant 0 : index
    %24 = vector.load %arg3[%c0_10, %c0_11] : memref<8x1xf32, #tpu.memory_space<vmem>>, vector<8x1xf32>
    %25 = vector.broadcast %24 : vector<8x1xf32> to vector<8x8192xf32>
    %26 = arith.addf %23, %25 : vector<8x8192xf32>
    %cst_12 = arith.constant 0.000000e+00 : f32
    %27 = vector.broadcast %cst_12 : f32 to vector<8x8192xf32>
    %28 = arith.maximumf %26, %27 : vector<8x8192xf32>
    %c0_13 = arith.constant 0 : index
    %c0_14 = arith.constant 0 : index
    %29 = vector.load %arg4[%c0_13, %c0_14] : memref<8x8192xf32, #tpu.memory_space<vmem>>, vector<8x8192xf32>
    tpu.vector_store %arg4[%c0_13, %c0_14], %28 {strides = array<i32>} : memref<8x8192xf32, #tpu.memory_space<vmem>>, vector<8x8192xf32>,
    return
  }
}

module attributes {stable_mosaic.version = 11 : i64} {
  func.func @_gemm_bn_kernel(%arg0: memref<16x216xf32, #tpu.memory_space<vmem>>, %arg1: memref<216x1024xf32, #tpu.memory_space<vmem>>, %arg2: memref<16x1xf32, #tpu.memory_space<vmem>>, %arg3: memref<16x1xf32, #tpu.memory_space<vmem>>, %arg4: memref<16x1024xf32, #tpu.memory_space<vmem>>) attributes {dimension_semantics = [], scalar_prefetch = 0 : i64, scratch_operands = 0 : i64, tpu.core_type = #tpu.core_type<tc>} {
    %c0 = arith.constant 0 : index
    %c0_0 = arith.constant 0 : index
    %0 = vector.load %arg0[%c0, %c0_0] : memref<16x216xf32, #tpu.memory_space<vmem>>, vector<16x216xf32>
    %c0_1 = arith.constant 0 : index
    %c0_2 = arith.constant 0 : index
    %1 = vector.load %arg1[%c0_1, %c0_2] : memref<216x1024xf32, #tpu.memory_space<vmem>>, vector<216x1024xf32>
    %cst = arith.constant dense<0.000000e+00> : vector<16x1024xf32>
    %2 = tpu.matmul %0, %1, %cst {dimension_numbers = #tpu.dot_dimension_numbers<[1], [0], [0], [1], [0, 0, 1, 1], [], []>} : vector<16x216xf32>, vector<216x1024xf32>, vector<16x1024xf32> -> vector<16x1024xf32>
    %cst_3 = arith.constant dense<0.000000e+00> : vector<16xf32>
    %3 = vector.multi_reduction <add>, %2, %cst_3 [1] : vector<16x1024xf32> to vector<16xf32>
    %4 = vector.shape_cast %3 : vector<16xf32> to vector<16x1xf32>
    %5 = arith.mulf %2, %2 : vector<16x1024xf32>
    %cst_4 = arith.constant dense<0.000000e+00> : vector<16xf32>
    %6 = vector.multi_reduction <add>, %5, %cst_4 [1] : vector<16x1024xf32> to vector<16xf32>
    %7 = vector.shape_cast %6 : vector<16xf32> to vector<16x1xf32>
    %cst_5 = arith.constant 9.765625E-4 : f32
    %8 = vector.broadcast %cst_5 : f32 to vector<16x1xf32>
    %9 = arith.mulf %4, %8 : vector<16x1xf32>
    %cst_6 = arith.constant 9.765625E-4 : f32
    %10 = vector.broadcast %cst_6 : f32 to vector<16x1xf32>
    %11 = arith.mulf %7, %10 : vector<16x1xf32>
    %12 = arith.mulf %9, %9 : vector<16x1xf32>
    %13 = arith.subf %11, %12 : vector<16x1xf32>
    %14 = vector.broadcast %9 : vector<16x1xf32> to vector<16x1024xf32>
    %15 = arith.subf %2, %14 : vector<16x1024xf32>
    %cst_7 = arith.constant 9.99999974E-6 : f32
    %16 = vector.broadcast %cst_7 : f32 to vector<16x1xf32>
    %17 = arith.addf %13, %16 : vector<16x1xf32>
    %18 = math.rsqrt %17 : vector<16x1xf32>
    %19 = vector.broadcast %18 : vector<16x1xf32> to vector<16x1024xf32>
    %20 = arith.mulf %15, %19 : vector<16x1024xf32>
    %c0_8 = arith.constant 0 : index
    %c0_9 = arith.constant 0 : index
    %21 = vector.load %arg2[%c0_8, %c0_9] : memref<16x1xf32, #tpu.memory_space<vmem>>, vector<16x1xf32>
    %22 = vector.broadcast %21 : vector<16x1xf32> to vector<16x1024xf32>
    %23 = arith.mulf %20, %22 : vector<16x1024xf32>
    %c0_10 = arith.constant 0 : index
    %c0_11 = arith.constant 0 : index
    %24 = vector.load %arg3[%c0_10, %c0_11] : memref<16x1xf32, #tpu.memory_space<vmem>>, vector<16x1xf32>
    %25 = vector.broadcast %24 : vector<16x1xf32> to vector<16x1024xf32>
    %26 = arith.addf %23, %25 : vector<16x1024xf32>
    %cst_12 = arith.constant 0.000000e+00 : f32
    %27 = vector.broadcast %cst_12 : f32 to vector<16x1024xf32>
    %28 = arith.maximumf %26, %27 : vector<16x1024xf32>
    %c0_13 = arith.constant 0 : index
    %c0_14 = arith.constant 0 : index
    %29 = vector.load %arg4[%c0_13, %c0_14] : memref<16x1024xf32, #tpu.memory_space<vmem>>, vector<16x1024xf32>
    tpu.vector_store %arg4[%c0_13, %c0_14], %28 {strides = array<i32>} : memref<16x1024xf32, #tpu.memory_space<vmem>>, vector<16x1024xf32>,
    return
  }
}

module attributes {stable_mosaic.version = 11 : i64} {
  func.func @_gemm_bn_kernel(%arg0: memref<32x432xf32, #tpu.memory_space<vmem>>, %arg1: memref<432x128xf32, #tpu.memory_space<vmem>>, %arg2: memref<32x1xf32, #tpu.memory_space<vmem>>, %arg3: memref<32x1xf32, #tpu.memory_space<vmem>>, %arg4: memref<32x128xf32, #tpu.memory_space<vmem>>) attributes {dimension_semantics = [], scalar_prefetch = 0 : i64, scratch_operands = 0 : i64, tpu.core_type = #tpu.core_type<tc>} {
    %c0 = arith.constant 0 : index
    %c0_0 = arith.constant 0 : index
    %0 = vector.load %arg0[%c0, %c0_0] : memref<32x432xf32, #tpu.memory_space<vmem>>, vector<32x432xf32>
    %c0_1 = arith.constant 0 : index
    %c0_2 = arith.constant 0 : index
    %1 = vector.load %arg1[%c0_1, %c0_2] : memref<432x128xf32, #tpu.memory_space<vmem>>, vector<432x128xf32>
    %cst = arith.constant dense<0.000000e+00> : vector<32x128xf32>
    %2 = tpu.matmul %0, %1, %cst {dimension_numbers = #tpu.dot_dimension_numbers<[1], [0], [0], [1], [0, 0, 1, 1], [], []>} : vector<32x432xf32>, vector<432x128xf32>, vector<32x128xf32> -> vector<32x128xf32>
    %cst_3 = arith.constant dense<0.000000e+00> : vector<32xf32>
    %3 = vector.multi_reduction <add>, %2, %cst_3 [1] : vector<32x128xf32> to vector<32xf32>
    %4 = vector.shape_cast %3 : vector<32xf32> to vector<32x1xf32>
    %5 = arith.mulf %2, %2 : vector<32x128xf32>
    %cst_4 = arith.constant dense<0.000000e+00> : vector<32xf32>
    %6 = vector.multi_reduction <add>, %5, %cst_4 [1] : vector<32x128xf32> to vector<32xf32>
    %7 = vector.shape_cast %6 : vector<32xf32> to vector<32x1xf32>
    %cst_5 = arith.constant 7.812500e-03 : f32
    %8 = vector.broadcast %cst_5 : f32 to vector<32x1xf32>
    %9 = arith.mulf %4, %8 : vector<32x1xf32>
    %cst_6 = arith.constant 7.812500e-03 : f32
    %10 = vector.broadcast %cst_6 : f32 to vector<32x1xf32>
    %11 = arith.mulf %7, %10 : vector<32x1xf32>
    %12 = arith.mulf %9, %9 : vector<32x1xf32>
    %13 = arith.subf %11, %12 : vector<32x1xf32>
    %14 = vector.broadcast %9 : vector<32x1xf32> to vector<32x128xf32>
    %15 = arith.subf %2, %14 : vector<32x128xf32>
    %cst_7 = arith.constant 9.99999974E-6 : f32
    %16 = vector.broadcast %cst_7 : f32 to vector<32x1xf32>
    %17 = arith.addf %13, %16 : vector<32x1xf32>
    %18 = math.rsqrt %17 : vector<32x1xf32>
    %19 = vector.broadcast %18 : vector<32x1xf32> to vector<32x128xf32>
    %20 = arith.mulf %15, %19 : vector<32x128xf32>
    %c0_8 = arith.constant 0 : index
    %c0_9 = arith.constant 0 : index
    %21 = vector.load %arg2[%c0_8, %c0_9] : memref<32x1xf32, #tpu.memory_space<vmem>>, vector<32x1xf32>
    %22 = vector.broadcast %21 : vector<32x1xf32> to vector<32x128xf32>
    %23 = arith.mulf %20, %22 : vector<32x128xf32>
    %c0_10 = arith.constant 0 : index
    %c0_11 = arith.constant 0 : index
    %24 = vector.load %arg3[%c0_10, %c0_11] : memref<32x1xf32, #tpu.memory_space<vmem>>, vector<32x1xf32>
    %25 = vector.broadcast %24 : vector<32x1xf32> to vector<32x128xf32>
    %26 = arith.addf %23, %25 : vector<32x128xf32>
    %cst_12 = arith.constant 0.000000e+00 : f32
    %27 = vector.broadcast %cst_12 : f32 to vector<32x128xf32>
    %28 = arith.maximumf %26, %27 : vector<32x128xf32>
    %c0_13 = arith.constant 0 : index
    %c0_14 = arith.constant 0 : index
    %29 = vector.load %arg4[%c0_13, %c0_14] : memref<32x128xf32, #tpu.memory_space<vmem>>, vector<32x128xf32>
    tpu.vector_store %arg4[%c0_13, %c0_14], %28 {strides = array<i32>} : memref<32x128xf32, #tpu.memory_space<vmem>>, vector<32x128xf32>,
    return
  }
}

module attributes {stable_mosaic.version = 11 : i64} {
  func.func @_gemm_bn_kernel(%arg0: memref<2x2048xf32, #tpu.memory_space<vmem>>, %arg1: memref<2048x2xf32, #tpu.memory_space<vmem>>, %arg2: memref<1x2xf32, #tpu.memory_space<vmem>>, %arg3: memref<1x2xf32, #tpu.memory_space<vmem>>, %arg4: memref<2x2xf32, #tpu.memory_space<vmem>>) attributes {dimension_semantics = [], scalar_prefetch = 0 : i64, scratch_operands = 0 : i64, tpu.core_type = #tpu.core_type<tc>} {
    %c0 = arith.constant 0 : index
    %c0_0 = arith.constant 0 : index
    %0 = vector.load %arg0[%c0, %c0_0] : memref<2x2048xf32, #tpu.memory_space<vmem>>, vector<2x2048xf32>
    %c0_1 = arith.constant 0 : index
    %c0_2 = arith.constant 0 : index
    %1 = vector.load %arg1[%c0_1, %c0_2] : memref<2048x2xf32, #tpu.memory_space<vmem>>, vector<2048x2xf32>
    %cst = arith.constant dense<0.000000e+00> : vector<2x2xf32>
    %2 = tpu.matmul %0, %1, %cst {dimension_numbers = #tpu.dot_dimension_numbers<[1], [0], [0], [1], [0, 0, 1, 1], [], []>} : vector<2x2048xf32>, vector<2048x2xf32>, vector<2x2xf32> -> vector<2x2xf32>
    %cst_3 = arith.constant dense<0.000000e+00> : vector<2xf32>
    %3 = vector.multi_reduction <add>, %2, %cst_3 [0] : vector<2x2xf32> to vector<2xf32>
    %4 = vector.shape_cast %3 : vector<2xf32> to vector<1x2xf32>
    %5 = arith.mulf %2, %2 : vector<2x2xf32>
    %cst_4 = arith.constant dense<0.000000e+00> : vector<2xf32>
    %6 = vector.multi_reduction <add>, %5, %cst_4 [0] : vector<2x2xf32> to vector<2xf32>
    %7 = vector.shape_cast %6 : vector<2xf32> to vector<1x2xf32>
    %cst_5 = arith.constant 5.000000e-01 : f32
    %8 = vector.broadcast %cst_5 : f32 to vector<1x2xf32>
    %9 = arith.mulf %4, %8 : vector<1x2xf32>
    %cst_6 = arith.constant 5.000000e-01 : f32
    %10 = vector.broadcast %cst_6 : f32 to vector<1x2xf32>
    %11 = arith.mulf %7, %10 : vector<1x2xf32>
    %12 = arith.mulf %9, %9 : vector<1x2xf32>
    %13 = arith.subf %11, %12 : vector<1x2xf32>
    %14 = vector.broadcast %9 : vector<1x2xf32> to vector<2x2xf32>
    %15 = arith.subf %2, %14 : vector<2x2xf32>
    %cst_7 = arith.constant 9.99999974E-6 : f32
    %16 = vector.broadcast %cst_7 : f32 to vector<1x2xf32>
    %17 = arith.addf %13, %16 : vector<1x2xf32>
    %18 = math.rsqrt %17 : vector<1x2xf32>
    %19 = vector.broadcast %18 : vector<1x2xf32> to vector<2x2xf32>
    %20 = arith.mulf %15, %19 : vector<2x2xf32>
    %c0_8 = arith.constant 0 : index
    %c0_9 = arith.constant 0 : index
    %21 = vector.load %arg2[%c0_8, %c0_9] : memref<1x2xf32, #tpu.memory_space<vmem>>, vector<1x2xf32>
    %22 = vector.broadcast %21 : vector<1x2xf32> to vector<2x2xf32>
    %23 = arith.mulf %20, %22 : vector<2x2xf32>
    %c0_10 = arith.constant 0 : index
    %c0_11 = arith.constant 0 : index
    %24 = vector.load %arg3[%c0_10, %c0_11] : memref<1x2xf32, #tpu.memory_space<vmem>>, vector<1x2xf32>
    %25 = vector.broadcast %24 : vector<1x2xf32> to vector<2x2xf32>
    %26 = arith.addf %23, %25 : vector<2x2xf32>
    %c0_12 = arith.constant 0 : index
    %c0_13 = arith.constant 0 : index
    %27 = vector.load %arg4[%c0_12, %c0_13] : memref<2x2xf32, #tpu.memory_space<vmem>>, vector<2x2xf32>
    tpu.vector_store %arg4[%c0_12, %c0_13], %26 {strides = array<i32>} : memref<2x2xf32, #tpu.memory_space<vmem>>, vector<2x2xf32>,
    return
  }
}

</mosaic_0001>

<bundles_post_ra>
// kernel: encoder_forward.4
= control target key start
LH: loop header
LB: loop body
LE: loop exit
PB: predicated region body
PF: predicated region fallthrough
CT: control target
= control target key end

     0   :  { %vm278_vm0 = vcmask 1042432   ;;  %vm274_vm1 = vcmask 220160   ;;  %s4496_s1 = inlined_call_operand.vmem [shape: f32[27,8192], index: 1, kind: input, shape index: {}]   ;;  %s4497_s0 = inlined_call_operand.vmem [shape: f32[8,27], index: 0, kind: input, shape index: {}]   ;;  %s4498_s2 = inlined_call_operand.vmem [shape: f32[8,1], index: 2, kind: input, shape index: {}]   ;;  %s4499_s3 = inlined_call_operand.vmem [shape: f32[8,1], index: 3, kind: input, shape index: {}]   ;;  %s4500_s4 = inlined_call_operand.vmem [shape: f32[8,8192], index: 4, kind: output, shape index: {}]  }
   0x1   :  { %v212_v0 = vld [vmem:[%s4496_s1 + $0x610] sm:$0x7]  ;;  %v210_v1 = vld [vmem:[%s4496_s1 + $0x600] sm:$0x7]  ;;  %v211_v2 = vld [vmem:[%s4496_s1 + $0x608] sm:$0x7] }
   0x2   :  { %2364 = vmatpush.msk.msra.mxu2 %vm278_vm0, %v212_v0  ;;  %2360 = vmatpush.msk.msra.mxu0 %vm278_vm0, %v210_v1  ;;  %v148_v3 = vld [vmem:[%s4496_s1 + $0x410] sm:$0xff]  ;;  %v213_v4 = vld [vmem:[%s4496_s1 + $0x618] sm:$0x7]  ;;  %v146_v5 = vld [vmem:[%s4496_s1 + $0x400] sm:$0xff] }
   0x3   :  { %2362 = vmatpush.msk.msra.mxu1 %vm278_vm0, %v211_v2  ;;  %2366 = vmatpush.msk.msra.mxu3 %vm278_vm0, %v213_v4  ;;  %v147_v6 = vld [vmem:[%s4496_s1 + $0x408] sm:$0xff]  ;;  %v84_v7 = vld [vmem:[%s4496_s1 + $0x210] sm:$0xff]  ;;  %v149_v8 = vld [vmem:[%s4496_s1 + $0x418] sm:$0xff] }
   0x4   :  { %524 = vmatpush.msra.mxu2 %v148_v3  ;;  %484 = vmatpush.msra.mxu0 %v146_v5  ;;  %v82_v9 = vld [vmem:[%s4496_s1 + $0x200] sm:$0xff]  ;;  %v83_v10 = vld [vmem:[%s4496_s1 + $0x208] sm:$0xff]  ;;  %v20_v11 = vld [vmem:[%s4496_s1 + $0x10] sm:$0xff] }
   0x5   :  { %504 = vmatpush.msra.mxu1 %v147_v6  ;;  %544 = vmatpush.msra.mxu3 %v149_v8  ;;  %v85_v12 = vld [vmem:[%s4496_s1 + $0x218] sm:$0xff]  ;;  %v2566_v13 = vld [vmem:[%s4497_s0] sm:$0xff]  ;;  %v19_v15 = vld [vmem:[%s4496_s1 + $0x8] sm:$0xff] }
   0x6   :  { %525 = vmatpush.msra.mxu2 %v84_v7  ;;  %485 = vmatpush.msra.mxu0 %v82_v9  ;;  %v18_v14 = vld [vmem:[%s4496_s1] sm:$0xff]  ;;  %v216_v16 = vld [vmem:[%s4496_s1 + $0x630] sm:$0x7]  ;;  %v21_v17 = vld [vmem:[%s4496_s1 + $0x18] sm:$0xff] }
   0x7   :  { %505 = vmatpush.msra.mxu1 %v83_v10  ;;  %545 = vmatpush.msra.mxu3 %v85_v12  ;;  %v214_v18 = vld [vmem:[%s4496_s1 + $0x620] sm:$0x7]  ;;  %v152_v19 = vld [vmem:[%s4496_s1 + $0x430] sm:$0xff]  ;;  %v217_v20 = vld [vmem:[%s4496_s1 + $0x638] sm:$0x7] }
   0x8   :  { %526 = vmatpush.msra.mxu2 %v20_v11  ;;  %486 = vmatpush.msra.mxu0 %v18_v14  ;;  %v150_v21 = vld [vmem:[%s4496_s1 + $0x420] sm:$0xff]  ;;  %v215_v22 = vld [vmem:[%s4496_s1 + $0x628] sm:$0x7]  ;;  %v88_v23 = vld [vmem:[%s4496_s1 + $0x230] sm:$0xff] }
   0x9   :  { %2365 = vmatmul.msk.f32.vlgmr.msra.gmra.mxu2 %vm274_vm1, %v2566_v13  ;;  %506 = vmatpush.msra.mxu1 %v19_v15  ;;  %v153_v24 = vld [vmem:[%s4496_s1 + $0x438] sm:$0xff]  ;;  %v86_v25 = vld [vmem:[%s4496_s1 + $0x220] sm:$0xff]  ;;  %v151_v26 = vld [vmem:[%s4496_s1 + $0x428] sm:$0xff] }
   0xa   :  { %2372 = vmatpush.msk.msrb.mxu2 %vm278_vm0, %v216_v16  ;;  %546 = vmatpush.msra.mxu3 %v21_v17  ;;  %v24_v27 = vld [vmem:[%s4496_s1 + $0x30] sm:$0xff]  ;;  %v89_v28 = vld [vmem:[%s4496_s1 + $0x238] sm:$0xff]  ;;  %v22_v29 = vld [vmem:[%s4496_s1 + $0x20] sm:$0xff] }
   0xb   :  { %2361 = vmatmul.msk.f32.vlgmr.msra.gmra.mxu0 %vm274_vm1, %v2566_v13  ;;  %2363 = vmatmul.msk.f32.vlgmr.msra.gmra.mxu1 %vm274_vm1, %v2566_v13  ;;  %v87_v30 = vld [vmem:[%s4496_s1 + $0x228] sm:$0xff]  ;;  %v25_v31 = vld [vmem:[%s4496_s1 + $0x38] sm:$0xff]  ;;  %v220_v32 = vld [vmem:[%s4496_s1 + $0x650] sm:$0x7] }
   0xc   :  { %2367 = vmatmul.msk.f32.vlgmr.msra.gmra.mxu3 %vm274_vm1, %v2566_v13  ;;  %2368 = vmatpush.msk.msrb.mxu0 %vm278_vm0, %v214_v18  ;;  %v23_v33 = vld [vmem:[%s4496_s1 + $0x28] sm:$0xff]  ;;  %v218_v34 = vld [vmem:[%s4496_s1 + $0x640] sm:$0x7]  ;;  %v156_v35 = vld [vmem:[%s4496_s1 + $0x450] sm:$0xff] }
   0xd   :  { %604 = vmatpush.msrb.mxu2 %v152_v19  ;;  %2374 = vmatpush.msk.msrb.mxu3 %vm278_vm0, %v217_v20  ;;  %v221_v36 = vld [vmem:[%s4496_s1 + $0x658] sm:$0x7]  ;;  %v154_v37 = vld [vmem:[%s4496_s1 + $0x440] sm:$0xff]  ;;  %v219_v38 = vld [vmem:[%s4496_s1 + $0x648] sm:$0x7] }
   0xe   :  { %564 = vmatpush.msrb.mxu0 %v150_v21  ;;  %2370 = vmatpush.msk.msrb.mxu1 %vm278_vm0, %v215_v22  ;;  %v92_v39 = vld [vmem:[%s4496_s1 + $0x250] sm:$0xff]  ;;  %v157_v40 = vld [vmem:[%s4496_s1 + $0x458] sm:$0xff]  ;;  %v90_v41 = vld [vmem:[%s4496_s1 + $0x240] sm:$0xff] }
   0xf   :  { %605 = vmatpush.msrb.mxu2 %v88_v23  ;;  %624 = vmatpush.msrb.mxu3 %v153_v24  ;;  %v155_v42 = vld [vmem:[%s4496_s1 + $0x448] sm:$0xff]  ;;  %v28_v43 = vld [vmem:[%s4496_s1 + $0x50] sm:$0xff]  ;;  %v93_v44 = vld [vmem:[%s4496_s1 + $0x258] sm:$0xff] }
  0x10   :  { %565 = vmatpush.msrb.mxu0 %v86_v25  ;;  %584 = vmatpush.msrb.mxu1 %v151_v26  ;;  %v26_v45 = vld [vmem:[%s4496_s1 + $0x40] sm:$0xff]  ;;  %v91_v46 = vld [vmem:[%s4496_s1 + $0x248] sm:$0xff]  ;;  %v29_v47 = vld [vmem:[%s4496_s1 + $0x58] sm:$0xff] }
  0x11   :  { %606 = vmatpush.msrb.mxu2 %v24_v27  ;;  %625 = vmatpush.msrb.mxu3 %v89_v28  ;;  %v224_v48 = vld [vmem:[%s4496_s1 + $0x670] sm:$0x7]  ;;  %v27_v49 = vld [vmem:[%s4496_s1 + $0x48] sm:$0xff]  ;;  %v222_v50 = vld [vmem:[%s4496_s1 + $0x660] sm:$0x7] }
  0x12   :  { %566 = vmatpush.msrb.mxu0 %v22_v29  ;;  %585 = vmatpush.msrb.mxu1 %v87_v30  ;;  %v160_v51 = vld [vmem:[%s4496_s1 + $0x470] sm:$0xff]  ;;  %v225_v52 = vld [vmem:[%s4496_s1 + $0x678] sm:$0x7]  ;;  %v158_v53 = vld [vmem:[%s4496_s1 + $0x460] sm:$0xff] }
  0x13   :  { %2373 = vmatmul.msk.f32.vlgmr.msrb.gmra.mxu2 %vm274_vm1, %v2566_v13  ;;  %626 = vmatpush.msrb.mxu3 %v25_v31  ;;  %v223_v54 = vld [vmem:[%s4496_s1 + $0x668] sm:$0x7]  ;;  %v96_v55 = vld [vmem:[%s4496_s1 + $0x270] sm:$0xff]  ;;  %v161_v56 = vld [vmem:[%s4496_s1 + $0x478] sm:$0xff] }
  0x14   :  { %2380 = vmatpush.msk.msra.mxu2 %vm278_vm0, %v220_v32  ;;  %2369 = vmatmul.msk.f32.vlgmr.msrb.gmra.mxu0 %vm274_vm1, %v2566_v13  ;;  %v94_v57 = vld [vmem:[%s4496_s1 + $0x260] sm:$0xff]  ;;  %v159_v58 = vld [vmem:[%s4496_s1 + $0x468] sm:$0xff]  ;;  %v32_v59 = vld [vmem:[%s4496_s1 + $0x70] sm:$0xff] }
  0x15   :  { %586 = vmatpush.msrb.mxu1 %v23_v33  ;;  %2375 = vmatmul.msk.f32.vlgmr.msrb.gmra.mxu3 %vm274_vm1, %v2566_v13  ;;  %v97_v60 = vld [vmem:[%s4496_s1 + $0x278] sm:$0xff]  ;;  %v30_v61 = vld [vmem:[%s4496_s1 + $0x60] sm:$0xff]  ;;  %v95_v62 = vld [vmem:[%s4496_s1 + $0x268] sm:$0xff] }
  0x16   :  { %2376 = vmatpush.msk.msra.mxu0 %vm278_vm0, %v218_v34  ;;  %684 = vmatpush.msra.mxu2 %v156_v35  ;;  %v33_v63 = vld [vmem:[%s4496_s1 + $0x78] sm:$0xff]  ;;  %v228_v0 = vld [vmem:[%s4496_s1 + $0x690] sm:$0x7]  ;;  %v31_v1 = vld [vmem:[%s4496_s1 + $0x68] sm:$0xff] }
  0x17   :  { %2382 = vmatpush.msk.msra.mxu3 %vm278_vm0, %v221_v36  ;;  %2371 = vmatmul.msk.f32.vlgmr.msrb.gmra.mxu1 %vm274_vm1, %v2566_v13  ;;  %v226_v2 = vld [vmem:[%s4496_s1 + $0x680] sm:$0x7]  ;;  %v164_v3 = vld [vmem:[%s4496_s1 + $0x490] sm:$0xff]  ;;  %v229_v4 = vld [vmem:[%s4496_s1 + $0x698] sm:$0x7] }
  0x18   :  { %644 = vmatpush.msra.mxu0 %v154_v37  ;;  %2378 = vmatpush.msk.msra.mxu1 %vm278_vm0, %v219_v38  ;;  %v162_v5 = vld [vmem:[%s4496_s1 + $0x480] sm:$0xff]  ;;  %v227_v6 = vld [vmem:[%s4496_s1 + $0x688] sm:$0x7]  ;;  %v100_v7 = vld [vmem:[%s4496_s1 + $0x290] sm:$0xff] }
  0x19   :  { %685 = vmatpush.msra.mxu2 %v92_v39  ;;  %704 = vmatpush.msra.mxu3 %v157_v40  ;;  %v165_v8 = vld [vmem:[%s4496_s1 + $0x498] sm:$0xff]  ;;  %v98_v9 = vld [vmem:[%s4496_s1 + $0x280] sm:$0xff]  ;;  %v163_v10 = vld [vmem:[%s4496_s1 + $0x488] sm:$0xff] }
  0x1a   :  { %645 = vmatpush.msra.mxu0 %v90_v41  ;;  %664 = vmatpush.msra.mxu1 %v155_v42  ;;  %v36_v11 = vld [vmem:[%s4496_s1 + $0x90] sm:$0xff]  ;;  %v101_v12 = vld [vmem:[%s4496_s1 + $0x298] sm:$0xff]  ;;  %v34_v14 = vld [vmem:[%s4496_s1 + $0x80] sm:$0xff] }
  0x1b   :  { %686 = vmatpush.msra.mxu2 %v28_v43  ;;  %705 = vmatpush.msra.mxu3 %v93_v44  ;;  %v99_v15 = vld [vmem:[%s4496_s1 + $0x288] sm:$0xff]  ;;  %v37_v16 = vld [vmem:[%s4496_s1 + $0x98] sm:$0xff]  ;;  %v232_v17 = vld [vmem:[%s4496_s1 + $0x6b0] sm:$0x7] }
  0x1c   :  { %646 = vmatpush.msra.mxu0 %v26_v45  ;;  %665 = vmatpush.msra.mxu1 %v91_v46  ;;  %v35_v18 = vld [vmem:[%s4496_s1 + $0x88] sm:$0xff]  ;;  %v230_v19 = vld [vmem:[%s4496_s1 + $0x6a0] sm:$0x7]  ;;  %v168_v20 = vld [vmem:[%s4496_s1 + $0x4b0] sm:$0xff] }
  0x1d   :  { %2381 = vmatmul.msk.f32.vlgmr.msra.gmra.mxu2 %vm274_vm1, %v2566_v13  ;;  %706 = vmatpush.msra.mxu3 %v29_v47  ;;  %v233_v21 = vld [vmem:[%s4496_s1 + $0x6b8] sm:$0x7]  ;;  %v166_v22 = vld [vmem:[%s4496_s1 + $0x4a0] sm:$0xff]  ;;  %v231_v23 = vld [vmem:[%s4496_s1 + $0x6a8] sm:$0x7] }
  0x1e   :  { %2388 = vmatpush.msk.msrb.mxu2 %vm278_vm0, %v224_v48  ;;  %2377 = vmatmul.msk.f32.vlgmr.msra.gmra.mxu0 %vm274_vm1, %v2566_v13  ;;  %v104_v24 = vld [vmem:[%s4496_s1 + $0x2b0] sm:$0xff]  ;;  %v169_v25 = vld [vmem:[%s4496_s1 + $0x4b8] sm:$0xff]  ;;  %v102_v26 = vld [vmem:[%s4496_s1 + $0x2a0] sm:$0xff] }
  0x1f   :  { %666 = vmatpush.msra.mxu1 %v27_v49  ;;  %2383 = vmatmul.msk.f32.vlgmr.msra.gmra.mxu3 %vm274_vm1, %v2566_v13  ;;  %v167_v27 = vld [vmem:[%s4496_s1 + $0x4a8] sm:$0xff]  ;;  %v40_v28 = vld [vmem:[%s4496_s1 + $0xb0] sm:$0xff]  ;;  %v105_v29 = vld [vmem:[%s4496_s1 + $0x2b8] sm:$0xff] }
  0x20   :  { %2384 = vmatpush.msk.msrb.mxu0 %vm278_vm0, %v222_v50  ;;  %764 = vmatpush.msrb.mxu2 %v160_v51  ;;  %v38_v30 = vld [vmem:[%s4496_s1 + $0xa0] sm:$0xff]  ;;  %v103_v31 = vld [vmem:[%s4496_s1 + $0x2a8] sm:$0xff]  ;;  %v41_v32 = vld [vmem:[%s4496_s1 + $0xb8] sm:$0xff] }
  0x21   :  { %2390 = vmatpush.msk.msrb.mxu3 %vm278_vm0, %v225_v52  ;;  %2379 = vmatmul.msk.f32.vlgmr.msra.gmra.mxu1 %vm274_vm1, %v2566_v13  ;;  %v236_v33 = vld [vmem:[%s4496_s1 + $0x6d0] sm:$0x7]  ;;  %v39_v34 = vld [vmem:[%s4496_s1 + $0xa8] sm:$0xff]  ;;  %v234_v35 = vld [vmem:[%s4496_s1 + $0x6c0] sm:$0x7] }
  0x22   :  { %724 = vmatpush.msrb.mxu0 %v158_v53  ;;  %2386 = vmatpush.msk.msrb.mxu1 %vm278_vm0, %v223_v54  ;;  %v172_v36 = vld [vmem:[%s4496_s1 + $0x4d0] sm:$0xff]  ;;  %v237_v37 = vld [vmem:[%s4496_s1 + $0x6d8] sm:$0x7]  ;;  %v170_v38 = vld [vmem:[%s4496_s1 + $0x4c0] sm:$0xff] }
  0x23   :  { %765 = vmatpush.msrb.mxu2 %v96_v55  ;;  %784 = vmatpush.msrb.mxu3 %v161_v56  ;;  %v235_v39 = vld [vmem:[%s4496_s1 + $0x6c8] sm:$0x7]  ;;  %v108_v40 = vld [vmem:[%s4496_s1 + $0x2d0] sm:$0xff]  ;;  %v173_v41 = vld [vmem:[%s4496_s1 + $0x4d8] sm:$0xff] }
  0x24   :  { %725 = vmatpush.msrb.mxu0 %v94_v57  ;;  %744 = vmatpush.msrb.mxu1 %v159_v58  ;;  %v106_v42 = vld [vmem:[%s4496_s1 + $0x2c0] sm:$0xff]  ;;  %v171_v43 = vld [vmem:[%s4496_s1 + $0x4c8] sm:$0xff]  ;;  %v44_v44 = vld [vmem:[%s4496_s1 + $0xd0] sm:$0xff] }
  0x25   :  { %766 = vmatpush.msrb.mxu2 %v32_v59  ;;  %785 = vmatpush.msrb.mxu3 %v97_v60  ;;  %v109_v45 = vld [vmem:[%s4496_s1 + $0x2d8] sm:$0xff]  ;;  %v42_v46 = vld [vmem:[%s4496_s1 + $0xc0] sm:$0xff]  ;;  %v107_v47 = vld [vmem:[%s4496_s1 + $0x2c8] sm:$0xff] }
  0x26   :  { %726 = vmatpush.msrb.mxu0 %v30_v61  ;;  %745 = vmatpush.msrb.mxu1 %v95_v62  ;;  %v45_v48 = vld [vmem:[%s4496_s1 + $0xd8] sm:$0xff]  ;;  %v240_v49 = vld [vmem:[%s4496_s1 + $0x6f0] sm:$0x7]  ;;  %v43_v50 = vld [vmem:[%s4496_s1 + $0xc8] sm:$0xff] }
  0x27   :  { %2389 = vmatmul.msk.f32.vlgmr.msrb.gmra.mxu2 %vm274_vm1, %v2566_v13  ;;  %786 = vmatpush.msrb.mxu3 %v33_v63  ;;  %v238_v51 = vld [vmem:[%s4496_s1 + $0x6e0] sm:$0x7]  ;;  %v176_v52 = vld [vmem:[%s4496_s1 + $0x4f0] sm:$0xff]  ;;  %v241_v53 = vld [vmem:[%s4496_s1 + $0x6f8] sm:$0x7] }
  0x28   :  { %2396 = vmatpush.msk.msra.mxu2 %vm278_vm0, %v228_v0  ;;  %2385 = vmatmul.msk.f32.vlgmr.msrb.gmra.mxu0 %vm274_vm1, %v2566_v13  ;;  %v174_v54 = vld [vmem:[%s4496_s1 + $0x4e0] sm:$0xff]  ;;  %v239_v55 = vld [vmem:[%s4496_s1 + $0x6e8] sm:$0x7]  ;;  %v112_v56 = vld [vmem:[%s4496_s1 + $0x2f0] sm:$0xff] }
  0x29   :  { %746 = vmatpush.msrb.mxu1 %v31_v1  ;;  %2391 = vmatmul.msk.f32.vlgmr.msrb.gmra.mxu3 %vm274_vm1, %v2566_v13  ;;  %v177_v57 = vld [vmem:[%s4496_s1 + $0x4f8] sm:$0xff]  ;;  %v110_v58 = vld [vmem:[%s4496_s1 + $0x2e0] sm:$0xff]  ;;  %v175_v59 = vld [vmem:[%s4496_s1 + $0x4e8] sm:$0xff] }
  0x2a   :  { %2392 = vmatpush.msk.msra.mxu0 %vm278_vm0, %v226_v2  ;;  %844 = vmatpush.msra.mxu2 %v164_v3  ;;  %v48_v60 = vld [vmem:[%s4496_s1 + $0xf0] sm:$0xff]  ;;  %v113_v61 = vld [vmem:[%s4496_s1 + $0x2f8] sm:$0xff]  ;;  %v46_v62 = vld [vmem:[%s4496_s1 + $0xe0] sm:$0xff] }
  0x2b   :  { %2398 = vmatpush.msk.msra.mxu3 %vm278_vm0, %v229_v4  ;;  %2387 = vmatmul.msk.f32.vlgmr.msrb.gmra.mxu1 %vm274_vm1, %v2566_v13  ;;  %v111_v63 = vld [vmem:[%s4496_s1 + $0x2e8] sm:$0xff]  ;;  %v49_v0 = vld [vmem:[%s4496_s1 + $0xf8] sm:$0xff]  ;;  %v244_v1 = vld [vmem:[%s4496_s1 + $0x710] sm:$0x7] }
  0x2c   :  { %804 = vmatpush.msra.mxu0 %v162_v5  ;;  %2394 = vmatpush.msk.msra.mxu1 %vm278_vm0, %v227_v6  ;;  %v47_v2 = vld [vmem:[%s4496_s1 + $0xe8] sm:$0xff]  ;;  %v242_v3 = vld [vmem:[%s4496_s1 + $0x700] sm:$0x7]  ;;  %v180_v4 = vld [vmem:[%s4496_s1 + $0x510] sm:$0xff] }
  0x2d   :  { %845 = vmatpush.msra.mxu2 %v100_v7  ;;  %864 = vmatpush.msra.mxu3 %v165_v8  ;;  %v245_v5 = vld [vmem:[%s4496_s1 + $0x718] sm:$0x7]  ;;  %v178_v6 = vld [vmem:[%s4496_s1 + $0x500] sm:$0xff]  ;;  %v243_v7 = vld [vmem:[%s4496_s1 + $0x708] sm:$0x7] }
  0x2e   :  { %805 = vmatpush.msra.mxu0 %v98_v9  ;;  %824 = vmatpush.msra.mxu1 %v163_v10  ;;  %v116_v8 = vld [vmem:[%s4496_s1 + $0x310] sm:$0xff]  ;;  %v181_v9 = vld [vmem:[%s4496_s1 + $0x518] sm:$0xff]  ;;  %v114_v10 = vld [vmem:[%s4496_s1 + $0x300] sm:$0xff] }
  0x2f   :  { %846 = vmatpush.msra.mxu2 %v36_v11  ;;  %865 = vmatpush.msra.mxu3 %v101_v12  ;;  %v179_v11 = vld [vmem:[%s4496_s1 + $0x508] sm:$0xff]  ;;  %v52_v12 = vld [vmem:[%s4496_s1 + $0x110] sm:$0xff] }
  0x30   :  { %806 = vmatpush.msra.mxu0 %v34_v14  ;;  %825 = vmatpush.msra.mxu1 %v99_v15  ;;  %v117_v14 = vld [vmem:[%s4496_s1 + $0x318] sm:$0xff]  ;;  %v50_v15 = vld [vmem:[%s4496_s1 + $0x100] sm:$0xff] }
  0x31   :  { %2397 = vmatmul.msk.f32.vlgmr.msra.gmra.mxu2 %vm274_vm1, %v2566_v13  ;;  %866 = vmatpush.msra.mxu3 %v37_v16  ;;  %v115_v16 = vld [vmem:[%s4496_s1 + $0x308] sm:$0xff] }
  0x32   :  { %2404 = vmatpush.msk.msrb.mxu2 %vm278_vm0, %v232_v17  ;;  %2393 = vmatmul.msk.f32.vlgmr.msra.gmra.mxu0 %vm274_vm1, %v2566_v13  ;;  %v53_v17 = vld [vmem:[%s4496_s1 + $0x118] sm:$0xff] }
  0x33   :  { %826 = vmatpush.msra.mxu1 %v35_v18  ;;  %2399 = vmatmul.msk.f32.vlgmr.msra.gmra.mxu3 %vm274_vm1, %v2566_v13  ;;  %v248_v18 = vld [vmem:[%s4496_s1 + $0x730] sm:$0x7] }
  0x34   :  { %2400 = vmatpush.msk.msrb.mxu0 %vm278_vm0, %v230_v19  ;;  %924 = vmatpush.msrb.mxu2 %v168_v20  ;;  %v51_v19 = vld [vmem:[%s4496_s1 + $0x108] sm:$0xff]  ;;  %v246_v20 = vld [vmem:[%s4496_s1 + $0x720] sm:$0x7] }
  0x35   :  { %2406 = vmatpush.msk.msrb.mxu3 %vm278_vm0, %v233_v21  ;;  %2395 = vmatmul.msk.f32.vlgmr.msra.gmra.mxu1 %vm274_vm1, %v2566_v13  ;;  %v184_v21 = vld [vmem:[%s4496_s1 + $0x530] sm:$0xff] }
  0x36   :  { %884 = vmatpush.msrb.mxu0 %v166_v22  ;;  %2402 = vmatpush.msk.msrb.mxu1 %vm278_vm0, %v231_v23  ;;  %v249_v22 = vld [vmem:[%s4496_s1 + $0x738] sm:$0x7]  ;;  %v182_v23 = vld [vmem:[%s4496_s1 + $0x520] sm:$0xff] }
  0x37   :  { %925 = vmatpush.msrb.mxu2 %v104_v24  ;;  %944 = vmatpush.msrb.mxu3 %v169_v25  ;;  %v247_v24 = vld [vmem:[%s4496_s1 + $0x728] sm:$0x7]  ;;  %v120_v25 = vld [vmem:[%s4496_s1 + $0x330] sm:$0xff] }
  0x38   :  { %885 = vmatpush.msrb.mxu0 %v102_v26  ;;  %904 = vmatpush.msrb.mxu1 %v167_v27  ;;  %v185_v26 = vld [vmem:[%s4496_s1 + $0x538] sm:$0xff]  ;;  %v118_v27 = vld [vmem:[%s4496_s1 + $0x320] sm:$0xff] }
  0x39   :  { %926 = vmatpush.msrb.mxu2 %v40_v28  ;;  %945 = vmatpush.msrb.mxu3 %v105_v29  ;;  %v183_v28 = vld [vmem:[%s4496_s1 + $0x528] sm:$0xff]  ;;  %v56_v29 = vld [vmem:[%s4496_s1 + $0x130] sm:$0xff] }
  0x3a   :  { %886 = vmatpush.msrb.mxu0 %v38_v30  ;;  %905 = vmatpush.msrb.mxu1 %v103_v31  ;;  %v121_v30 = vld [vmem:[%s4496_s1 + $0x338] sm:$0xff]  ;;  %v54_v31 = vld [vmem:[%s4496_s1 + $0x120] sm:$0xff] }
  0x3b   :  { %2405 = vmatmul.msk.f32.vlgmr.msrb.gmra.mxu2 %vm274_vm1, %v2566_v13  ;;  %946 = vmatpush.msrb.mxu3 %v41_v32  ;;  %v119_v32 = vld [vmem:[%s4496_s1 + $0x328] sm:$0xff] }
  0x3c   :  { %2412 = vmatpush.msk.msra.mxu2 %vm278_vm0, %v236_v33  ;;  %2401 = vmatmul.msk.f32.vlgmr.msrb.gmra.mxu0 %vm274_vm1, %v2566_v13  ;;  %v57_v33 = vld [vmem:[%s4496_s1 + $0x138] sm:$0xff] }
  0x3d   :  { %906 = vmatpush.msrb.mxu1 %v39_v34  ;;  %2407 = vmatmul.msk.f32.vlgmr.msrb.gmra.mxu3 %vm274_vm1, %v2566_v13  ;;  %v252_v34 = vld [vmem:[%s4496_s1 + $0x750] sm:$0x7] }
  0x3e   :  { %2408 = vmatpush.msk.msra.mxu0 %vm278_vm0, %v234_v35  ;;  %1004 = vmatpush.msra.mxu2 %v172_v36  ;;  %v55_v35 = vld [vmem:[%s4496_s1 + $0x128] sm:$0xff]  ;;  %v250_v36 = vld [vmem:[%s4496_s1 + $0x740] sm:$0x7] }
  0x3f   :  { %2414 = vmatpush.msk.msra.mxu3 %vm278_vm0, %v237_v37  ;;  %2403 = vmatmul.msk.f32.vlgmr.msrb.gmra.mxu1 %vm274_vm1, %v2566_v13  ;;  %v188_v37 = vld [vmem:[%s4496_s1 + $0x550] sm:$0xff] }
  0x40   :  { %964 = vmatpush.msra.mxu0 %v170_v38  ;;  %2410 = vmatpush.msk.msra.mxu1 %vm278_vm0, %v235_v39  ;;  %v253_v38 = vld [vmem:[%s4496_s1 + $0x758] sm:$0x7]  ;;  %v186_v39 = vld [vmem:[%s4496_s1 + $0x540] sm:$0xff] }
  0x41   :  { %1005 = vmatpush.msra.mxu2 %v108_v40  ;;  %1024 = vmatpush.msra.mxu3 %v173_v41  ;;  %v251_v40 = vld [vmem:[%s4496_s1 + $0x748] sm:$0x7]  ;;  %v124_v41 = vld [vmem:[%s4496_s1 + $0x350] sm:$0xff] }
  0x42   :  { %965 = vmatpush.msra.mxu0 %v106_v42  ;;  %984 = vmatpush.msra.mxu1 %v171_v43  ;;  %v189_v42 = vld [vmem:[%s4496_s1 + $0x558] sm:$0xff]  ;;  %v122_v43 = vld [vmem:[%s4496_s1 + $0x340] sm:$0xff] }
  0x43   :  { %1006 = vmatpush.msra.mxu2 %v44_v44  ;;  %1025 = vmatpush.msra.mxu3 %v109_v45  ;;  %v187_v44 = vld [vmem:[%s4496_s1 + $0x548] sm:$0xff]  ;;  %v60_v45 = vld [vmem:[%s4496_s1 + $0x150] sm:$0xff] }
  0x44   :  { %966 = vmatpush.msra.mxu0 %v42_v46  ;;  %985 = vmatpush.msra.mxu1 %v107_v47  ;;  %v125_v46 = vld [vmem:[%s4496_s1 + $0x358] sm:$0xff]  ;;  %v58_v47 = vld [vmem:[%s4496_s1 + $0x140] sm:$0xff] }
  0x45   :  { %2413 = vmatmul.msk.f32.vlgmr.msra.gmra.mxu2 %vm274_vm1, %v2566_v13  ;;  %1026 = vmatpush.msra.mxu3 %v45_v48  ;;  %v123_v48 = vld [vmem:[%s4496_s1 + $0x348] sm:$0xff] }
  0x46   :  { %2420 = vmatpush.msk.msrb.mxu2 %vm278_vm0, %v240_v49  ;;  %2409 = vmatmul.msk.f32.vlgmr.msra.gmra.mxu0 %vm274_vm1, %v2566_v13  ;;  %v61_v49 = vld [vmem:[%s4496_s1 + $0x158] sm:$0xff] }
  0x47   :  { %986 = vmatpush.msra.mxu1 %v43_v50  ;;  %2415 = vmatmul.msk.f32.vlgmr.msra.gmra.mxu3 %vm274_vm1, %v2566_v13  ;;  %v256_v50 = vld [vmem:[%s4496_s1 + $0x770] sm:$0x7] }
  0x48   :  { %2416 = vmatpush.msk.msrb.mxu0 %vm278_vm0, %v238_v51  ;;  %1084 = vmatpush.msrb.mxu2 %v176_v52  ;;  %v59_v51 = vld [vmem:[%s4496_s1 + $0x148] sm:$0xff]  ;;  %v254_v52 = vld [vmem:[%s4496_s1 + $0x760] sm:$0x7] }
  0x49   :  { %2422 = vmatpush.msk.msrb.mxu3 %vm278_vm0, %v241_v53  ;;  %2411 = vmatmul.msk.f32.vlgmr.msra.gmra.mxu1 %vm274_vm1, %v2566_v13  ;;  %v192_v53 = vld [vmem:[%s4496_s1 + $0x570] sm:$0xff] }
  0x4a   :  { %1044 = vmatpush.msrb.mxu0 %v174_v54  ;;  %2418 = vmatpush.msk.msrb.mxu1 %vm278_vm0, %v239_v55  ;;  %v257_v54 = vld [vmem:[%s4496_s1 + $0x778] sm:$0x7]  ;;  %v190_v55 = vld [vmem:[%s4496_s1 + $0x560] sm:$0xff] }
  0x4b   :  { %1085 = vmatpush.msrb.mxu2 %v112_v56  ;;  %1104 = vmatpush.msrb.mxu3 %v177_v57  ;;  %v255_v56 = vld [vmem:[%s4496_s1 + $0x768] sm:$0x7]  ;;  %v128_v57 = vld [vmem:[%s4496_s1 + $0x370] sm:$0xff] }
  0x4c   :  { %1045 = vmatpush.msrb.mxu0 %v110_v58  ;;  %1064 = vmatpush.msrb.mxu1 %v175_v59  ;;  %v193_v58 = vld [vmem:[%s4496_s1 + $0x578] sm:$0xff]  ;;  %v126_v59 = vld [vmem:[%s4496_s1 + $0x360] sm:$0xff] }
  0x4d   :  { %1086 = vmatpush.msrb.mxu2 %v48_v60  ;;  %1105 = vmatpush.msrb.mxu3 %v113_v61  ;;  %v191_v60 = vld [vmem:[%s4496_s1 + $0x568] sm:$0xff]  ;;  %v64_v61 = vld [vmem:[%s4496_s1 + $0x170] sm:$0xff] }
  0x4e   :  { %1046 = vmatpush.msrb.mxu0 %v46_v62  ;;  %1065 = vmatpush.msrb.mxu1 %v111_v63  ;;  %v129_v62 = vld [vmem:[%s4496_s1 + $0x378] sm:$0xff]  ;;  %v62_v63 = vld [vmem:[%s4496_s1 + $0x160] sm:$0xff] }
  0x4f   :  { %2421 = vmatmul.msk.f32.vlgmr.msrb.gmra.mxu2 %vm274_vm1, %v2566_v13  ;;  %1106 = vmatpush.msrb.mxu3 %v49_v0  ;;  %v127_v0 = vld [vmem:[%s4496_s1 + $0x368] sm:$0xff] }
  0x50   :  { %2428 = vmatpush.msk.msra.mxu2 %vm278_vm0, %v244_v1  ;;  %2417 = vmatmul.msk.f32.vlgmr.msrb.gmra.mxu0 %vm274_vm1, %v2566_v13  ;;  %v65_v1 = vld [vmem:[%s4496_s1 + $0x178] sm:$0xff] }
  0x51   :  { %1066 = vmatpush.msrb.mxu1 %v47_v2  ;;  %2423 = vmatmul.msk.f32.vlgmr.msrb.gmra.mxu3 %vm274_vm1, %v2566_v13  ;;  %v260_v2 = vld [vmem:[%s4496_s1 + $0x790] sm:$0x7] }
  0x52   :  { %2424 = vmatpush.msk.msra.mxu0 %vm278_vm0, %v242_v3  ;;  %1164 = vmatpush.msra.mxu2 %v180_v4  ;;  %v63_v3 = vld [vmem:[%s4496_s1 + $0x168] sm:$0xff]  ;;  %v258_v4 = vld [vmem:[%s4496_s1 + $0x780] sm:$0x7] }
  0x53   :  { %2430 = vmatpush.msk.msra.mxu3 %vm278_vm0, %v245_v5  ;;  %2419 = vmatmul.msk.f32.vlgmr.msrb.gmra.mxu1 %vm274_vm1, %v2566_v13  ;;  %v196_v5 = vld [vmem:[%s4496_s1 + $0x590] sm:$0xff] }
  0x54   :  { %1124 = vmatpush.msra.mxu0 %v178_v6  ;;  %2426 = vmatpush.msk.msra.mxu1 %vm278_vm0, %v243_v7  ;;  %v261_v6 = vld [vmem:[%s4496_s1 + $0x798] sm:$0x7]  ;;  %v194_v7 = vld [vmem:[%s4496_s1 + $0x580] sm:$0xff] }
  0x55   :  { %1165 = vmatpush.msra.mxu2 %v116_v8  ;;  %1184 = vmatpush.msra.mxu3 %v181_v9  ;;  %v259_v8 = vld [vmem:[%s4496_s1 + $0x788] sm:$0x7]  ;;  %v132_v9 = vld [vmem:[%s4496_s1 + $0x390] sm:$0xff] }
  0x56   :  { %1125 = vmatpush.msra.mxu0 %v114_v10  ;;  %1144 = vmatpush.msra.mxu1 %v179_v11  ;;  %v197_v10 = vld [vmem:[%s4496_s1 + $0x598] sm:$0xff]  ;;  %v130_v11 = vld [vmem:[%s4496_s1 + $0x380] sm:$0xff] }
  0x57   :  { %1166 = vmatpush.msra.mxu2 %v52_v12  ;;  %1185 = vmatpush.msra.mxu3 %v117_v14  ;;  %v195_v12 = vld [vmem:[%s4496_s1 + $0x588] sm:$0xff]  ;;  %v68_v14 = vld [vmem:[%s4496_s1 + $0x190] sm:$0xff] }
  0x58   :  { %1126 = vmatpush.msra.mxu0 %v50_v15  ;;  %1145 = vmatpush.msra.mxu1 %v115_v16  ;;  %v133_v15 = vld [vmem:[%s4496_s1 + $0x398] sm:$0xff]  ;;  %v66_v16 = vld [vmem:[%s4496_s1 + $0x180] sm:$0xff] }
  0x59   :  { %2429 = vmatmul.msk.f32.vlgmr.msra.gmra.mxu2 %vm274_vm1, %v2566_v13  ;;  %1186 = vmatpush.msra.mxu3 %v53_v17  ;;  %v131_v17 = vld [vmem:[%s4496_s1 + $0x388] sm:$0xff] }
  0x5a   :  { %2436 = vmatpush.msk.msrb.mxu2 %vm278_vm0, %v248_v18  ;;  %2425 = vmatmul.msk.f32.vlgmr.msra.gmra.mxu0 %vm274_vm1, %v2566_v13  ;;  %v69_v18 = vld [vmem:[%s4496_s1 + $0x198] sm:$0xff] }
  0x5b   :  { %1146 = vmatpush.msra.mxu1 %v51_v19  ;;  %2431 = vmatmul.msk.f32.vlgmr.msra.gmra.mxu3 %vm274_vm1, %v2566_v13  ;;  %v264_v19 = vld [vmem:[%s4496_s1 + $0x7b0] sm:$0x7] }
  0x5c   :  { %2432 = vmatpush.msk.msrb.mxu0 %vm278_vm0, %v246_v20  ;;  %1244 = vmatpush.msrb.mxu2 %v184_v21  ;;  %v67_v20 = vld [vmem:[%s4496_s1 + $0x188] sm:$0xff]  ;;  %v262_v21 = vld [vmem:[%s4496_s1 + $0x7a0] sm:$0x7] }
  0x5d   :  { %2438 = vmatpush.msk.msrb.mxu3 %vm278_vm0, %v249_v22  ;;  %2427 = vmatmul.msk.f32.vlgmr.msra.gmra.mxu1 %vm274_vm1, %v2566_v13  ;;  %v200_v22 = vld [vmem:[%s4496_s1 + $0x5b0] sm:$0xff] }
  0x5e   :  { %1204 = vmatpush.msrb.mxu0 %v182_v23  ;;  %2434 = vmatpush.msk.msrb.mxu1 %vm278_vm0, %v247_v24  ;;  %v265_v23 = vld [vmem:[%s4496_s1 + $0x7b8] sm:$0x7]  ;;  %v198_v24 = vld [vmem:[%s4496_s1 + $0x5a0] sm:$0xff] }
  0x5f   :  { %1245 = vmatpush.msrb.mxu2 %v120_v25  ;;  %1264 = vmatpush.msrb.mxu3 %v185_v26  ;;  %v263_v25 = vld [vmem:[%s4496_s1 + $0x7a8] sm:$0x7]  ;;  %v136_v26 = vld [vmem:[%s4496_s1 + $0x3b0] sm:$0xff] }
  0x60   :  { %1205 = vmatpush.msrb.mxu0 %v118_v27  ;;  %1224 = vmatpush.msrb.mxu1 %v183_v28  ;;  %v201_v27 = vld [vmem:[%s4496_s1 + $0x5b8] sm:$0xff]  ;;  %v134_v28 = vld [vmem:[%s4496_s1 + $0x3a0] sm:$0xff] }
  0x61   :  { %1246 = vmatpush.msrb.mxu2 %v56_v29  ;;  %1265 = vmatpush.msrb.mxu3 %v121_v30  ;;  %v199_v29 = vld [vmem:[%s4496_s1 + $0x5a8] sm:$0xff]  ;;  %v72_v30 = vld [vmem:[%s4496_s1 + $0x1b0] sm:$0xff] }
  0x62   :  { %1206 = vmatpush.msrb.mxu0 %v54_v31  ;;  %1225 = vmatpush.msrb.mxu1 %v119_v32  ;;  %v137_v31 = vld [vmem:[%s4496_s1 + $0x3b8] sm:$0xff]  ;;  %v70_v32 = vld [vmem:[%s4496_s1 + $0x1a0] sm:$0xff] }
  0x63   :  { %2437 = vmatmul.msk.f32.vlgmr.msrb.gmra.mxu2 %vm274_vm1, %v2566_v13  ;;  %1266 = vmatpush.msrb.mxu3 %v57_v33  ;;  %v135_v33 = vld [vmem:[%s4496_s1 + $0x3a8] sm:$0xff] }
  0x64   :  { %2444 = vmatpush.msk.msra.mxu2 %vm278_vm0, %v252_v34  ;;  %2433 = vmatmul.msk.f32.vlgmr.msrb.gmra.mxu0 %vm274_vm1, %v2566_v13  ;;  %v73_v34 = vld [vmem:[%s4496_s1 + $0x1b8] sm:$0xff] }
  0x65   :  { %1226 = vmatpush.msrb.mxu1 %v55_v35  ;;  %2439 = vmatmul.msk.f32.vlgmr.msrb.gmra.mxu3 %vm274_vm1, %v2566_v13 }
  0x66   :  { %2440 = vmatpush.msk.msra.mxu0 %vm278_vm0, %v250_v36  ;;  %1324 = vmatpush.msra.mxu2 %v188_v37  ;;  %v268_v37 = vld [vmem:[%s4496_s1 + $0x7d0] sm:$0x7] }
  0x67   :  { %2446 = vmatpush.msk.msra.mxu3 %vm278_vm0, %v253_v38  ;;  %2435 = vmatmul.msk.f32.vlgmr.msrb.gmra.mxu1 %vm274_vm1, %v2566_v13 }
  0x68   :  { %1284 = vmatpush.msra.mxu0 %v186_v39  ;;  %2442 = vmatpush.msk.msra.mxu1 %vm278_vm0, %v251_v40  ;;  %v71_v40 = vld [vmem:[%s4496_s1 + $0x1a8] sm:$0xff] }
  0x69   :  { %1325 = vmatpush.msra.mxu2 %v124_v41  ;;  %1344 = vmatpush.msra.mxu3 %v189_v42  ;;  %v266_v41 = vld [vmem:[%s4496_s1 + $0x7c0] sm:$0x7]  ;;  %v204_v42 = vld [vmem:[%s4496_s1 + $0x5d0] sm:$0xff] }
  0x6a   :  { %1285 = vmatpush.msra.mxu0 %v122_v43  ;;  %1304 = vmatpush.msra.mxu1 %v187_v44  ;;  %v269_v44 = vld [vmem:[%s4496_s1 + $0x7d8] sm:$0x7] }
  0x6b   :  { %1326 = vmatpush.msra.mxu2 %v60_v45  ;;  %1345 = vmatpush.msra.mxu3 %v125_v46  ;;  %v202_v46 = vld [vmem:[%s4496_s1 + $0x5c0] sm:$0xff] }
  0x6c   :  { %1286 = vmatpush.msra.mxu0 %v58_v47  ;;  %1305 = vmatpush.msra.mxu1 %v123_v48  ;;  %v267_v47 = vld [vmem:[%s4496_s1 + $0x7c8] sm:$0x7] }
  0x6d   :  { %2445 = vmatmul.msk.f32.vlgmr.msra.gmra.mxu2 %vm274_vm1, %v2566_v13  ;;  %1346 = vmatpush.msra.mxu3 %v61_v49 }
  0x6e   :  { %2452 = vmatpush.msk.msrb.mxu2 %vm278_vm0, %v256_v50  ;;  %2441 = vmatmul.msk.f32.vlgmr.msra.gmra.mxu0 %vm274_vm1, %v2566_v13 }
  0x6f   :  { %1306 = vmatpush.msra.mxu1 %v59_v51  ;;  %2447 = vmatmul.msk.f32.vlgmr.msra.gmra.mxu3 %vm274_vm1, %v2566_v13  ;;  %v140_v51 = vld [vmem:[%s4496_s1 + $0x3d0] sm:$0xff] }
  0x70   :  { %2448 = vmatpush.msk.msrb.mxu0 %vm278_vm0, %v254_v52  ;;  %1404 = vmatpush.msrb.mxu2 %v192_v53  ;;  %v205_v52 = vld [vmem:[%s4496_s1 + $0x5d8] sm:$0xff]  ;;  %v138_v53 = vld [vmem:[%s4496_s1 + $0x3c0] sm:$0xff] }
  0x71   :  { %2454 = vmatpush.msk.msrb.mxu3 %vm278_vm0, %v257_v54  ;;  %2443 = vmatmul.msk.f32.vlgmr.msra.gmra.mxu1 %vm274_vm1, %v2566_v13  ;;  %v203_v54 = vld [vmem:[%s4496_s1 + $0x5c8] sm:$0xff] }
  0x72   :  { %1364 = vmatpush.msrb.mxu0 %v190_v55  ;;  %2450 = vmatpush.msk.msrb.mxu1 %vm278_vm0, %v255_v56 }
  0x73   :  { %1405 = vmatpush.msrb.mxu2 %v128_v57  ;;  %1424 = vmatpush.msrb.mxu3 %v193_v58  ;;  %v76_v57 = vld [vmem:[%s4496_s1 + $0x1d0] sm:$0xff] }
  0x74   :  { %1365 = vmatpush.msrb.mxu0 %v126_v59  ;;  %1384 = vmatpush.msrb.mxu1 %v191_v60  ;;  %v74_v60 = vld [vmem:[%s4496_s1 + $0x1c0] sm:$0xff] }
  0x75   :  { %1406 = vmatpush.msrb.mxu2 %v64_v61  ;;  %1425 = vmatpush.msrb.mxu3 %v129_v62  ;;  %v139_v61 = vld [vmem:[%s4496_s1 + $0x3c8] sm:$0xff] }
  0x76   :  { %1366 = vmatpush.msrb.mxu0 %v62_v63  ;;  %1385 = vmatpush.msrb.mxu1 %v127_v0  ;;  %v77_v63 = vld [vmem:[%s4496_s1 + $0x1d8] sm:$0xff] }
  0x77   :  { %2453 = vmatmul.msk.f32.vlgmr.msrb.gmra.mxu2 %vm274_vm1, %v2566_v13  ;;  %1426 = vmatpush.msrb.mxu3 %v65_v1 }
  0x78   :  { %2460 = vmatpush.msk.msra.mxu2 %vm278_vm0, %v260_v2  ;;  %2449 = vmatmul.msk.f32.vlgmr.msrb.gmra.mxu0 %vm274_vm1, %v2566_v13 }
  0x79   :  { %1386 = vmatpush.msrb.mxu1 %v63_v3  ;;  %2455 = vmatmul.msk.f32.vlgmr.msrb.gmra.mxu3 %vm274_vm1, %v2566_v13  ;;  %v272_v3 = vld [vmem:[%s4496_s1 + $0x7f0] sm:$0x7] }
  0x7a   :  { %2456 = vmatpush.msk.msra.mxu0 %vm278_vm0, %v258_v4  ;;  %1484 = vmatpush.msra.mxu2 %v196_v5  ;;  %v75_v4 = vld [vmem:[%s4496_s1 + $0x1c8] sm:$0xff] }
  0x7b   :  { %2462 = vmatpush.msk.msra.mxu3 %vm278_vm0, %v261_v6  ;;  %2451 = vmatmul.msk.f32.vlgmr.msrb.gmra.mxu1 %vm274_vm1, %v2566_v13 }
  0x7c   :  { %1444 = vmatpush.msra.mxu0 %v194_v7  ;;  %2458 = vmatpush.msk.msra.mxu1 %vm278_vm0, %v259_v8  ;;  %v2493_v7 = vld [vmem:[%s4497_s0] sm:$0xff] }
  0x7d   :  { %1485 = vmatpush.msra.mxu2 %v132_v9  ;;  %1504 = vmatpush.msra.mxu3 %v197_v10  ;;  %v270_v8 = vld [vmem:[%s4496_s1 + $0x7e0] sm:$0x7]  ;;  %v208_v9 = vld [vmem:[%s4496_s1 + $0x5f0] sm:$0xff] }
  0x7e   :  { %1445 = vmatpush.msra.mxu0 %v130_v11  ;;  %1464 = vmatpush.msra.mxu1 %v195_v12  ;;  %v273_v12 = vld [vmem:[%s4496_s1 + $0x7f8] sm:$0x7] }
  0x7f   :  { %1486 = vmatpush.msra.mxu2 %v68_v14  ;;  %1505 = vmatpush.msra.mxu3 %v133_v15  ;;  %v206_v15 = vld [vmem:[%s4496_s1 + $0x5e0] sm:$0xff] }
  0x80   :  { %1446 = vmatpush.msra.mxu0 %v66_v16  ;;  %1465 = vmatpush.msra.mxu1 %v131_v17  ;;  %v271_v16 = vld [vmem:[%s4496_s1 + $0x7e8] sm:$0x7] }
  0x81   :  { %2461 = vmatmul.msk.f32.vlgmr.msra.gmra.mxu2 %vm274_vm1, %v2566_v13  ;;  %1506 = vmatpush.msra.mxu3 %v69_v18 }
  0x82   :  { %2468 = vmatpush.msk.msrb.mxu2 %vm278_vm0, %v264_v19  ;;  %2457 = vmatmul.msk.f32.vlgmr.msra.gmra.mxu0 %vm274_vm1, %v2566_v13 }
  0x83   :  { %1466 = vmatpush.msra.mxu1 %v67_v20  ;;  %2463 = vmatmul.msk.f32.vlgmr.msra.gmra.mxu3 %vm274_vm1, %v2566_v13  ;;  %v144_v20 = vld [vmem:[%s4496_s1 + $0x3f0] sm:$0xff] }
  0x84   :  { %2464 = vmatpush.msk.msrb.mxu0 %vm278_vm0, %v262_v21  ;;  %1564 = vmatpush.msrb.mxu2 %v200_v22  ;;  %v209_v21 = vld [vmem:[%s4496_s1 + $0x5f8] sm:$0xff] }
  0x85   :  { %2470 = vmatpush.msk.msrb.mxu3 %vm278_vm0, %v265_v23  ;;  %2459 = vmatmul.msk.f32.vlgmr.msra.gmra.mxu1 %vm274_vm1, %v2566_v13  ;;  %v142_v23 = vld [vmem:[%s4496_s1 + $0x3e0] sm:$0xff] }
  0x86   :  { %1524 = vmatpush.msrb.mxu0 %v198_v24  ;;  %2466 = vmatpush.msk.msrb.mxu1 %vm278_vm0, %v263_v25  ;;  %v207_v24 = vld [vmem:[%s4496_s1 + $0x5e8] sm:$0xff] }
  0x87   :  { %1565 = vmatpush.msrb.mxu2 %v136_v26  ;;  %1584 = vmatpush.msrb.mxu3 %v201_v27 }
  0x88   :  { %1525 = vmatpush.msrb.mxu0 %v134_v28  ;;  %1544 = vmatpush.msrb.mxu1 %v199_v29  ;;  %v3354_v35 = vpop.f32.mrf.mxu0  ;;  %v3356_v36 = vpop.f32.mrf.mxu1  ;;  %v80_v28 = vld [vmem:[%s4496_s1 + $0x1f0] sm:$0xff]  ;;  %v145_v29 = vld [vmem:[%s4496_s1 + $0x3f8] sm:$0xff] }
  0x89   :  { %1566 = vmatpush.msrb.mxu2 %v72_v30  ;;  %1585 = vmatpush.msrb.mxu3 %v137_v31  ;;  %v1816_v38 = vmul.f32 %v3354_v35, %v3354_v35  ;;  %v1817_v39 = vmul.f32 %v3356_v36, %v3356_v36  ;;  %v1751_v43 = vadd.f32 %v3356_v36, %v3354_v35  ;;  %v78_v30 = vld [vmem:[%s4496_s1 + $0x1e0] sm:$0xff]  ;;  %v143_v31 = vld [vmem:[%s4496_s1 + $0x3e8] sm:$0xff] }
  0x8a   :  { %1526 = vmatpush.msrb.mxu0 %v70_v32  ;;  %1545 = vmatpush.msrb.mxu1 %v135_v33 }
  0x8b   :  { %2469 = vmatmul.msk.f32.vlgmr.msrb.gmra.mxu2 %vm274_vm1, %v2566_v13  ;;  %1586 = vmatpush.msrb.mxu3 %v73_v34  ;;  %v1880_v48 = vadd.f32 %v1817_v39, %v1816_v38  ;;  %v81_v34 = vld [vmem:[%s4496_s1 + $0x1f8] sm:$0xff]  ;;  %v79_v39 = vld [vmem:[%s4496_s1 + $0x1e8] sm:$0xff] }
  0x8c   :  { %2476 = vmatpush.msk.msra.mxu2 %vm278_vm0, %v268_v37  ;;  %2465 = vmatmul.msk.f32.vlgmr.msrb.gmra.mxu0 %vm274_vm1, %v2566_v13  ;;  %v3384_v45 = vpop.f32.mrf.mxu2 }
  0x8d   :  { %1546 = vmatpush.msrb.mxu1 %v71_v40  ;;  %2471 = vmatmul.msk.f32.vlgmr.msrb.gmra.mxu3 %vm274_vm1, %v2566_v13  ;;  %v1752_v49 = vadd.f32 %v1751_v43, %v3384_v45  ;;  %v1818_v50 = vmul.f32 %v3384_v45, %v3384_v45 }
  0x8e   :  { %2472 = vmatpush.msk.msra.mxu0 %vm278_vm0, %v266_v41  ;;  %1644 = vmatpush.msra.mxu2 %v204_v42 }
  0x8f   :  { %2478 = vmatpush.msk.msra.mxu3 %vm278_vm0, %v269_v44  ;;  %2467 = vmatmul.msk.f32.vlgmr.msrb.gmra.mxu1 %vm274_vm1, %v2566_v13  ;;  %v1881_v55 = vadd.f32 %v1880_v48, %v1818_v50  ;;  %v3413_v56 = vpop.f32.mrf.mxu3  ;;  %v141_v13 = vld [vmem:[%s4496_s1 + $0x3d8] sm:$0xff] }
  0x90   :  { %1604 = vmatpush.msra.mxu0 %v202_v46  ;;  %2474 = vmatpush.msk.msra.mxu1 %vm278_vm0, %v267_v47  ;;  %v1753_v58 = vadd.f32 %v1752_v49, %v3413_v56  ;;  %v1819_v59 = vmul.f32 %v3413_v56, %v3413_v56 }
  0x91   :  { %1645 = vmatpush.msra.mxu2 %v140_v51  ;;  %1664 = vmatpush.msra.mxu3 %v205_v52  ;;  %v3431_v62 = vpop.f32.mrf.mxu0 }
  0x92   :  { %1605 = vmatpush.msra.mxu0 %v138_v53  ;;  %1624 = vmatpush.msra.mxu1 %v203_v54  ;;  %v1882_v0 = vadd.f32 %v1881_v55, %v1819_v59  ;;  %v1754_v1 = vadd.f32 %v1753_v58, %v3431_v62  ;;  %v1820_v2 = vmul.f32 %v3431_v62, %v3431_v62 }
  0x93   :  { %1646 = vmatpush.msra.mxu2 %v76_v57  ;;  %1665 = vmatpush.msra.mxu3 %v141_v13 }
  0x94   :  { %1606 = vmatpush.msra.mxu0 %v74_v60  ;;  %1625 = vmatpush.msra.mxu1 %v139_v61  ;;  %v1883_v5 = vadd.f32 %v1882_v0, %v1820_v2  ;;  %v3445_v6 = vpop.f32.mrf.mxu1 }
  0x95   :  { %2477 = vmatmul.msk.f32.vlgmr.msra.gmra.mxu2 %vm274_vm1, %v2493_v7  ;;  %1666 = vmatpush.msra.mxu3 %v77_v63  ;;  %v1755_v10 = vadd.f32 %v1754_v1, %v3445_v6  ;;  %v1821_v11 = vmul.f32 %v3445_v6, %v3445_v6 }
  0x96   :  { %2484 = vmatpush.msk.msrb.mxu2 %vm278_vm0, %v272_v3  ;;  %2473 = vmatmul.msk.f32.vlgmr.msra.gmra.mxu0 %vm274_vm1, %v2493_v7  ;;  %v3465_v14 = vpop.f32.mrf.mxu2 }
  0x97   :  { %1626 = vmatpush.msra.mxu1 %v75_v4  ;;  %2479 = vmatmul.msk.f32.vlgmr.msra.gmra.mxu3 %vm274_vm1, %v2493_v7  ;;  %v1884_v17 = vadd.f32 %v1883_v5, %v1821_v11  ;;  %v1756_v18 = vadd.f32 %v1755_v10, %v3465_v14  ;;  %v1822_v19 = vmul.f32 %v3465_v14, %v3465_v14 }
  0x98   :  { %2480 = vmatpush.msk.msrb.mxu0 %vm278_vm0, %v270_v8  ;;  %1724 = vmatpush.msrb.mxu2 %v208_v9  ;;  %v3484_v22 = vpop.f32.mrf.mxu3 }
  0x99   :  { %2486 = vmatpush.msk.msrb.mxu3 %vm278_vm0, %v273_v12  ;;  %2475 = vmatmul.msk.f32.vlgmr.msra.gmra.mxu1 %vm274_vm1, %v2493_v7  ;;  %v1885_v25 = vadd.f32 %v1884_v17, %v1822_v19  ;;  %v1757_v26 = vadd.f32 %v1756_v18, %v3484_v22  ;;  %v1823_v27 = vmul.f32 %v3484_v22, %v3484_v22 }
  0x9a   :  { %1684 = vmatpush.msrb.mxu0 %v206_v15  ;;  %2482 = vmatpush.msk.msrb.mxu1 %vm278_vm0, %v271_v16 }
  0x9b   :  { %1725 = vmatpush.msrb.mxu2 %v144_v20  ;;  %1744 = vmatpush.msrb.mxu3 %v209_v21  ;;  %v1886_v32 = vadd.f32 %v1885_v25, %v1823_v27  ;;  %v3510_v33 = vpop.f32.mrf.mxu0 }
  0x9c   :  { %1685 = vmatpush.msrb.mxu0 %v142_v23  ;;  %1704 = vmatpush.msrb.mxu1 %v207_v24  ;;  %v1758_v37 = vadd.f32 %v1757_v26, %v3510_v33  ;;  %v1824_v38 = vmul.f32 %v3510_v33, %v3510_v33 }
  0x9d   :  { %1726 = vmatpush.msrb.mxu2 %v80_v28  ;;  %1745 = vmatpush.msrb.mxu3 %v145_v29 }
  0x9e   :  { %1686 = vmatpush.msrb.mxu0 %v78_v30  ;;  %1705 = vmatpush.msrb.mxu1 %v143_v31  ;;  %v1887_v40 = vadd.f32 %v1886_v32, %v1824_v38  ;;  %v3521_v41 = vpop.f32.mrf.mxu1 }
  0x9f   :  { %2485 = vmatmul.msk.f32.vlgmr.msrb.gmra.mxu2 %vm274_vm1, %v2493_v7  ;;  %1746 = vmatpush.msrb.mxu3 %v81_v34  ;;  %v1759_v42 = vadd.f32 %v1758_v37, %v3521_v41  ;;  %v1825_v43 = vmul.f32 %v3521_v41, %v3521_v41 }
  0xa0   :  { %2481 = vmatmul.msk.f32.vlgmr.msrb.gmra.mxu0 %vm274_vm1, %v2493_v7  ;;  %1706 = vmatpush.msrb.mxu1 %v79_v39  ;;  %v3528_v44 = vpop.f32.mrf.mxu2 }
  0xa1   :  { %2487 = vmatmul.msk.f32.vlgmr.msrb.gmra.mxu3 %vm274_vm1, %v2493_v7  ;;  %2483 = vmatmul.msk.f32.vlgmr.msrb.gmra.mxu1 %vm274_vm1, %v2493_v7  ;;  %v1888_v46 = vadd.f32 %v1887_v40, %v1825_v43  ;;  %v1760_v47 = vadd.f32 %v1759_v42, %v3528_v44  ;;  %v1826_v48 = vmul.f32 %v3528_v44, %v3528_v44 }
  0xa2   :  { %v3535_v49 = vpop.f32.mrf.mxu3 }
  0xa3   :  { %v1889_v50 = vadd.f32 %v1888_v46, %v1826_v48  ;;  %v1761_v51 = vadd.f32 %v1760_v47, %v3535_v49  ;;  %v1827_v52 = vmul.f32 %v3535_v49, %v3535_v49 }
  0xa5   :  { %v1890_v53 = vadd.f32 %v1889_v50, %v1827_v52  ;;  %v3540_v54 = vpop.f32.mrf.mxu0 }
  0xa6   :  { %v1762_v55 = vadd.f32 %v1761_v51, %v3540_v54  ;;  %v1828_v57 = vmul.f32 %v3540_v54, %v3540_v54 }
  0xa8   :  { %v1891_v13 = vadd.f32 %v1890_v53, %v1828_v57  ;;  %v3545_v58 = vpop.f32.mrf.mxu1 }
  0xa9   :  { %v1763_v59 = vadd.f32 %v1762_v55, %v3545_v58  ;;  %v1829_v60 = vmul.f32 %v3545_v58, %v3545_v58 }
  0xaa   :  { %v3550_v61 = vpop.f32.mrf.mxu2 }
  0xab   :  { %v1892_v63 = vadd.f32 %v1891_v13, %v1829_v60  ;;  %v1764_v0 = vadd.f32 %v1763_v59, %v3550_v61  ;;  %v1830_v1 = vmul.f32 %v3550_v61, %v3550_v61 }
  0xac   :  { %v3555_v2 = vpop.f32.mrf.mxu3 }
  0xad   :  { %v1893_v3 = vadd.f32 %v1892_v63, %v1830_v1  ;;  %v1765_v4 = vadd.f32 %v1764_v0, %v3555_v2  ;;  %v1831_v5 = vmul.f32 %v3555_v2, %v3555_v2 }
  0xaf   :  { %v1894_v7 = vadd.f32 %v1893_v3, %v1831_v5  ;;  %v3560_v8 = vpop.f32.mrf.mxu0 }
  0xb0   :  { %v1766_v9 = vadd.f32 %v1765_v4, %v3560_v8  ;;  %v1832_v10 = vmul.f32 %v3560_v8, %v3560_v8 }
  0xb2   :  { %v1895_v11 = vadd.f32 %v1894_v7, %v1832_v10  ;;  %v3565_v12 = vpop.f32.mrf.mxu1 }
  0xb3   :  { %v1767_v15 = vadd.f32 %v1766_v9, %v3565_v12  ;;  %v1833_v16 = vmul.f32 %v3565_v12, %v3565_v12 }
  0xb4   :  { %v3570_v17 = vpop.f32.mrf.mxu2 }
  0xb5   :  { %v1896_v18 = vadd.f32 %v1895_v11, %v1833_v16  ;;  %v1768_v19 = vadd.f32 %v1767_v15, %v3570_v17  ;;  %v1834_v20 = vmul.f32 %v3570_v17, %v3570_v17 }
  0xb6   :  { %v3575_v21 = vpop.f32.mrf.mxu3 }
  0xb7   :  { %v1897_v23 = vadd.f32 %v1896_v18, %v1834_v20  ;;  %v1769_v24 = vadd.f32 %v1768_v19, %v3575_v21  ;;  %v1835_v25 = vmul.f32 %v3575_v21, %v3575_v21 }
  0xb9   :  { %v1898_v26 = vadd.f32 %v1897_v23, %v1835_v25  ;;  %v3580_v27 = vpop.f32.mrf.mxu0 }
  0xba   :  { %v1770_v28 = vadd.f32 %v1769_v24, %v3580_v27  ;;  %v1836_v29 = vmul.f32 %v3580_v27, %v3580_v27 }
  0xbc   :  { %v1899_v30 = vadd.f32 %v1898_v26, %v1836_v29  ;;  %v3585_v31 = vpop.f32.mrf.mxu1 }
  0xbd   :  { %v1771_v32 = vadd.f32 %v1770_v28, %v3585_v31  ;;  %v1837_v34 = vmul.f32 %v3585_v31, %v3585_v31 }
  0xbe   :  { %v3590_v37 = vpop.f32.mrf.mxu2 }
  0xbf   :  { %v1900_v38 = vadd.f32 %v1899_v30, %v1837_v34  ;;  %v1772_v39 = vadd.f32 %v1771_v32, %v3590_v37  ;;  %v1838_v40 = vmul.f32 %v3590_v37, %v3590_v37 }
  0xc0   :  { %v3595_v42 = vpop.f32.mrf.mxu3 }
  0xc1   :  { %v1901_v43 = vadd.f32 %v1900_v38, %v1838_v40  ;;  %v1773_v46 = vadd.f32 %v1772_v39, %v3595_v42  ;;  %v1839_v47 = vmul.f32 %v3595_v42, %v3595_v42 }
  0xc3   :  { %v1902_v48 = vadd.f32 %v1901_v43, %v1839_v47  ;;  %v3600_v50 = vpop.f32.mrf.mxu0 }
  0xc4   :  { %v1774_v51 = vadd.f32 %v1773_v46, %v3600_v50  ;;  %v1840_v52 = vmul.f32 %v3600_v50, %v3600_v50 }
  0xc6   :  { %v1903_v53 = vadd.f32 %v1902_v48, %v1840_v52  ;;  %v3605_v55 = vpop.f32.mrf.mxu1 }
  0xc7   :  { %v1775_v57 = vadd.f32 %v1774_v51, %v3605_v55  ;;  %v1841_v13 = vmul.f32 %v3605_v55, %v3605_v55 }
  0xc8   :  { %v3610_v59 = vpop.f32.mrf.mxu2 }
  0xc9   :  { %v1904_v60 = vadd.f32 %v1903_v53, %v1841_v13  ;;  %v1776_v63 = vadd.f32 %v1775_v57, %v3610_v59  ;;  %v1842_v0 = vmul.f32 %v3610_v59, %v3610_v59 }
  0xca   :  { %v3615_v1 = vpop.f32.mrf.mxu3 }
  0xcb   :  { %v1905_v3 = vadd.f32 %v1904_v60, %v1842_v0  ;;  %v1777_v4 = vadd.f32 %v1776_v63, %v3615_v1  ;;  %v1843_v5 = vmul.f32 %v3615_v1, %v3615_v1 }
  0xcd   :  { %v1906_v7 = vadd.f32 %v1905_v3, %v1843_v5  ;;  %v3620_v9 = vpop.f32.mrf.mxu0 }
  0xce   :  { %v1778_v10 = vadd.f32 %v1777_v4, %v3620_v9  ;;  %v1844_v11 = vmul.f32 %v3620_v9, %v3620_v9 }
  0xd0   :  { %v1907_v15 = vadd.f32 %v1906_v7, %v1844_v11  ;;  %v3625_v16 = vpop.f32.mrf.mxu1 }
  0xd1   :  { %v1779_v18 = vadd.f32 %v1778_v10, %v3625_v16  ;;  %v1845_v19 = vmul.f32 %v3625_v16, %v3625_v16 }
  0xd2   :  { %v3630_v20 = vpop.f32.mrf.mxu2 }
  0xd3   :  { %v1908_v23 = vadd.f32 %v1907_v15, %v1845_v19  ;;  %v1780_v24 = vadd.f32 %v1779_v18, %v3630_v20  ;;  %v1846_v25 = vmul.f32 %v3630_v20, %v3630_v20 }
  0xd4   :  { %v3635_v26 = vpop.f32.mrf.mxu3 }
  0xd5   :  { %v1909_v28 = vadd.f32 %v1908_v23, %v1846_v25  ;;  %v1781_v29 = vadd.f32 %v1780_v24, %v3635_v26  ;;  %v1847_v30 = vmul.f32 %v3635_v26, %v3635_v26 }
  0xd7   :  { %v1910_v32 = vadd.f32 %v1909_v28, %v1847_v30  ;;  %v3640_v34 = vpop.f32.mrf.mxu0 }
  0xd8   :  { %v1782_v38 = vadd.f32 %v1781_v29, %v3640_v34  ;;  %v1848_v39 = vmul.f32 %v3640_v34, %v3640_v34 }
  0xda   :  { %v1911_v40 = vadd.f32 %v1910_v32, %v1848_v39  ;;  %v3645_v43 = vpop.f32.mrf.mxu1 }
  0xdb   :  { %v1783_v46 = vadd.f32 %v1782_v38, %v3645_v43  ;;  %v1849_v47 = vmul.f32 %v3645_v43, %v3645_v43 }
  0xdc   :  { %v3650_v48 = vpop.f32.mrf.mxu2 }
  0xdd   :  { %v1912_v51 = vadd.f32 %v1911_v40, %v1849_v47  ;;  %v1784_v52 = vadd.f32 %v1783_v46, %v3650_v48  ;;  %v1850_v53 = vmul.f32 %v3650_v48, %v3650_v48 }
  0xde   :  { %v3655_v57 = vpop.f32.mrf.mxu3 }
  0xdf   :  { %v1913_v13 = vadd.f32 %v1912_v51, %v1850_v53  ;;  %v1785_v60 = vadd.f32 %v1784_v52, %v3655_v57  ;;  %v1851_v63 = vmul.f32 %v3655_v57, %v3655_v57 }
  0xe1   :  { %v1914_v0 = vadd.f32 %v1913_v13, %v1851_v63  ;;  %v3660_v3 = vpop.f32.mrf.mxu0 }
  0xe2   :  { %v1786_v4 = vadd.f32 %v1785_v60, %v3660_v3  ;;  %v1852_v5 = vmul.f32 %v3660_v3, %v3660_v3 }
  0xe4   :  { %v1915_v7 = vadd.f32 %v1914_v0, %v1852_v5  ;;  %v3665_v10 = vpop.f32.mrf.mxu1 }
  0xe5   :  { %v1787_v11 = vadd.f32 %v1786_v4, %v3665_v10  ;;  %v1853_v15 = vmul.f32 %v3665_v10, %v3665_v10 }
  0xe6   :  { %v3670_v18 = vpop.f32.mrf.mxu2 }
  0xe7   :  { %v1916_v19 = vadd.f32 %v1915_v7, %v1853_v15  ;;  %v1788_v23 = vadd.f32 %v1787_v11, %v3670_v18  ;;  %v1854_v24 = vmul.f32 %v3670_v18, %v3670_v18 }
  0xe8   :  { %v3675_v25 = vpop.f32.mrf.mxu3 }
  0xe9   :  { %v1917_v28 = vadd.f32 %v1916_v19, %v1854_v24  ;;  %v1789_v29 = vadd.f32 %v1788_v23, %v3675_v25  ;;  %v1855_v30 = vmul.f32 %v3675_v25, %v3675_v25 }
  0xeb   :  { %v1918_v32 = vadd.f32 %v1917_v28, %v1855_v30  ;;  %v3680_v38 = vpop.f32.mrf.mxu0 }
  0xec   :  { %4537 = vst [vmem:[#allocation2_spill] sm:$0xff] %v3680_v38  ;;  %v1790_v39 = vadd.f32 %v1789_v29, %v3680_v38  ;;  %v1856_v40 = vmul.f32 %v3680_v38, %v3680_v38 }
  0xee   :  { %v1919_v46 = vadd.f32 %v1918_v32, %v1856_v40  ;;  %v3685_v47 = vpop.f32.mrf.mxu1 }
  0xef   :  { %4538 = vst [vmem:[#allocation3_spill] sm:$0xff] %v3685_v47  ;;  %v1791_v51 = vadd.f32 %v1790_v39, %v3685_v47  ;;  %v1857_v52 = vmul.f32 %v3685_v47, %v3685_v47 }
  0xf0   :  { %v3690_v53 = vpop.f32.mrf.mxu2 }
  0xf1   :  { %4539 = vst [vmem:[#allocation4_spill] sm:$0xff] %v3690_v53  ;;  %v1920_v13 = vadd.f32 %v1919_v46, %v1857_v52  ;;  %v1792_v60 = vadd.f32 %v1791_v51, %v3690_v53  ;;  %v1858_v63 = vmul.f32 %v3690_v53, %v3690_v53 }
  0xf2   :  { %v3695_v0 = vpop.f32.mrf.mxu3 }
  0xf3   :  { %4540 = vst [vmem:[#allocation5_spill] sm:$0xff] %v3695_v0  ;;  %v1921_v4 = vadd.f32 %v1920_v13, %v1858_v63  ;;  %v1793_v5 = vadd.f32 %v1792_v60, %v3695_v0  ;;  %v1859_v7 = vmul.f32 %v3695_v0, %v3695_v0 }
  0xf5   :  { %v1922_v11 = vadd.f32 %v1921_v4, %v1859_v7  ;;  %v3700_v15 = vpop.f32.mrf.mxu0 }
  0xf6   :  { %4541 = vst [vmem:[#allocation6_spill] sm:$0xff] %v3700_v15  ;;  %v1794_v19 = vadd.f32 %v1793_v5, %v3700_v15  ;;  %v1860_v23 = vmul.f32 %v3700_v15, %v3700_v15 }
  0xf8   :  { %v1923_v24 = vadd.f32 %v1922_v11, %v1860_v23  ;;  %v3705_v28 = vpop.f32.mrf.mxu1 }
  0xf9   :  { %4542 = vst [vmem:[#allocation7_spill] sm:$0xff] %v3705_v28  ;;  %v1795_v29 = vadd.f32 %v1794_v19, %v3705_v28  ;;  %v1861_v30 = vmul.f32 %v3705_v28, %v3705_v28 }
  0xfa   :  { %v3710_v32 = vpop.f32.mrf.mxu2 }
  0xfb   :  { %4543 = vst [vmem:[#allocation8_spill] sm:$0xff] %v3710_v32  ;;  %v1924_v39 = vadd.f32 %v1923_v24, %v1861_v30  ;;  %v1796_v40 = vadd.f32 %v1795_v29, %v3710_v32  ;;  %v1862_v46 = vmul.f32 %v3710_v32, %v3710_v32 }
  0xfc   :  { %v3715_v51 = vpop.f32.mrf.mxu3 }
  0xfd   :  { %4544 = vst [vmem:[#allocation9_spill] sm:$0xff] %v3715_v51  ;;  %v1925_v52 = vadd.f32 %v1924_v39, %v1862_v46  ;;  %v1797_v13 = vadd.f32 %v1796_v40, %v3715_v51  ;;  %v1863_v60 = vmul.f32 %v3715_v51, %v3715_v51 }
  0xff   :  { %v1926_v63 = vadd.f32 %v1925_v52, %v1863_v60  ;;  %v3720_v4 = vpop.f32.mrf.mxu0 }
 0x100   :  { %4545 = vst [vmem:[#allocation10_spill] sm:$0xff] %v3720_v4  ;;  %v1798_v5 = vadd.f32 %v1797_v13, %v3720_v4  ;;  %v1864_v7 = vmul.f32 %v3720_v4, %v3720_v4 }
 0x102   :  { %v1927_v11 = vadd.f32 %v1926_v63, %v1864_v7  ;;  %v3725_v19 = vpop.f32.mrf.mxu1 }
 0x103   :  { %4546 = vst [vmem:[#allocation11_spill] sm:$0xff] %v3725_v19  ;;  %v1799_v23 = vadd.f32 %v1798_v5, %v3725_v19  ;;  %v1865_v24 = vmul.f32 %v3725_v19, %v3725_v19 }
 0x104   :  { %v3730_v29 = vpop.f32.mrf.mxu2 }
 0x105   :  { %4547 = vst [vmem:[#allocation12_spill] sm:$0xff] %v3730_v29  ;;  %v1928_v30 = vadd.f32 %v1927_v11, %v1865_v24  ;;  %v1800_v39 = vadd.f32 %v1799_v23, %v3730_v29  ;;  %v1866_v40 = vmul.f32 %v3730_v29, %v3730_v29 }
 0x106   :  { %v3735_v46 = vpop.f32.mrf.mxu3 }
 0x107   :  { %4548 = vst [vmem:[#allocation13_spill] sm:$0xff] %v3735_v46  ;;  %v1929_v52 = vadd.f32 %v1928_v30, %v1866_v40  ;;  %v1801_v13 = vadd.f32 %v1800_v39, %v3735_v46  ;;  %v1867_v60 = vmul.f32 %v3735_v46, %v3735_v46 }
 0x109   :  { %v1930_v63 = vadd.f32 %v1929_v52, %v1867_v60  ;;  %v3740_v5 = vpop.f32.mrf.mxu0 }
 0x10a   :  { %4549 = vst [vmem:[#allocation14_spill] sm:$0xff] %v3740_v5  ;;  %v1802_v7 = vadd.f32 %v1801_v13, %v3740_v5  ;;  %v1868_v11 = vmul.f32 %v3740_v5, %v3740_v5  ;;  %v2088_v13 = vld [vmem:[%s4498_s2] sm:$0xff] }
 0x10c   :  { %v1931_v23 = vadd.f32 %v1930_v63, %v1868_v11  ;;  %v3745_v24 = vpop.f32.mrf.mxu1  ;;  %v2494_v11 = vmov 0  }
 0x10d   :  { %4550 = vst [vmem:[#allocation15_spill] sm:$0xff] %v3745_v24  ;;  %v1803_v29 = vadd.f32 %v1802_v7, %v3745_v24  ;;  %v1869_v30 = vmul.f32 %v3745_v24, %v3745_v24  ;;  %2489 = vset.pattern.permute.xlu1 %v2494_v11  ;;  %2490 = vset.pattern.permute.xlu0 %v2494_v11 }
 0x10e   :  { %v3750_v39 = vpop.f32.mrf.mxu2  ;;  %2091 = vperm.xlu1 %2489, %v2088_v13  }
 0x10f   :  { %4551 = vst [vmem:[#allocation16_spill] sm:$0xff] %v3750_v39  ;;  %v1932_v40 = vadd.f32 %v1931_v23, %v1869_v30  ;;  %v1804_v52 = vadd.f32 %v1803_v29, %v3750_v39  ;;  %v1870_v60 = vmul.f32 %v3750_v39, %v3750_v39 }
 0x110   :  { %v3758_v63 = vpop.f32.mrf.mxu3 }
 0x111   :  { %4552 = vst [vmem:[#allocation17_spill] sm:$0xff] %v3758_v63  ;;  %v1933_v7 = vadd.f32 %v1932_v40, %v1870_v60  ;;  %v1805_v24 = vadd.f32 %v1804_v52, %v3758_v63  ;;  %v1871_v23 = vmul.f32 %v3758_v63, %v3758_v63  ;;  %v2158_v40 = vld [vmem:[%s4499_s3] sm:$0xff] }
 0x113   :  { %v1934_v29 = vadd.f32 %v1933_v7, %v1871_v23  ;;  %v3763_v30 = vpop.f32.mrf.mxu0 }
 0x114   :  { %4553 = vst [vmem:[#allocation18_spill] sm:$0xff] %v3763_v30  ;;  %v1806_v39 = vadd.f32 %v1805_v24, %v3763_v30  ;;  %v1872_v5 = vmul.f32 %v3763_v30, %v3763_v30 }
 0x116   :  { %v1935_v46 = vadd.f32 %v1934_v29, %v1872_v5  ;;  %v3768_v19 = vpop.f32.mrf.mxu1  ;;  %2161 = vperm.xlu1 %2489, %v2158_v40  }
 0x117   :  { %4554 = vst [vmem:[#allocation19_spill] sm:$0xff] %v3768_v19  ;;  %v1807_v52 = vadd.f32 %v1806_v39, %v3768_v19  ;;  %v1873_v60 = vmul.f32 %v3768_v19, %v3768_v19 }
 0x118   :  { %v3776_v13 = vpop.f32.mrf.mxu2 }
 0x119   :  { %v1936_v11 = vadd.f32 %v1935_v46, %v1873_v60  ;;  %v1808_v24 = vadd.f32 %v1807_v52, %v3776_v13  ;;  %v1874_v7 = vmul.f32 %v3776_v13, %v3776_v13 }
 0x11a   :  { %v3781_v5 = vpop.f32.mrf.mxu3 }
 0x11b   :  { %v1937_v23 = vadd.f32 %v1936_v11, %v1874_v7  ;;  %v1809_v29 = vadd.f32 %v1808_v24, %v3781_v5  ;;  %v1875_v39 = vmul.f32 %v3781_v5, %v3781_v5 }
 0x11d   :  { %v1938_v30 = vadd.f32 %v1937_v23, %v1875_v39  ;;  %v1688_v63 = vpop.f32.mrf.mxu0 }
 0x11e   :  { %v1810_v19 = vadd.f32 %v1809_v29, %v1688_v63  ;;  %v1876_v4 = vmul.f32 %v1688_v63, %v1688_v63  ;;  %v1708_v51 = vpop.f32.mrf.mxu1 }
 0x11f   :  { %v1877_v52 = vmul.f32 %v1708_v51, %v1708_v51 }
 0x120   :  { %v1811_v46 = vadd.f32 %v1810_v19, %v1708_v51  ;;  %v1939_v60 = vadd.f32 %v1938_v30, %v1876_v4 }
 0x122   :  { %v1728_v32 = vpop.f32.mrf.mxu2  ;;  %v1940_v40 = vadd.f32 %v1939_v60, %v1877_v52 }
 0x123   :  { %v1812_v28 = vadd.f32 %v1811_v46, %v1728_v32  ;;  %v1878_v0 = vmul.f32 %v1728_v32, %v1728_v32 }
 0x124   :  { %v1748_v15 = vpop.f32.mrf.mxu3 }
 0x125   :  { %v1813_v53 = vadd.f32 %v1812_v28, %v1748_v15  ;;  %v1879_v11 = vmul.f32 %v1748_v15, %v1748_v15  ;;  %v1941_v24 = vadd.f32 %v1940_v40, %v1878_v0 }
 0x127   :  { %1814 = vadd.xlane.f32.xlu0 %v1813_v53  ;;  %v1942_v7 = vadd.f32 %v1941_v24, %v1879_v11 }
 0x12f   :  { %1943 = vadd.xlane.f32.xlu0 %v1942_v7  ;;  %v4565_v7 = vld [vmem:[#allocation6_spill] sm:$0xff] }
 0x19a   :  { %v1815_v47 = vpop.xlane.xlu0 %1814 }
 0x19b   :  { %v3786_v39 = vmul.f32 0.00012207031, %v1815_v47 }
 0x19d   :  { %v1947_v4 = vmul.f32 %v3786_v39, %v3786_v39  ;;  %v1949_v0 = vsub.f32 %v3354_v35, %v3786_v39  ;;  %v1950_v47 = vsub.f32 %v3356_v36, %v3786_v39  ;;  %v1951_v40 = vsub.f32 %v3384_v45, %v3786_v39  ;;  %v4566_v35 = vld [vmem:[#allocation7_spill] sm:$0xff]  ;;  %v4568_v45 = vld [vmem:[#allocation9_spill] sm:$0xff] }
 0x19e   :  { %v1952_v11 = vsub.f32 %v3413_v56, %v3786_v39  ;;  %v4584_v24 = vsub.f32 %v3528_v44, %v3786_v39 }
 0x1a2   :  { %v1944_v23 = vpop.xlane.xlu0 %1943 }
 0x1a3   :  { %v1946_v29 = vmul.f32 0.00012207031, %v1944_v23  ;;  %v4564_v23 = vld [vmem:[#allocation5_spill] sm:$0xff] }
 0x1a5   :  { %v1948_v19 = vsub.f32 %v1946_v29, %v1947_v4  ;;  %v2007_v4 = vsub.f32 %v3776_v13, %v3786_v39 }
 0x1a7   :  { %v2013_v30 = vadd.f32 1e-05, %v1948_v19 }
 0x1a9   :  { %2491 = vrsqrt.f32 %v2013_v30  ;;  %vm2020_vm3 = vweird.f32 %v2013_v30 }
 0x1af   :  { %v2492_v46 = vpop.eup %2491 }
 0x1b0   :  { %v2015_v60 = vmul.f32 %v2492_v46, %v2013_v30  ;;  %vm2021_vm2 = vweird.f32 %v2492_v46  ;;  %v2010_v30 = vsub.f32 %v1708_v51, %v3786_v39 }
 0x1b1   :  { %vm2022_vm4 = vmor %vm2020_vm3, %vm2021_vm2 }
 0x1b2   :  { %v2016_v52 = vmul.f32 %v2492_v46, %v2015_v60  ;;  %v2011_v60 = vsub.f32 %v1728_v32, %v3786_v39 }
 0x1b4   :  { %v2017_v28 = vmul.f32 0.5, %v2016_v52  ;;  %v2012_v52 = vsub.f32 %v1748_v15, %v3786_v39 }
 0x1b6   :  { %v2018_v53 = vsub.f32 1.5, %v2017_v28 }
 0x1b8   :  { %v2019_v38 = vmul.f32 %v2492_v46, %v2018_v53 }
 0x1ba   :  { %v3808_v19 = vsel %vm2022_vm4, %v2492_v46, %v2019_v38  ;;  %v2008_v38 = vsub.f32 %v3781_v5, %v3786_v39  ;;  %v2009_v46 = vsub.f32 %v1688_v63, %v3786_v39 }
 0x1bb   :  { %v2082_v29 = vmul.f32 %v3808_v19, %v2007_v4  ;;  %v2085_v63 = vmul.f32 %v3808_v19, %v2010_v30  ;;  %v2086_v51 = vmul.f32 %v3808_v19, %v2011_v60  ;;  %v2087_v32 = vmul.f32 %v3808_v19, %v2012_v52  ;;  %v4561_v4 = vld [vmem:[#allocation2_spill] sm:$0xff] }
 0x1bc   :  { %v2083_v13 = vmul.f32 %v3808_v19, %v2008_v38  ;;  %v2084_v5 = vmul.f32 %v3808_v19, %v2009_v46  ;;  %v3846_v38 = vpop.permute.xlu1 %2091  ;;  %v2026_v15 = vmul.f32 %v3808_v19, %v1951_v40  ;;  %v2027_v36 = vmul.f32 %v3808_v19, %v1952_v11 }
 0x1bd   :  { %v3861_v28 = vmul.f32 %v3846_v38, %v2082_v29  ;;  %v3870_v52 = vmul.f32 %v3846_v38, %v2085_v63  ;;  %v3873_v46 = vmul.f32 %v3846_v38, %v2086_v51  ;;  %v3876_v53 = vmul.f32 %v3846_v38, %v2087_v32  ;;  %v4562_v29 = vld [vmem:[#allocation3_spill] sm:$0xff] }
 0x1be   :  { %v3864_v30 = vmul.f32 %v3846_v38, %v2083_v13  ;;  %v3867_v60 = vmul.f32 %v3846_v38, %v2084_v5  ;;  %v4563_v13 = vld [vmem:[#allocation4_spill] sm:$0xff]  ;;  %v2024_v63 = vmul.f32 %v3808_v19, %v1949_v0  ;;  %v2025_v51 = vmul.f32 %v3808_v19, %v1950_v47 }
 0x1bf   :  { %4555 = vst [vmem:[#allocation20_spill] sm:$0xff] %v3861_v28  ;;  %v4567_v0 = vld [vmem:[#allocation8_spill] sm:$0xff]  ;;  %v4570_v5 = vsub.f32 %v3431_v62, %v3786_v39  ;;  %v4574_v40 = vsub.f32 %v3445_v6, %v3786_v39  ;;  %v4575_v32 = vsub.f32 %v3465_v14, %v3786_v39  ;;  %v2096_v28 = vmul.f32 %v3846_v38, %v2026_v15 }
 0x1c0   :  { %4556 = vst [vmem:[#allocation21_spill] sm:$0xff] %v3864_v30  ;;  %v4578_v6 = vsub.f32 %v3484_v22, %v3786_v39  ;;  %v2097_v14 = vmul.f32 %v3846_v38, %v2027_v36  ;;  %v4581_v15 = vsub.f32 %v3510_v33, %v3786_v39  ;;  %v4583_v36 = vsub.f32 %v3521_v41, %v3786_v39 }
 0x1c1   :  { %4557 = vst [vmem:[#allocation22_spill] sm:$0xff] %v3867_v60  ;;  %v2029_v30 = vmul.f32 %v3808_v19, %v4574_v40  ;;  %v2030_v62 = vmul.f32 %v3808_v19, %v4575_v32 }
 0x1c2   :  { %4558 = vst [vmem:[#allocation23_spill] sm:$0xff] %v3870_v52  ;;  %v2095_v52 = vmul.f32 %v3846_v38, %v2025_v51  ;;  %v2031_v40 = vmul.f32 %v3808_v19, %v4578_v6  ;;  %v2032_v56 = vmul.f32 %v3808_v19, %v4581_v15  ;;  %v2034_v51 = vmul.f32 %v3808_v19, %v4584_v24 }
 0x1c3   :  { %4559 = vst [vmem:[#allocation24_spill] sm:$0xff] %v3873_v46  ;;  %v2028_v46 = vmul.f32 %v3808_v19, %v4570_v5  ;;  %v2094_v5 = vmul.f32 %v3846_v38, %v2024_v63  ;;  %v2033_v63 = vmul.f32 %v3808_v19, %v4583_v36  ;;  %v2099_v33 = vmul.f32 %v3846_v38, %v2029_v30 }
 0x1c4   :  { %4560 = vst [vmem:[#allocation25_spill] sm:$0xff] %v3876_v53  ;;  %v3979_v47 = vpop.permute.xlu1 %2161  ;;  %v2100_v15 = vmul.f32 %v3846_v38, %v2030_v62  ;;  %v4586_v36 = vsub.f32 %v3535_v49, %v3786_v39  ;;  %v2101_v24 = vmul.f32 %v3846_v38, %v2031_v40  ;;  %v4587_v62 = vsub.f32 %v3540_v54, %v3786_v39 }
 0x1c5   :  { %v2098_v60 = vmul.f32 %v3846_v38, %v2028_v46  ;;  %v2164_v46 = vadd.f32 %v3979_v47, %v2094_v5  ;;  %v2165_v32 = vadd.f32 %v3979_v47, %v2095_v52  ;;  %v2166_v6 = vadd.f32 %v3979_v47, %v2096_v28 }
 0x1c6   :  { %v2035_v44 = vmul.f32 %v3808_v19, %v4586_v36  ;;  %v2167_v30 = vadd.f32 %v3979_v47, %v2097_v14  ;;  %v2036_v5 = vmul.f32 %v3808_v19, %v4587_v62  ;;  %v4588_v28 = vsub.f32 %v3545_v58, %v3786_v39 }
 0x1c7   :  { %v2102_v41 = vmul.f32 %v3846_v38, %v2032_v56  ;;  %v2168_v49 = vadd.f32 %v3979_v47, %v2098_v60  ;;  %v4589_v36 = vsub.f32 %v3550_v61, %v3786_v39  ;;  %v2103_v14 = vmul.f32 %v3846_v38, %v2033_v63 }
 0x1c8   :  { %v2037_v52 = vmul.f32 %v3808_v19, %v4588_v28  ;;  %v2104_v54 = vmul.f32 %v3846_v38, %v2034_v51  ;;  %v2169_v62 = vadd.f32 %v3979_v47, %v2099_v33  ;;  %v2170_v22 = vadd.f32 %v3979_v47, %v2100_v15 }
 0x1c9   :  { %v2038_v40 = vmul.f32 %v3808_v19, %v4589_v36  ;;  %v2228_v58 = vmax.f32 %v2164_v46, 0.0  ;;  %v2229_v11 = vmax.f32 %v2165_v32, 0.0  ;;  %v2230_v28 = vmax.f32 %v2166_v6, 0.0 }
 0x1ca   :  { %v4590_v56 = vsub.f32 %v3555_v2, %v3786_v39  ;;  %v2105_v61 = vmul.f32 %v3846_v38, %v2035_v44  ;;  %v2171_v36 = vadd.f32 %v3979_v47, %v2101_v24  ;;  %v2231_v53 = vmax.f32 %v2167_v30, 0.0 }
 0x1cb   :  { %v4591_v63 = vsub.f32 %v3560_v8, %v3786_v39  ;;  %v2106_v33 = vmul.f32 %v3846_v38, %v2036_v5  ;;  %v2172_v32 = vadd.f32 %v3979_v47, %v2102_v41  ;;  %v2232_v6 = vmax.f32 %v2168_v49, 0.0  ;;  %2292 = vst [vmem:[%s4500_s4] sm:$0xff] %v2228_v58 }
 0x1cc   :  { %v2039_v60 = vmul.f32 %v3808_v19, %v4590_v56  ;;  %v4592_v2 = vsub.f32 %v3565_v12, %v3786_v39  ;;  %v2107_v46 = vmul.f32 %v3846_v38, %v2037_v52  ;;  %v2173_v8 = vadd.f32 %v3979_v47, %v2103_v14  ;;  %2293 = vst [vmem:[%s4500_s4 + $0x8] sm:$0xff] %v2229_v11 }
 0x1cd   :  { %v2040_v51 = vmul.f32 %v3808_v19, %v4591_v63  ;;  %v2233_v44 = vmax.f32 %v2169_v62, 0.0  ;;  %v4593_v41 = vsub.f32 %v3570_v17, %v3786_v39  ;;  %v2108_v30 = vmul.f32 %v3846_v38, %v2038_v40  ;;  %2294 = vst [vmem:[%s4500_s4 + $0x10] sm:$0xff] %v2230_v28 }
 0x1ce   :  { %v2041_v15 = vmul.f32 %v3808_v19, %v4592_v2  ;;  %v2174_v12 = vadd.f32 %v3979_v47, %v2104_v54  ;;  %v2234_v5 = vmax.f32 %v2170_v22, 0.0  ;;  %v4594_v52 = vsub.f32 %v3575_v21, %v3786_v39  ;;  %2295 = vst [vmem:[%s4500_s4 + $0x18] sm:$0xff] %v2231_v53 }
 0x1cf   :  { %v2042_v24 = vmul.f32 %v3808_v19, %v4593_v41  ;;  %v2109_v11 = vmul.f32 %v3846_v38, %v2039_v60  ;;  %v2175_v17 = vadd.f32 %v3979_v47, %v2105_v61  ;;  %v2235_v14 = vmax.f32 %v2171_v36, 0.0  ;;  %2296 = vst [vmem:[%s4500_s4 + $0x20] sm:$0xff] %v2232_v6 }
 0x1d0   :  { %v2043_v49 = vmul.f32 %v3808_v19, %v4594_v52  ;;  %v4595_v22 = vsub.f32 %v3580_v27, %v3786_v39  ;;  %v2110_v54 = vmul.f32 %v3846_v38, %v2040_v51  ;;  %v2176_v21 = vadd.f32 %v3979_v47, %v2106_v33  ;;  %2297 = vst [vmem:[%s4500_s4 + $0x28] sm:$0xff] %v2233_v44 }
 0x1d1   :  { %v2236_v62 = vmax.f32 %v2172_v32, 0.0  ;;  %v4596_v58 = vsub.f32 %v3585_v31, %v3786_v39  ;;  %v2111_v53 = vmul.f32 %v3846_v38, %v2041_v15  ;;  %v2177_v27 = vadd.f32 %v3979_v47, %v2107_v46  ;;  %2298 = vst [vmem:[%s4500_s4 + $0x30] sm:$0xff] %v2234_v5 }
 0x1d2   :  { %v2044_v40 = vmul.f32 %v3808_v19, %v4595_v22  ;;  %v2237_v56 = vmax.f32 %v2173_v8, 0.0  ;;  %v4597_v60 = vsub.f32 %v3590_v37, %v3786_v39  ;;  %v2112_v36 = vmul.f32 %v3846_v38, %v2042_v24  ;;  %2299 = vst [vmem:[%s4500_s4 + $0x38] sm:$0xff] %v2235_v14 }
 0x1d3   :  { %v2045_v28 = vmul.f32 %v3808_v19, %v4596_v58  ;;  %v2178_v31 = vadd.f32 %v3979_v47, %v2108_v30  ;;  %v2238_v63 = vmax.f32 %v2174_v12, 0.0  ;;  %v4598_v51 = vsub.f32 %v3595_v42, %v3786_v39  ;;  %2300 = vst [vmem:[%s4500_s4 + $0x40] sm:$0xff] %v2236_v62 }
 0x1d4   :  { %v2046_v61 = vmul.f32 %v3808_v19, %v4597_v60  ;;  %v2113_v32 = vmul.f32 %v3846_v38, %v2043_v49  ;;  %v2179_v37 = vadd.f32 %v3979_v47, %v2109_v11  ;;  %v2239_v6 = vmax.f32 %v2175_v17, 0.0  ;;  %2301 = vst [vmem:[%s4500_s4 + $0x48] sm:$0xff] %v2237_v56 }
 0x1d5   :  { %v2047_v33 = vmul.f32 %v3808_v19, %v4598_v51  ;;  %v4599_v2 = vsub.f32 %v3600_v50, %v3786_v39  ;;  %v2114_v46 = vmul.f32 %v3846_v38, %v2044_v40  ;;  %v2180_v42 = vadd.f32 %v3979_v47, %v2110_v54  ;;  %2302 = vst [vmem:[%s4500_s4 + $0x50] sm:$0xff] %v2238_v63 }
 0x1d6   :  { %v2240_v8 = vmax.f32 %v2176_v21, 0.0  ;;  %v4600_v44 = vsub.f32 %v3605_v55, %v3786_v39  ;;  %v2115_v24 = vmul.f32 %v3846_v38, %v2045_v28  ;;  %v2181_v50 = vadd.f32 %v3979_v47, %v2111_v53  ;;  %2303 = vst [vmem:[%s4500_s4 + $0x58] sm:$0xff] %v2239_v6 }
 0x1d7   :  { %v2048_v15 = vmul.f32 %v3808_v19, %v4599_v2  ;;  %v2241_v30 = vmax.f32 %v2177_v27, 0.0  ;;  %v4601_v12 = vsub.f32 %v3610_v59, %v3786_v39  ;;  %v2116_v52 = vmul.f32 %v3846_v38, %v2046_v61 }
 0x1d8   :  { %v2049_v41 = vmul.f32 %v3808_v19, %v4600_v44  ;;  %v2182_v55 = vadd.f32 %v3979_v47, %v2112_v36  ;;  %v2242_v49 = vmax.f32 %v2178_v31, 0.0  ;;  %v4602_v11 = vsub.f32 %v3615_v1, %v3786_v39  ;;  %2304 = vst [vmem:[%s4500_s4 + $0x60] sm:$0xff] %v2240_v8 }
 0x1d9   :  { %v2050_v5 = vmul.f32 %v3808_v19, %v4601_v12  ;;  %v2117_v14 = vmul.f32 %v3846_v38, %v2047_v33  ;;  %v2183_v59 = vadd.f32 %v3979_v47, %v2113_v32  ;;  %v2243_v22 = vmax.f32 %v2179_v37, 0.0  ;;  %2305 = vst [vmem:[%s4500_s4 + $0x68] sm:$0xff] %v2241_v30 }
 0x1da   :  { %v2051_v17 = vmul.f32 %v3808_v19, %v4602_v11  ;;  %v4603_v40 = vsub.f32 %v3620_v9, %v3786_v39  ;;  %v2118_v21 = vmul.f32 %v3846_v38, %v2048_v15  ;;  %v2184_v1 = vadd.f32 %v3979_v47, %v2114_v46  ;;  %2306 = vst [vmem:[%s4500_s4 + $0x70] sm:$0xff] %v2242_v49 }
 0x1db   :  { %v2244_v62 = vmax.f32 %v2180_v42, 0.0  ;;  %v4604_v58 = vsub.f32 %v3625_v16, %v3786_v39  ;;  %v2119_v53 = vmul.f32 %v3846_v38, %v2049_v41  ;;  %v2185_v9 = vadd.f32 %v3979_v47, %v2115_v24  ;;  %2307 = vst [vmem:[%s4500_s4 + $0x78] sm:$0xff] %v2243_v22 }
 0x1dc   :  { %v2052_v54 = vmul.f32 %v3808_v19, %v4603_v40  ;;  %v2245_v27 = vmax.f32 %v2181_v50, 0.0  ;;  %v4605_v56 = vsub.f32 %v3630_v20, %v3786_v39  ;;  %v2120_v61 = vmul.f32 %v3846_v38, %v2050_v5 }
 0x1dd   :  { %v2053_v28 = vmul.f32 %v3808_v19, %v4604_v58  ;;  %v2186_v16 = vadd.f32 %v3979_v47, %v2116_v52  ;;  %v2246_v36 = vmax.f32 %v2182_v55, 0.0  ;;  %v4606_v31 = vsub.f32 %v3635_v26, %v3786_v39  ;;  %2308 = vst [vmem:[%s4500_s4 + $0x80] sm:$0xff] %v2244_v62 }
 0x1de   :  { %v2054_v60 = vmul.f32 %v3808_v19, %v4605_v56  ;;  %v2121_v51 = vmul.f32 %v3846_v38, %v2051_v17  ;;  %v2187_v20 = vadd.f32 %v3979_v47, %v2117_v14  ;;  %v2247_v33 = vmax.f32 %v2183_v59, 0.0  ;;  %2309 = vst [vmem:[%s4500_s4 + $0x88] sm:$0xff] %v2245_v27 }
 0x1df   :  { %v2055_v63 = vmul.f32 %v3808_v19, %v4606_v31  ;;  %v4607_v32 = vsub.f32 %v3640_v34, %v3786_v39  ;;  %v2122_v6 = vmul.f32 %v3846_v38, %v2052_v54  ;;  %v2188_v26 = vadd.f32 %v3979_v47, %v2118_v21  ;;  %2310 = vst [vmem:[%s4500_s4 + $0x90] sm:$0xff] %v2246_v36 }
 0x1e0   :  { %v2248_v2 = vmax.f32 %v2184_v1, 0.0  ;;  %v4608_v15 = vsub.f32 %v3645_v43, %v3786_v39  ;;  %v2123_v42 = vmul.f32 %v3846_v38, %v2053_v28  ;;  %v2189_v34 = vadd.f32 %v3979_v47, %v2119_v53  ;;  %2311 = vst [vmem:[%s4500_s4 + $0x98] sm:$0xff] %v2247_v33 }
 0x1e1   :  { %v2056_v37 = vmul.f32 %v3808_v19, %v4607_v32  ;;  %v2249_v8 = vmax.f32 %v2185_v9, 0.0  ;;  %v4609_v44 = vsub.f32 %v3650_v48, %v3786_v39  ;;  %v2124_v24 = vmul.f32 %v3846_v38, %v2054_v60 }
 0x1e2   :  { %v2057_v46 = vmul.f32 %v3808_v19, %v4608_v15  ;;  %v2190_v43 = vadd.f32 %v3979_v47, %v2120_v61  ;;  %v2250_v50 = vmax.f32 %v2186_v16, 0.0  ;;  %v4610_v30 = vsub.f32 %v3655_v57, %v3786_v39  ;;  %2312 = vst [vmem:[%s4500_s4 + $0xa0] sm:$0xff] %v2248_v2 }
 0x1e3   :  { %v2058_v41 = vmul.f32 %v3808_v19, %v4609_v44  ;;  %v2125_v5 = vmul.f32 %v3846_v38, %v2055_v63  ;;  %v2191_v48 = vadd.f32 %v3979_v47, %v2121_v51  ;;  %v2251_v52 = vmax.f32 %v2187_v20, 0.0  ;;  %2313 = vst [vmem:[%s4500_s4 + $0xa8] sm:$0xff] %v2249_v8 }
 0x1e4   :  { %v2059_v12 = vmul.f32 %v3808_v19, %v4610_v30  ;;  %v4611_v55 = vsub.f32 %v3660_v3, %v3786_v39  ;;  %v2126_v11 = vmul.f32 %v3846_v38, %v2056_v37  ;;  %v2192_v57 = vadd.f32 %v3979_v47, %v2122_v6  ;;  %2314 = vst [vmem:[%s4500_s4 + $0xb0] sm:$0xff] %v2250_v50 }
 0x1e5   :  { %v2252_v17 = vmax.f32 %v2188_v26, 0.0  ;;  %v4612_v14 = vsub.f32 %v3665_v10, %v3786_v39  ;;  %v2127_v22 = vmul.f32 %v3846_v38, %v2057_v46  ;;  %v2193_v3 = vadd.f32 %v3979_v47, %v2123_v42  ;;  %2315 = vst [vmem:[%s4500_s4 + $0xb8] sm:$0xff] %v2251_v52 }
 0x1e6   :  { %v2060_v49 = vmul.f32 %v3808_v19, %v4611_v55  ;;  %v2253_v40 = vmax.f32 %v2189_v34, 0.0  ;;  %v4613_v54 = vsub.f32 %v3670_v18, %v3786_v39  ;;  %v2128_v1 = vmul.f32 %v3846_v38, %v2058_v41 }
 0x1e7   :  { %v2061_v59 = vmul.f32 %v3808_v19, %v4612_v14  ;;  %v2194_v10 = vadd.f32 %v3979_v47, %v2124_v24  ;;  %v2254_v62 = vmax.f32 %v2190_v43, 0.0  ;;  %v4614_v58 = vsub.f32 %v3675_v25, %v3786_v39  ;;  %2316 = vst [vmem:[%s4500_s4 + $0xc0] sm:$0xff] %v2252_v17 }
 0x1e8   :  { %v2062_v21 = vmul.f32 %v3808_v19, %v4613_v54  ;;  %v2129_v53 = vmul.f32 %v3846_v38, %v2059_v12  ;;  %v2195_v18 = vadd.f32 %v3979_v47, %v2125_v5  ;;  %v2255_v9 = vmax.f32 %v2191_v48, 0.0  ;;  %2317 = vst [vmem:[%s4500_s4 + $0xc8] sm:$0xff] %v2253_v40 }
 0x1e9   :  { %v2063_v28 = vmul.f32 %v3808_v19, %v4614_v58  ;;  %v4615_v27 = vsub.f32 %v4561_v4, %v3786_v39  ;;  %v2130_v60 = vmul.f32 %v3846_v38, %v2060_v49  ;;  %v2196_v25 = vadd.f32 %v3979_v47, %v2126_v11  ;;  %2318 = vst [vmem:[%s4500_s4 + $0xd0] sm:$0xff] %v2254_v62  ;;  %v4623_v49 = vld [vmem:[#allocation10_spill] sm:$0xff] }
 0x1ea   :  { %v2256_v61 = vmax.f32 %v2192_v57, 0.0  ;;  %v4616_v16 = vsub.f32 %v4562_v29, %v3786_v39  ;;  %v2131_v31 = vmul.f32 %v3846_v38, %v2061_v59  ;;  %v2197_v4 = vadd.f32 %v3979_v47, %v2127_v22  ;;  %2319 = vst [vmem:[%s4500_s4 + $0xd8] sm:$0xff] %v2255_v9  ;;  %v4625_v59 = vld [vmem:[#allocation11_spill] sm:$0xff] }
 0x1eb   :  { %v2064_v56 = vmul.f32 %v3808_v19, %v4615_v27  ;;  %v2257_v63 = vmax.f32 %v2193_v3, 0.0  ;;  %v4617_v51 = vsub.f32 %v4563_v13, %v3786_v39  ;;  %v2132_v33 = vmul.f32 %v3846_v38, %v2062_v21 }
 0x1ec   :  { %v2065_v36 = vmul.f32 %v3808_v19, %v4616_v16  ;;  %v2198_v29 = vadd.f32 %v3979_v47, %v2128_v1  ;;  %v2258_v32 = vmax.f32 %v2194_v10, 0.0  ;;  %v4618_v37 = vsub.f32 %v4564_v23, %v3786_v39  ;;  %2320 = vst [vmem:[%s4500_s4 + $0xe0] sm:$0xff] %v2256_v61  ;;  %v4627_v1 = vld [vmem:[#allocation12_spill] sm:$0xff]  ;;  %v4631_v61 = vld [vmem:[#allocation14_spill] sm:$0xff] }
 0x1ed   :  { %v2066_v20 = vmul.f32 %v3808_v19, %v4617_v51  ;;  %v2133_v26 = vmul.f32 %v3846_v38, %v2063_v28  ;;  %v2199_v13 = vadd.f32 %v3979_v47, %v2129_v53  ;;  %v2259_v2 = vmax.f32 %v2195_v18, 0.0  ;;  %2321 = vst [vmem:[%s4500_s4 + $0xe8] sm:$0xff] %v2257_v63  ;;  %v4629_v18 = vld [vmem:[#allocation13_spill] sm:$0xff]  ;;  %v4633_v51 = vld [vmem:[#allocation15_spill] sm:$0xff] }
 0x1ee   :  { %v2067_v6 = vmul.f32 %v3808_v19, %v4618_v37  ;;  %v4619_v15 = vsub.f32 %v4565_v7, %v3786_v39  ;;  %v2134_v42 = vmul.f32 %v3846_v38, %v2064_v56  ;;  %v2200_v23 = vadd.f32 %v3979_v47, %v2130_v60  ;;  %2322 = vst [vmem:[%s4500_s4 + $0xf0] sm:$0xff] %v2258_v32 }
 0x1ef   :  { %v2260_v34 = vmax.f32 %v2196_v25, 0.0  ;;  %v4620_v8 = vsub.f32 %v4566_v35, %v3786_v39  ;;  %v2135_v41 = vmul.f32 %v3846_v38, %v2065_v36  ;;  %v2201_v7 = vadd.f32 %v3979_v47, %v2131_v31  ;;  %2323 = vst [vmem:[%s4500_s4 + $0xf8] sm:$0xff] %v2259_v2 }
 0x1f0   :  { %v2068_v46 = vmul.f32 %v3808_v19, %v4619_v15  ;;  %v2261_v24 = vmax.f32 %v2197_v4, 0.0  ;;  %v4621_v43 = vsub.f32 %v4567_v0, %v3786_v39  ;;  %v2136_v30 = vmul.f32 %v3846_v38, %v2066_v20 }
 0x1f1   :  { %v2069_v44 = vmul.f32 %v3808_v19, %v4620_v8  ;;  %v2202_v35 = vadd.f32 %v3979_v47, %v2132_v33  ;;  %v2262_v12 = vmax.f32 %v2198_v29, 0.0  ;;  %v4622_v5 = vsub.f32 %v4568_v45, %v3786_v39  ;;  %2324 = vst [vmem:[%s4500_s4 + $0x100] sm:$0xff] %v2260_v34 }
 0x1f2   :  { %v2070_v50 = vmul.f32 %v3808_v19, %v4621_v43  ;;  %v2137_v52 = vmul.f32 %v3846_v38, %v2067_v6  ;;  %v2203_v0 = vadd.f32 %v3979_v47, %v2133_v26  ;;  %v2263_v55 = vmax.f32 %v2199_v13, 0.0  ;;  %2325 = vst [vmem:[%s4500_s4 + $0x108] sm:$0xff] %v2261_v24  ;;  %v4635_v6 = vld [vmem:[#allocation16_spill] sm:$0xff] }
 0x1f3   :  { %v2071_v48 = vmul.f32 %v3808_v19, %v4622_v5  ;;  %v4624_v11 = vsub.f32 %v4623_v49, %v3786_v39  ;;  %v2138_v17 = vmul.f32 %v3846_v38, %v2068_v46  ;;  %v2204_v45 = vadd.f32 %v3979_v47, %v2134_v42  ;;  %2326 = vst [vmem:[%s4500_s4 + $0x110] sm:$0xff] %v2262_v12  ;;  %v4637_v42 = vld [vmem:[#allocation17_spill] sm:$0xff]  ;;  %v4641_v12 = vld [vmem:[#allocation19_spill] sm:$0xff] }
 0x1f4   :  { %v2264_v14 = vmax.f32 %v2200_v23, 0.0  ;;  %v4626_v22 = vsub.f32 %v4625_v59, %v3786_v39  ;;  %v2139_v40 = vmul.f32 %v3846_v38, %v2069_v44  ;;  %v2205_v54 = vadd.f32 %v3979_v47, %v2135_v41  ;;  %2327 = vst [vmem:[%s4500_s4 + $0x118] sm:$0xff] %v2263_v55 }
 0x1f5   :  { %v2072_v57 = vmul.f32 %v3808_v19, %v4624_v11  ;;  %v2265_v21 = vmax.f32 %v2201_v7, 0.0  ;;  %v4628_v10 = vsub.f32 %v4627_v1, %v3786_v39  ;;  %v2140_v58 = vmul.f32 %v3846_v38, %v2070_v50  ;;  %v4639_v7 = vld [vmem:[#allocation18_spill] sm:$0xff] }
 0x1f6   :  { %v2073_v3 = vmul.f32 %v3808_v19, %v4626_v22  ;;  %v2206_v28 = vadd.f32 %v3979_v47, %v2136_v30  ;;  %v2266_v53 = vmax.f32 %v2202_v35, 0.0  ;;  %v4630_v9 = vsub.f32 %v4629_v18, %v3786_v39  ;;  %2328 = vst [vmem:[%s4500_s4 + $0x120] sm:$0xff] %v2264_v14 }
 0x1f7   :  { %v2074_v62 = vmul.f32 %v3808_v19, %v4628_v10  ;;  %v2141_v56 = vmul.f32 %v3846_v38, %v2071_v48  ;;  %v2207_v60 = vadd.f32 %v3979_v47, %v2137_v52  ;;  %v2267_v25 = vmax.f32 %v2203_v0, 0.0  ;;  %2329 = vst [vmem:[%s4500_s4 + $0x128] sm:$0xff] %v2265_v21 }
 0x1f8   :  { %v2075_v27 = vmul.f32 %v3808_v19, %v4630_v9  ;;  %v4632_v16 = vsub.f32 %v4631_v61, %v3786_v39  ;;  %v2142_v31 = vmul.f32 %v3846_v38, %v2072_v57  ;;  %v2208_v4 = vadd.f32 %v3979_v47, %v2138_v17  ;;  %2330 = vst [vmem:[%s4500_s4 + $0x130] sm:$0xff] %v2266_v53  ;;  %v4643_v53 = vld [vmem:[#allocation20_spill] sm:$0xff] }
 0x1f9   :  { %v2268_v63 = vmax.f32 %v2204_v45, 0.0  ;;  %v4634_v20 = vsub.f32 %v4633_v51, %v3786_v39  ;;  %v2143_v29 = vmul.f32 %v3846_v38, %v2073_v3  ;;  %v2209_v32 = vadd.f32 %v3979_v47, %v2139_v40  ;;  %2331 = vst [vmem:[%s4500_s4 + $0x138] sm:$0xff] %v2267_v25  ;;  %v4645_v25 = vld [vmem:[#allocation22_spill] sm:$0xff] }
 0x1fa   :  { %v2076_v36 = vmul.f32 %v3808_v19, %v4632_v16  ;;  %v2269_v37 = vmax.f32 %v2205_v54, 0.0  ;;  %v4636_v26 = vsub.f32 %v4635_v6, %v3786_v39  ;;  %v2144_v2 = vmul.f32 %v3846_v38, %v2074_v62 }
 0x1fb   :  { %v2077_v33 = vmul.f32 %v3808_v19, %v4634_v20  ;;  %v2210_v15 = vadd.f32 %v3979_v47, %v2140_v58  ;;  %v2270_v46 = vmax.f32 %v2206_v28, 0.0  ;;  %v4638_v23 = vsub.f32 %v4637_v42, %v3786_v39  ;;  %2332 = vst [vmem:[%s4500_s4 + $0x140] sm:$0xff] %v2268_v63  ;;  %v4647_v63 = vld [vmem:[#allocation24_spill] sm:$0xff] }
 0x1fc   :  { %v2078_v13 = vmul.f32 %v3808_v19, %v4636_v26  ;;  %v2145_v8 = vmul.f32 %v3846_v38, %v2075_v27  ;;  %v2211_v44 = vadd.f32 %v3979_v47, %v2141_v56  ;;  %v2271_v41 = vmax.f32 %v2207_v60, 0.0  ;;  %2333 = vst [vmem:[%s4500_s4 + $0x148] sm:$0xff] %v2269_v37  ;;  %v4644_v27 = vld [vmem:[#allocation21_spill] sm:$0xff] }
 0x1fd   :  { %v2079_v34 = vmul.f32 %v3808_v19, %v4638_v23  ;;  %v4640_v24 = vsub.f32 %v4639_v7, %v3786_v39  ;;  %v2146_v50 = vmul.f32 %v3846_v38, %v2076_v36  ;;  %v2212_v30 = vadd.f32 %v3979_v47, %v2142_v31  ;;  %2334 = vst [vmem:[%s4500_s4 + $0x150] sm:$0xff] %v2270_v46  ;;  %v4646_v36 = vld [vmem:[#allocation23_spill] sm:$0xff] }
 0x1fe   :  { %v2272_v35 = vmax.f32 %v2208_v4, 0.0  ;;  %v4642_v5 = vsub.f32 %v4641_v12, %v3786_v39  ;;  %v2147_v52 = vmul.f32 %v3846_v38, %v2077_v33  ;;  %v2213_v0 = vadd.f32 %v3979_v47, %v2143_v29  ;;  %2335 = vst [vmem:[%s4500_s4 + $0x158] sm:$0xff] %v2271_v41  ;;  %v4648_v33 = vld [vmem:[#allocation25_spill] sm:$0xff] }
 0x1ff   :  { %v2080_v43 = vmul.f32 %v3808_v19, %v4640_v24  ;;  %v2273_v55 = vmax.f32 %v2209_v32, 0.0  ;;  %v2148_v49 = vmul.f32 %v3846_v38, %v2078_v13  ;;  %v2214_v11 = vadd.f32 %v3979_v47, %v2144_v2 }
 0x200   :  { %v2081_v48 = vmul.f32 %v3808_v19, %v4642_v5  ;;  %v2274_v57 = vmax.f32 %v2210_v15, 0.0  ;;  %v2149_v39 = vmul.f32 %v3846_v38, %v2079_v34  ;;  %v2215_v19 = vadd.f32 %v3979_v47, %v2145_v8  ;;  %2336 = vst [vmem:[%s4500_s4 + $0x160] sm:$0xff] %v2272_v35 }
 0x201   :  { %v2275_v17 = vmax.f32 %v2211_v44, 0.0  ;;  %v2150_v45 = vmul.f32 %v3846_v38, %v2080_v43  ;;  %v2216_v14 = vadd.f32 %v3979_v47, %v2146_v50  ;;  %v2276_v59 = vmax.f32 %v2212_v30, 0.0  ;;  %2337 = vst [vmem:[%s4500_s4 + $0x168] sm:$0xff] %v2273_v55 }
 0x202   :  { %v2151_v22 = vmul.f32 %v3846_v38, %v2081_v48  ;;  %v2217_v3 = vadd.f32 %v3979_v47, %v2147_v52  ;;  %v2277_v40 = vmax.f32 %v2213_v0, 0.0  ;;  %v2218_v54 = vadd.f32 %v3979_v47, %v2148_v49  ;;  %2338 = vst [vmem:[%s4500_s4 + $0x170] sm:$0xff] %v2274_v57 }
 0x203   :  { %v2278_v21 = vmax.f32 %v2214_v11, 0.0  ;;  %v2219_v1 = vadd.f32 %v3979_v47, %v2149_v39  ;;  %v2279_v10 = vmax.f32 %v2215_v19, 0.0  ;;  %2339 = vst [vmem:[%s4500_s4 + $0x178] sm:$0xff] %v2275_v17  ;;  %v2220_v38 = vadd.f32 %v3979_v47, %v2150_v45 }
 0x204   :  { %v2280_v62 = vmax.f32 %v2216_v14, 0.0  ;;  %2340 = vst [vmem:[%s4500_s4 + $0x180] sm:$0xff] %v2276_v59  ;;  %v2221_v58 = vadd.f32 %v3979_v47, %v2151_v22  ;;  %v2281_v28 = vmax.f32 %v2217_v3, 0.0  ;;  %v2222_v18 = vadd.f32 %v3979_v47, %v4643_v53 }
 0x205   :  { %2341 = vst [vmem:[%s4500_s4 + $0x188] sm:$0xff] %v2277_v40  ;;  %v2282_v9 = vmax.f32 %v2218_v54, 0.0  ;;  %v2223_v56 = vadd.f32 %v3979_v47, %v4644_v27  ;;  %v2283_v60 = vmax.f32 %v2219_v1, 0.0  ;;  %v2224_v61 = vadd.f32 %v3979_v47, %v4645_v25 }
 0x206   :  { %2342 = vst [vmem:[%s4500_s4 + $0x190] sm:$0xff] %v2278_v21  ;;  %v2284_v16 = vmax.f32 %v2220_v38, 0.0  ;;  %v2225_v31 = vadd.f32 %v3979_v47, %v4646_v36  ;;  %v2285_v4 = vmax.f32 %v2221_v58, 0.0  ;;  %v2226_v51 = vadd.f32 %v3979_v47, %v4647_v63 }
 0x207   :  { %2343 = vst [vmem:[%s4500_s4 + $0x198] sm:$0xff] %v2279_v10  ;;  %v2286_v20 = vmax.f32 %v2222_v18, 0.0  ;;  %v2227_v29 = vadd.f32 %v3979_v47, %v4648_v33  ;;  %v2287_v32 = vmax.f32 %v2223_v56, 0.0  ;;  %v2288_v37 = vmax.f32 %v2224_v61, 0.0 }
 0x208   :  { %2344 = vst [vmem:[%s4500_s4 + $0x1a0] sm:$0xff] %v2280_v62  ;;  %v2289_v6 = vmax.f32 %v2225_v31, 0.0  ;;  %v2290_v26 = vmax.f32 %v2226_v51, 0.0 }
 0x209   :  { %2345 = vst [vmem:[%s4500_s4 + $0x1a8] sm:$0xff] %v2281_v28  ;;  %v2291_v47 = vmax.f32 %v2227_v29, 0.0 }
 0x20a   :  { %2346 = vst [vmem:[%s4500_s4 + $0x1b0] sm:$0xff] %v2282_v9 }
 0x20b   :  { %2347 = vst [vmem:[%s4500_s4 + $0x1b8] sm:$0xff] %v2283_v60 }
 0x20c   :  { %2348 = vst [vmem:[%s4500_s4 + $0x1c0] sm:$0xff] %v2284_v16 }
 0x20d   :  { %2349 = vst [vmem:[%s4500_s4 + $0x1c8] sm:$0xff] %v2285_v4 }
 0x20e   :  { %2350 = vst [vmem:[%s4500_s4 + $0x1d0] sm:$0xff] %v2286_v20 }
 0x20f   :  { %2351 = vst [vmem:[%s4500_s4 + $0x1d8] sm:$0xff] %v2287_v32 }
 0x210   :  { %2352 = vst [vmem:[%s4500_s4 + $0x1e0] sm:$0xff] %v2288_v37 }
 0x211   :  { %2353 = vst [vmem:[%s4500_s4 + $0x1e8] sm:$0xff] %v2289_v6 }
 0x212   :  { %2354 = vst [vmem:[%s4500_s4 + $0x1f0] sm:$0xff] %v2290_v26 }
 0x213   :  { %2355 = vst [vmem:[%s4500_s4 + $0x1f8] sm:$0xff] %v2291_v47 }

// kernel: encoder_forward.5
= control target key start
LH: loop header
LB: loop body
LE: loop exit
PB: predicated region body
PF: predicated region fallthrough
CT: control target
= control target key end

     0   :  { %vm237_vm0 = vcmask 719872   ;;  %s1754_s1 = inlined_call_operand.vmem [shape: f32[216,1024], index: 1, kind: input, shape index: {}]   ;;  %s1755_s0 = inlined_call_operand.vmem [shape: f32[16,216], index: 0, kind: input, shape index: {}]   ;;  %s1756_s2 = inlined_call_operand.vmem [shape: f32[16,1], index: 2, kind: input, shape index: {}]   ;;  %s1757_s3 = inlined_call_operand.vmem [shape: f32[16,1], index: 3, kind: input, shape index: {}]   ;;  %s1758_s4 = inlined_call_operand.vmem [shape: f32[16,1024], index: 4, kind: output, shape index: {}]  }
   0x1   :  { %v141_v0 = vld [vmem:[%s1754_s1 + $0x3c0] sm:$0xff]  ;;  %v142_v2 = vld [vmem:[%s1754_s1 + $0x3c8] sm:$0xff]  ;;  %v143_v44 = vld [vmem:[%s1754_s1 + $0x3d0] sm:$0xff] }
   0x2   :  { %v229_v1 = vld [vmem:[%s1754_s1 + $0x680] sm:$0xff]  ;;  %244 = vmatpush.msra.mxu0 %v141_v0  ;;  %v230_v3 = vld [vmem:[%s1754_s1 + $0x688] sm:$0xff]  ;;  %290 = vmatpush.msra.mxu2 %v142_v2  ;;  %v231_v45 = vld [vmem:[%s1754_s1 + $0x690] sm:$0xff] }
   0x3   :  { %272 = vmatpush.msra.mxu1 %v229_v1  ;;  %v133_v4 = vld [vmem:[%s1754_s1 + $0x380] sm:$0xff]  ;;  %318 = vmatpush.msra.mxu3 %v230_v3  ;;  %v134_v6 = vld [vmem:[%s1754_s1 + $0x388] sm:$0xff]  ;;  %v135_v48 = vld [vmem:[%s1754_s1 + $0x390] sm:$0xff] }
   0x4   :  { %v221_v5 = vld [vmem:[%s1754_s1 + $0x640] sm:$0xff]  ;;  %v222_v7 = vld [vmem:[%s1754_s1 + $0x648] sm:$0xff]  ;;  %245 = vmatpush.msra.mxu0 %v133_v4  ;;  %291 = vmatpush.msra.mxu2 %v134_v6  ;;  %v223_v49 = vld [vmem:[%s1754_s1 + $0x650] sm:$0xff] }
   0x5   :  { %v125_v8 = vld [vmem:[%s1754_s1 + $0x340] sm:$0xff]  ;;  %273 = vmatpush.msra.mxu1 %v221_v5  ;;  %v126_v10 = vld [vmem:[%s1754_s1 + $0x348] sm:$0xff]  ;;  %319 = vmatpush.msra.mxu3 %v222_v7  ;;  %v127_v52 = vld [vmem:[%s1754_s1 + $0x350] sm:$0xff] }
   0x6   :  { %v213_v9 = vld [vmem:[%s1754_s1 + $0x600] sm:$0xff]  ;;  %v214_v11 = vld [vmem:[%s1754_s1 + $0x608] sm:$0xff]  ;;  %246 = vmatpush.msra.mxu0 %v125_v8  ;;  %292 = vmatpush.msra.mxu2 %v126_v10  ;;  %v215_v53 = vld [vmem:[%s1754_s1 + $0x610] sm:$0xff] }
   0x7   :  { %v117_v12 = vld [vmem:[%s1754_s1 + $0x300] sm:$0xff]  ;;  %274 = vmatpush.msra.mxu1 %v213_v9  ;;  %v118_v14 = vld [vmem:[%s1754_s1 + $0x308] sm:$0xff]  ;;  %320 = vmatpush.msra.mxu3 %v214_v11  ;;  %v119_v56 = vld [vmem:[%s1754_s1 + $0x310] sm:$0xff] }
   0x8   :  { %v205_v13 = vld [vmem:[%s1754_s1 + $0x5c0] sm:$0xff]  ;;  %v206_v15 = vld [vmem:[%s1754_s1 + $0x5c8] sm:$0xff]  ;;  %247 = vmatpush.msra.mxu0 %v117_v12  ;;  %293 = vmatpush.msra.mxu2 %v118_v14  ;;  %v207_v57 = vld [vmem:[%s1754_s1 + $0x5d0] sm:$0xff] }
   0x9   :  { %v109_v16 = vld [vmem:[%s1754_s1 + $0x2c0] sm:$0xff]  ;;  %275 = vmatpush.msra.mxu1 %v205_v13  ;;  %v110_v18 = vld [vmem:[%s1754_s1 + $0x2c8] sm:$0xff]  ;;  %321 = vmatpush.msra.mxu3 %v206_v15  ;;  %v111_v60 = vld [vmem:[%s1754_s1 + $0x2d0] sm:$0xff] }
   0xa   :  { %v197_v17 = vld [vmem:[%s1754_s1 + $0x580] sm:$0xff]  ;;  %v198_v19 = vld [vmem:[%s1754_s1 + $0x588] sm:$0xff]  ;;  %248 = vmatpush.msra.mxu0 %v109_v16  ;;  %294 = vmatpush.msra.mxu2 %v110_v18  ;;  %v199_v61 = vld [vmem:[%s1754_s1 + $0x590] sm:$0xff] }
   0xb   :  { %v101_v20 = vld [vmem:[%s1754_s1 + $0x280] sm:$0xff]  ;;  %276 = vmatpush.msra.mxu1 %v197_v17  ;;  %v102_v22 = vld [vmem:[%s1754_s1 + $0x288] sm:$0xff]  ;;  %322 = vmatpush.msra.mxu3 %v198_v19  ;;  %v103_v0 = vld [vmem:[%s1754_s1 + $0x290] sm:$0xff] }
   0xc   :  { %v189_v21 = vld [vmem:[%s1754_s1 + $0x540] sm:$0xff]  ;;  %v190_v23 = vld [vmem:[%s1754_s1 + $0x548] sm:$0xff]  ;;  %249 = vmatpush.msra.mxu0 %v101_v20  ;;  %295 = vmatpush.msra.mxu2 %v102_v22  ;;  %v191_v1 = vld [vmem:[%s1754_s1 + $0x550] sm:$0xff] }
   0xd   :  { %v93_v24 = vld [vmem:[%s1754_s1 + $0x240] sm:$0xff]  ;;  %277 = vmatpush.msra.mxu1 %v189_v21  ;;  %v94_v26 = vld [vmem:[%s1754_s1 + $0x248] sm:$0xff]  ;;  %323 = vmatpush.msra.mxu3 %v190_v23  ;;  %v144_v2 = vld [vmem:[%s1754_s1 + $0x3d8] sm:$0xff] }
   0xe   :  { %v181_v25 = vld [vmem:[%s1754_s1 + $0x500] sm:$0xff]  ;;  %v182_v27 = vld [vmem:[%s1754_s1 + $0x508] sm:$0xff]  ;;  %250 = vmatpush.msra.mxu0 %v93_v24  ;;  %296 = vmatpush.msra.mxu2 %v94_v26  ;;  %v232_v3 = vld [vmem:[%s1754_s1 + $0x698] sm:$0xff] }
   0xf   :  { %v85_v28 = vld [vmem:[%s1754_s1 + $0x200] sm:$0xff]  ;;  %278 = vmatpush.msra.mxu1 %v181_v25  ;;  %v86_v30 = vld [vmem:[%s1754_s1 + $0x208] sm:$0xff]  ;;  %324 = vmatpush.msra.mxu3 %v182_v27  ;;  %v95_v4 = vld [vmem:[%s1754_s1 + $0x250] sm:$0xff] }
  0x10   :  { %v173_v29 = vld [vmem:[%s1754_s1 + $0x4c0] sm:$0xff]  ;;  %v174_v31 = vld [vmem:[%s1754_s1 + $0x4c8] sm:$0xff]  ;;  %251 = vmatpush.msra.mxu0 %v85_v28  ;;  %297 = vmatpush.msra.mxu2 %v86_v30  ;;  %v183_v5 = vld [vmem:[%s1754_s1 + $0x510] sm:$0xff] }
  0x11   :  { %v77_v32 = vld [vmem:[%s1754_s1 + $0x1c0] sm:$0xff]  ;;  %279 = vmatpush.msra.mxu1 %v173_v29  ;;  %v78_v34 = vld [vmem:[%s1754_s1 + $0x1c8] sm:$0xff]  ;;  %325 = vmatpush.msra.mxu3 %v174_v31  ;;  %v136_v6 = vld [vmem:[%s1754_s1 + $0x398] sm:$0xff] }
  0x12   :  { %v165_v33 = vld [vmem:[%s1754_s1 + $0x480] sm:$0xff]  ;;  %v166_v35 = vld [vmem:[%s1754_s1 + $0x488] sm:$0xff]  ;;  %252 = vmatpush.msra.mxu0 %v77_v32  ;;  %298 = vmatpush.msra.mxu2 %v78_v34  ;;  %v224_v7 = vld [vmem:[%s1754_s1 + $0x658] sm:$0xff] }
  0x13   :  { %v69_v36 = vld [vmem:[%s1754_s1 + $0x180] sm:$0xff]  ;;  %280 = vmatpush.msra.mxu1 %v165_v33  ;;  %v70_v38 = vld [vmem:[%s1754_s1 + $0x188] sm:$0xff]  ;;  %326 = vmatpush.msra.mxu3 %v166_v35  ;;  %v87_v8 = vld [vmem:[%s1754_s1 + $0x210] sm:$0xff] }
  0x14   :  { %v157_v37 = vld [vmem:[%s1754_s1 + $0x440] sm:$0xff]  ;;  %v158_v39 = vld [vmem:[%s1754_s1 + $0x448] sm:$0xff]  ;;  %253 = vmatpush.msra.mxu0 %v69_v36  ;;  %299 = vmatpush.msra.mxu2 %v70_v38  ;;  %v175_v9 = vld [vmem:[%s1754_s1 + $0x4d0] sm:$0xff] }
  0x15   :  { %v61_v40 = vld [vmem:[%s1754_s1 + $0x140] sm:$0xff]  ;;  %281 = vmatpush.msra.mxu1 %v157_v37  ;;  %v62_v42 = vld [vmem:[%s1754_s1 + $0x148] sm:$0xff]  ;;  %327 = vmatpush.msra.mxu3 %v158_v39  ;;  %v128_v10 = vld [vmem:[%s1754_s1 + $0x358] sm:$0xff] }
  0x16   :  { %v149_v41 = vld [vmem:[%s1754_s1 + $0x400] sm:$0xff]  ;;  %v150_v43 = vld [vmem:[%s1754_s1 + $0x408] sm:$0xff]  ;;  %254 = vmatpush.msra.mxu0 %v61_v40  ;;  %300 = vmatpush.msra.mxu2 %v62_v42  ;;  %v216_v11 = vld [vmem:[%s1754_s1 + $0x618] sm:$0xff] }
  0x17   :  { %282 = vmatpush.msra.mxu1 %v149_v41  ;;  %v53_v46 = vld [vmem:[%s1754_s1 + $0x100] sm:$0xff]  ;;  %v54_v47 = vld [vmem:[%s1754_s1 + $0x108] sm:$0xff]  ;;  %328 = vmatpush.msra.mxu3 %v150_v43  ;;  %v79_v12 = vld [vmem:[%s1754_s1 + $0x1d0] sm:$0xff] }
  0x18   :  { %v45_v50 = vld [vmem:[%s1754_s1 + $0xc0] sm:$0xff]  ;;  %v46_v51 = vld [vmem:[%s1754_s1 + $0xc8] sm:$0xff]  ;;  %255 = vmatpush.msra.mxu0 %v53_v46  ;;  %301 = vmatpush.msra.mxu2 %v54_v47  ;;  %v167_v13 = vld [vmem:[%s1754_s1 + $0x490] sm:$0xff] }
  0x19   :  { %336 = vmatpush.msrb.mxu1 %v143_v44  ;;  %364 = vmatpush.msrb.mxu3 %v231_v45  ;;  %v37_v54 = vld [vmem:[%s1754_s1 + $0x80] sm:$0xff]  ;;  %v38_v55 = vld [vmem:[%s1754_s1 + $0x88] sm:$0xff]  ;;  %v120_v14 = vld [vmem:[%s1754_s1 + $0x318] sm:$0xff] }
  0x1a   :  { %256 = vmatpush.msra.mxu0 %v45_v50  ;;  %302 = vmatpush.msra.mxu2 %v46_v51  ;;  %v29_v58 = vld [vmem:[%s1754_s1 + $0x40] sm:$0xff]  ;;  %v30_v59 = vld [vmem:[%s1754_s1 + $0x48] sm:$0xff]  ;;  %v208_v15 = vld [vmem:[%s1754_s1 + $0x5d8] sm:$0xff] }
  0x1b   :  { %337 = vmatpush.msrb.mxu1 %v135_v48  ;;  %365 = vmatpush.msrb.mxu3 %v223_v49  ;;  %v21_v62 = vld [vmem:[%s1754_s1] sm:$0xff]  ;;  %v22_v63 = vld [vmem:[%s1754_s1 + $0x8] sm:$0xff]  ;;  %v71_v16 = vld [vmem:[%s1754_s1 + $0x190] sm:$0xff] }
  0x1c   :  { %257 = vmatpush.msra.mxu0 %v37_v54  ;;  %303 = vmatpush.msra.mxu2 %v38_v55  ;;  %v159_v17 = vld [vmem:[%s1754_s1 + $0x450] sm:$0xff]  ;;  %v112_v18 = vld [vmem:[%s1754_s1 + $0x2d8] sm:$0xff]  ;;  %v1123_v20 = vld [vmem:[%s1755_s0 + $0x8] sm:$0xff] }
  0x1d   :  { %338 = vmatpush.msrb.mxu1 %v127_v52  ;;  %366 = vmatpush.msrb.mxu3 %v215_v53  ;;  %v200_v19 = vld [vmem:[%s1754_s1 + $0x598] sm:$0xff]  ;;  %v63_v21 = vld [vmem:[%s1754_s1 + $0x150] sm:$0xff]  ;;  %v145_v25 = vld [vmem:[%s1754_s1 + $0x3e0] sm:$0xff] }
  0x1e   :  { %258 = vmatpush.msra.mxu0 %v29_v58  ;;  %304 = vmatpush.msra.mxu2 %v30_v59  ;;  %v151_v22 = vld [vmem:[%s1754_s1 + $0x410] sm:$0xff]  ;;  %v104_v23 = vld [vmem:[%s1754_s1 + $0x298] sm:$0xff]  ;;  %v1145_v26 = vld [vmem:[%s1755_s0] sm:$0xff] }
  0x1f   :  { %339 = vmatpush.msrb.mxu1 %v119_v56  ;;  %367 = vmatpush.msrb.mxu3 %v207_v57  ;;  %v192_v24 = vld [vmem:[%s1754_s1 + $0x558] sm:$0xff]  ;;  %v55_v27 = vld [vmem:[%s1754_s1 + $0x110] sm:$0xff]  ;;  %v137_v30 = vld [vmem:[%s1754_s1 + $0x3a0] sm:$0xff] }
  0x20   :  { %259 = vmatpush.msra.mxu0 %v21_v62  ;;  %305 = vmatpush.msra.mxu2 %v22_v63  ;;  %v96_v28 = vld [vmem:[%s1754_s1 + $0x258] sm:$0xff]  ;;  %v47_v31 = vld [vmem:[%s1754_s1 + $0xd0] sm:$0xff]  ;;  %v129_v34 = vld [vmem:[%s1754_s1 + $0x360] sm:$0xff] }
  0x21   :  { %340 = vmatpush.msrb.mxu1 %v111_v60  ;;  %368 = vmatpush.msrb.mxu3 %v199_v61  ;;  %v184_v29 = vld [vmem:[%s1754_s1 + $0x518] sm:$0xff]  ;;  %v39_v35 = vld [vmem:[%s1754_s1 + $0x90] sm:$0xff]  ;;  %v121_v40 = vld [vmem:[%s1754_s1 + $0x320] sm:$0xff] }
  0x22   :  { %382 = vmatpush.msrb.mxu0 %v144_v2  ;;  %410 = vmatpush.msrb.mxu2 %v232_v3  ;;  %v88_v32 = vld [vmem:[%s1754_s1 + $0x218] sm:$0xff]  ;;  %v31_v39 = vld [vmem:[%s1754_s1 + $0x50] sm:$0xff]  ;;  %v113_v45 = vld [vmem:[%s1754_s1 + $0x2e0] sm:$0xff] }
  0x23   :  { %341 = vmatpush.msrb.mxu1 %v103_v0  ;;  %369 = vmatpush.msrb.mxu3 %v191_v1  ;;  %v176_v33 = vld [vmem:[%s1754_s1 + $0x4d8] sm:$0xff]  ;;  %v23_v43 = vld [vmem:[%s1754_s1 + $0x10] sm:$0xff]  ;;  %v105_v48 = vld [vmem:[%s1754_s1 + $0x2a0] sm:$0xff] }
  0x24   :  { %383 = vmatpush.msrb.mxu0 %v136_v6  ;;  %411 = vmatpush.msrb.mxu2 %v224_v7  ;;  %v80_v36 = vld [vmem:[%s1754_s1 + $0x1d8] sm:$0xff]  ;;  %v1209_v44 = vld [vmem:[%s1755_s0 + $0x10] sm:$0xff]  ;;  %v233_v49 = vld [vmem:[%s1754_s1 + $0x6a0] sm:$0xff] }
  0x25   :  { %342 = vmatpush.msrb.mxu1 %v95_v4  ;;  %370 = vmatpush.msrb.mxu3 %v183_v5  ;;  %v168_v37 = vld [vmem:[%s1754_s1 + $0x498] sm:$0xff]  ;;  %v146_v50 = vld [vmem:[%s1754_s1 + $0x3e8] sm:$0xff]  ;;  %v97_v52 = vld [vmem:[%s1754_s1 + $0x260] sm:$0xff] }
  0x26   :  { %384 = vmatpush.msrb.mxu0 %v128_v10  ;;  %412 = vmatpush.msrb.mxu2 %v216_v11  ;;  %v1186_v38 = vld [vmem:[%s1755_s0 + $0x18] sm:$0xff]  ;;  %v225_v53 = vld [vmem:[%s1754_s1 + $0x660] sm:$0xff]  ;;  %v138_v54 = vld [vmem:[%s1754_s1 + $0x3a8] sm:$0xff] }
  0x27   :  { %343 = vmatpush.msrb.mxu1 %v87_v8  ;;  %371 = vmatpush.msrb.mxu3 %v175_v9  ;;  %v72_v41 = vld [vmem:[%s1754_s1 + $0x198] sm:$0xff]  ;;  %v89_v56 = vld [vmem:[%s1754_s1 + $0x220] sm:$0xff]  ;;  %v130_v58 = vld [vmem:[%s1754_s1 + $0x368] sm:$0xff] }
  0x28   :  { %385 = vmatpush.msrb.mxu0 %v120_v14  ;;  %413 = vmatpush.msrb.mxu2 %v208_v15  ;;  %v160_v42 = vld [vmem:[%s1754_s1 + $0x458] sm:$0xff]  ;;  %v217_v57 = vld [vmem:[%s1754_s1 + $0x620] sm:$0xff]  ;;  %v122_v62 = vld [vmem:[%s1754_s1 + $0x328] sm:$0xff] }
  0x29   :  { %344 = vmatpush.msrb.mxu1 %v79_v12  ;;  %372 = vmatpush.msrb.mxu3 %v167_v13  ;;  %v64_v46 = vld [vmem:[%s1754_s1 + $0x158] sm:$0xff]  ;;  %v81_v60 = vld [vmem:[%s1754_s1 + $0x1e0] sm:$0xff]  ;;  %v114_v2 = vld [vmem:[%s1754_s1 + $0x2e8] sm:$0xff] }
  0x2a   :  { %386 = vmatpush.msrb.mxu0 %v112_v18  ;;  %414 = vmatpush.msrb.mxu2 %v200_v19  ;;  %v152_v47 = vld [vmem:[%s1754_s1 + $0x418] sm:$0xff]  ;;  %v209_v61 = vld [vmem:[%s1754_s1 + $0x5e0] sm:$0xff]  ;;  %v106_v6 = vld [vmem:[%s1754_s1 + $0x2a8] sm:$0xff] }
  0x2b   :  { %345 = vmatpush.msrb.mxu1 %v71_v16  ;;  %373 = vmatpush.msrb.mxu3 %v159_v17  ;;  %v56_v51 = vld [vmem:[%s1754_s1 + $0x118] sm:$0xff]  ;;  %v73_v0 = vld [vmem:[%s1754_s1 + $0x1a0] sm:$0xff]  ;;  %v234_v7 = vld [vmem:[%s1754_s1 + $0x6a8] sm:$0xff] }
  0x2c   :  { %820 = vmatmul.msk.f32.vlgmr.msra.gmra.mxu3 %vm237_vm0, %v1123_v20  ;;  %387 = vmatpush.msrb.mxu0 %v104_v23  ;;  %v48_v55 = vld [vmem:[%s1754_s1 + $0xd8] sm:$0xff]  ;;  %v201_v1 = vld [vmem:[%s1754_s1 + $0x5a0] sm:$0xff]  ;;  %v98_v10 = vld [vmem:[%s1754_s1 + $0x268] sm:$0xff] }
  0x2d   :  { %346 = vmatpush.msrb.mxu1 %v63_v21  ;;  %374 = vmatpush.msrb.mxu3 %v151_v22  ;;  %v40_v59 = vld [vmem:[%s1754_s1 + $0x98] sm:$0xff]  ;;  %v65_v4 = vld [vmem:[%s1754_s1 + $0x160] sm:$0xff]  ;;  %v226_v11 = vld [vmem:[%s1754_s1 + $0x668] sm:$0xff] }
  0x2e   :  { %415 = vmatpush.msrb.mxu2 %v192_v24  ;;  %388 = vmatpush.msrb.mxu0 %v96_v28  ;;  %v32_v63 = vld [vmem:[%s1754_s1 + $0x58] sm:$0xff]  ;;  %v193_v5 = vld [vmem:[%s1754_s1 + $0x560] sm:$0xff]  ;;  %v90_v14 = vld [vmem:[%s1754_s1 + $0x228] sm:$0xff] }
  0x2f   :  { %428 = vmatpush.msra.mxu3 %v145_v25  ;;  %306 = vmatmul.f32.vlgmr.msra.gmra.mxu2 %v1145_v26  ;;  %v24_v3 = vld [vmem:[%s1754_s1 + $0x18] sm:$0xff]  ;;  %v57_v8 = vld [vmem:[%s1754_s1 + $0x120] sm:$0xff]  ;;  %v218_v15 = vld [vmem:[%s1754_s1 + $0x628] sm:$0xff] }
  0x30   :  { %347 = vmatpush.msrb.mxu1 %v55_v27  ;;  %416 = vmatpush.msrb.mxu2 %v184_v29  ;;  %v185_v9 = vld [vmem:[%s1754_s1 + $0x520] sm:$0xff]  ;;  %v82_v18 = vld [vmem:[%s1754_s1 + $0x1e8] sm:$0xff] }
  0x31   :  { %429 = vmatpush.msra.mxu3 %v137_v30  ;;  %389 = vmatpush.msrb.mxu0 %v88_v32  ;;  %v177_v12 = vld [vmem:[%s1754_s1 + $0x4e0] sm:$0xff]  ;;  %v210_v19 = vld [vmem:[%s1754_s1 + $0x5e8] sm:$0xff]  ;;  %v147_v30 = vld [vmem:[%s1754_s1 + $0x3f0] sm:$0xff] }
  0x32   :  { %348 = vmatpush.msrb.mxu1 %v47_v31  ;;  %417 = vmatpush.msrb.mxu2 %v176_v33  ;;  %v49_v13 = vld [vmem:[%s1754_s1 + $0xe0] sm:$0xff]  ;;  %v74_v23 = vld [vmem:[%s1754_s1 + $0x1a8] sm:$0xff]  ;;  %v235_v33 = vld [vmem:[%s1754_s1 + $0x6b0] sm:$0xff] }
  0x33   :  { %818 = vmatmul.msk.f32.vlgmr.msra.gmra.mxu1 %vm237_vm0, %v1123_v20  ;;  %430 = vmatpush.msra.mxu3 %v129_v34  ;;  %v169_v16 = vld [vmem:[%s1754_s1 + $0x4a0] sm:$0xff]  ;;  %v202_v24 = vld [vmem:[%s1754_s1 + $0x5a8] sm:$0xff]  ;;  %v139_v34 = vld [vmem:[%s1754_s1 + $0x3b0] sm:$0xff] }
  0x34   :  { %349 = vmatpush.msrb.mxu1 %v39_v35  ;;  %390 = vmatpush.msrb.mxu0 %v80_v36  ;;  %v41_v17 = vld [vmem:[%s1754_s1 + $0xa0] sm:$0xff]  ;;  %v66_v28 = vld [vmem:[%s1754_s1 + $0x168] sm:$0xff] }
  0x35   :  { %418 = vmatpush.msrb.mxu2 %v168_v37  ;;  %260 = vmatmul.f32.vlgmr.msra.gmra.mxu0 %v1145_v26  ;;  %v33_v21 = vld [vmem:[%s1754_s1 + $0x60] sm:$0xff]  ;;  %v194_v29 = vld [vmem:[%s1754_s1 + $0x568] sm:$0xff]  ;;  %v131_v37 = vld [vmem:[%s1754_s1 + $0x370] sm:$0xff] }
  0x36   :  { %821 = vmatmul.msk.f32.gmra.mxu3 %vm237_vm0, %v1186_v38  ;;  %350 = vmatpush.msrb.mxu1 %v31_v39  ;;  %v161_v22 = vld [vmem:[%s1754_s1 + $0x460] sm:$0xff]  ;;  %v58_v31 = vld [vmem:[%s1754_s1 + $0x128] sm:$0xff]  ;;  %v227_v39 = vld [vmem:[%s1754_s1 + $0x670] sm:$0xff] }
  0x37   :  { %431 = vmatpush.msra.mxu3 %v121_v40  ;;  %391 = vmatpush.msrb.mxu0 %v72_v41  ;;  %v25_v25 = vld [vmem:[%s1754_s1 + $0x20] sm:$0xff]  ;;  %v186_v32 = vld [vmem:[%s1754_s1 + $0x528] sm:$0xff] }
  0x38   :  { %419 = vmatpush.msrb.mxu2 %v160_v42  ;;  %351 = vmatpush.msrb.mxu1 %v23_v43  ;;  %v153_v27 = vld [vmem:[%s1754_s1 + $0x420] sm:$0xff]  ;;  %v50_v35 = vld [vmem:[%s1754_s1 + $0xe8] sm:$0xff]  ;;  %v219_v42 = vld [vmem:[%s1754_s1 + $0x630] sm:$0xff] }
  0x39   :  { %309 = vmatmul.f32.gmra.mxu2 %v1209_v44  ;;  %432 = vmatpush.msra.mxu3 %v113_v45  ;;  %v178_v36 = vld [vmem:[%s1754_s1 + $0x4e8] sm:$0xff]  ;;  %v123_v43 = vld [vmem:[%s1754_s1 + $0x330] sm:$0xff] }
  0x3a   :  { %392 = vmatpush.msrb.mxu0 %v64_v46  ;;  %420 = vmatpush.msrb.mxu2 %v152_v47  ;;  %v42_v40 = vld [vmem:[%s1754_s1 + $0xa8] sm:$0xff]  ;;  %v115_v47 = vld [vmem:[%s1754_s1 + $0x2f0] sm:$0xff] }
  0x3b   :  { %433 = vmatpush.msra.mxu3 %v105_v48  ;;  %456 = vmatpush.msra.mxu1 %v233_v49  ;;  %v170_v41 = vld [vmem:[%s1754_s1 + $0x4a8] sm:$0xff] }
  0x3c   :  { %474 = vmatpush.msra.mxu2 %v146_v50  ;;  %393 = vmatpush.msrb.mxu0 %v56_v51  ;;  %v34_v45 = vld [vmem:[%s1754_s1 + $0x68] sm:$0xff]  ;;  %v107_v50 = vld [vmem:[%s1754_s1 + $0x2b0] sm:$0xff] }
  0x3d   :  { %819 = vmatmul.msk.f32.gmra.mxu1 %vm237_vm0, %v1186_v38  ;;  %434 = vmatpush.msra.mxu3 %v97_v52  ;;  %v162_v46 = vld [vmem:[%s1754_s1 + $0x468] sm:$0xff]  ;;  %v211_v51 = vld [vmem:[%s1754_s1 + $0x5f0] sm:$0xff]  ;;  %v148_v52 = vld [vmem:[%s1754_s1 + $0x3f8] sm:$0xff] }
  0x3e   :  { %457 = vmatpush.msra.mxu1 %v225_v53  ;;  %475 = vmatpush.msra.mxu2 %v138_v54  ;;  %v26_v48 = vld [vmem:[%s1754_s1 + $0x28] sm:$0xff]  ;;  %v236_v53 = vld [vmem:[%s1754_s1 + $0x6b8] sm:$0xff]  ;;  %v99_v54 = vld [vmem:[%s1754_s1 + $0x270] sm:$0xff] }
  0x3f   :  { %394 = vmatpush.msrb.mxu0 %v48_v55  ;;  %822 = vmatmul.msk.f32.vlgmr.msrb.gmra.mxu3 %vm237_vm0, %v1123_v20  ;;  %v154_v49 = vld [vmem:[%s1754_s1 + $0x428] sm:$0xff]  ;;  %v203_v55 = vld [vmem:[%s1754_s1 + $0x5b0] sm:$0xff] }
  0x40   :  { %263 = vmatmul.f32.gmra.mxu0 %v1209_v44  ;;  %435 = vmatpush.msra.mxu3 %v89_v56  ;;  %v140_v56 = vld [vmem:[%s1754_s1 + $0x3b8] sm:$0xff] }
  0x41   :  { %458 = vmatpush.msra.mxu1 %v217_v57  ;;  %476 = vmatpush.msra.mxu2 %v130_v58  ;;  %v91_v57 = vld [vmem:[%s1754_s1 + $0x230] sm:$0xff] }
  0x42   :  { %395 = vmatpush.msrb.mxu0 %v40_v59  ;;  %824 = vmatmul.msk.f32.vlgmr.msrb.gmra.mxu2 %vm237_vm0, %v1123_v20  ;;  %v195_v58 = vld [vmem:[%s1754_s1 + $0x570] sm:$0xff]  ;;  %v132_v59 = vld [vmem:[%s1754_s1 + $0x378] sm:$0xff] }
  0x43   :  { %436 = vmatpush.msra.mxu3 %v81_v60  ;;  %459 = vmatpush.msra.mxu1 %v209_v61  ;;  %v228_v60 = vld [vmem:[%s1754_s1 + $0x678] sm:$0xff]  ;;  %v83_v61 = vld [vmem:[%s1754_s1 + $0x1f0] sm:$0xff] }
  0x44   :  { %477 = vmatpush.msra.mxu2 %v122_v62  ;;  %396 = vmatpush.msrb.mxu0 %v32_v63  ;;  %v187_v62 = vld [vmem:[%s1754_s1 + $0x530] sm:$0xff]  ;;  %v124_v63 = vld [vmem:[%s1754_s1 + $0x338] sm:$0xff] }
  0x45   :  { %437 = vmatpush.msra.mxu3 %v73_v0  ;;  %460 = vmatpush.msra.mxu1 %v201_v1  ;;  %v75_v0 = vld [vmem:[%s1754_s1 + $0x1b0] sm:$0xff] }
  0x46   :  { %478 = vmatpush.msra.mxu2 %v114_v2  ;;  %397 = vmatpush.msrb.mxu0 %v24_v3  ;;  %v179_v1 = vld [vmem:[%s1754_s1 + $0x4f0] sm:$0xff]  ;;  %v116_v2 = vld [vmem:[%s1754_s1 + $0x2f8] sm:$0xff] }
  0x47   :  { %352 = vmatmul.f32.vlgmr.msrb.gmra.mxu1 %v1145_v26  ;;  %438 = vmatpush.msra.mxu3 %v65_v4  ;;  %v220_v3 = vld [vmem:[%s1754_s1 + $0x638] sm:$0xff]  ;;  %v67_v4 = vld [vmem:[%s1754_s1 + $0x170] sm:$0xff] }
  0x48   :  { %461 = vmatpush.msra.mxu1 %v193_v5  ;;  %479 = vmatpush.msra.mxu2 %v106_v6  ;;  %v171_v5 = vld [vmem:[%s1754_s1 + $0x4b0] sm:$0xff]  ;;  %v108_v6 = vld [vmem:[%s1754_s1 + $0x2b8] sm:$0xff] }
  0x49   :  { %502 = vmatpush.msra.mxu0 %v234_v7  ;;  %439 = vmatpush.msra.mxu3 %v57_v8  ;;  %v212_v7 = vld [vmem:[%s1754_s1 + $0x5f8] sm:$0xff]  ;;  %v59_v8 = vld [vmem:[%s1754_s1 + $0x130] sm:$0xff] }
  0x4a   :  { %398 = vmatmul.f32.vlgmr.msrb.gmra.mxu0 %v1145_v26  ;;  %462 = vmatpush.msra.mxu1 %v185_v9  ;;  %v163_v9 = vld [vmem:[%s1754_s1 + $0x470] sm:$0xff] }
  0x4b   :  { %480 = vmatpush.msra.mxu2 %v98_v10  ;;  %503 = vmatpush.msra.mxu0 %v226_v11  ;;  %v100_v10 = vld [vmem:[%s1754_s1 + $0x278] sm:$0xff] }
  0x4c   :  { %823 = vmatmul.msk.f32.gmra.mxu3 %vm237_vm0, %v1186_v38  ;;  %463 = vmatpush.msra.mxu1 %v177_v12  ;;  %v204_v11 = vld [vmem:[%s1754_s1 + $0x5b8] sm:$0xff]  ;;  %v51_v12 = vld [vmem:[%s1754_s1 + $0xf0] sm:$0xff] }
  0x4d   :  { %440 = vmatpush.msra.mxu3 %v49_v13  ;;  %481 = vmatpush.msra.mxu2 %v90_v14  ;;  %v155_v13 = vld [vmem:[%s1754_s1 + $0x430] sm:$0xff]  ;;  %v92_v14 = vld [vmem:[%s1754_s1 + $0x238] sm:$0xff] }
  0x4e   :  { %504 = vmatpush.msra.mxu0 %v218_v15  ;;  %464 = vmatpush.msra.mxu1 %v169_v16  ;;  %v196_v15 = vld [vmem:[%s1754_s1 + $0x578] sm:$0xff]  ;;  %v43_v16 = vld [vmem:[%s1754_s1 + $0xb0] sm:$0xff] }
  0x4f   :  { %441 = vmatpush.msra.mxu3 %v41_v17  ;;  %482 = vmatpush.msra.mxu2 %v82_v18  ;;  %v84_v17 = vld [vmem:[%s1754_s1 + $0x1f8] sm:$0xff] }
  0x50   :  { %505 = vmatpush.msra.mxu0 %v210_v19  ;;  %825 = vmatmul.msk.f32.gmra.mxu2 %vm237_vm0, %v1186_v38  ;;  %v188_v18 = vld [vmem:[%s1754_s1 + $0x538] sm:$0xff]  ;;  %v35_v19 = vld [vmem:[%s1754_s1 + $0x70] sm:$0xff] }
  0x51   :  { %442 = vmatpush.msra.mxu3 %v33_v21  ;;  %465 = vmatpush.msra.mxu1 %v161_v22  ;;  %v76_v21 = vld [vmem:[%s1754_s1 + $0x1b8] sm:$0xff] }
  0x52   :  { %483 = vmatpush.msra.mxu2 %v74_v23  ;;  %506 = vmatpush.msra.mxu0 %v202_v24  ;;  %v180_v22 = vld [vmem:[%s1754_s1 + $0x4f8] sm:$0xff]  ;;  %v27_v23 = vld [vmem:[%s1754_s1 + $0x30] sm:$0xff] }
  0x53   :  { %355 = vmatmul.f32.gmra.mxu1 %v1209_v44  ;;  %443 = vmatpush.msra.mxu3 %v25_v25  ;;  %v68_v24 = vld [vmem:[%s1754_s1 + $0x178] sm:$0xff] }
  0x54   :  { %466 = vmatpush.msra.mxu1 %v153_v27  ;;  %484 = vmatpush.msra.mxu2 %v66_v28  ;;  %v172_v25 = vld [vmem:[%s1754_s1 + $0x4b8] sm:$0xff] }
  0x55   :  { %507 = vmatpush.msra.mxu0 %v194_v29  ;;  %444 = vmatmul.f32.vlgmr.msra.gmra.mxu3 %v1145_v26  ;;  %v60_v27 = vld [vmem:[%s1754_s1 + $0x138] sm:$0xff] }
  0x56   :  { %520 = vmatpush.msrb.mxu1 %v147_v30  ;;  %485 = vmatpush.msra.mxu2 %v58_v31  ;;  %v164_v28 = vld [vmem:[%s1754_s1 + $0x478] sm:$0xff] }
  0x57   :  { %508 = vmatpush.msra.mxu0 %v186_v32  ;;  %548 = vmatpush.msrb.mxu3 %v235_v33  ;;  %v52_v29 = vld [vmem:[%s1754_s1 + $0xf8] sm:$0xff] }
  0x58   :  { %521 = vmatpush.msrb.mxu1 %v139_v34  ;;  %401 = vmatmul.f32.gmra.mxu0 %v1209_v44  ;;  %v156_v30 = vld [vmem:[%s1754_s1 + $0x438] sm:$0xff] }
  0x59   :  { %486 = vmatpush.msra.mxu2 %v50_v35  ;;  %509 = vmatpush.msra.mxu0 %v178_v36  ;;  %v44_v31 = vld [vmem:[%s1754_s1 + $0xb8] sm:$0xff] }
  0x5a   :  { %522 = vmatpush.msrb.mxu1 %v131_v37  ;;  %549 = vmatpush.msrb.mxu3 %v227_v39  ;;  %v36_v32 = vld [vmem:[%s1754_s1 + $0x78] sm:$0xff] }
  0x5b   :  { %487 = vmatpush.msra.mxu2 %v42_v40  ;;  %510 = vmatpush.msra.mxu0 %v170_v41  ;;  %v28_v33 = vld [vmem:[%s1754_s1 + $0x38] sm:$0xff] }
  0x5c   :  { %826 = vmatmul.msk.f32.vlgmr.msra.gmra.mxu1 %vm237_vm0, %v1123_v20  ;;  %550 = vmatpush.msrb.mxu3 %v219_v42 }
  0x5d   :  { %523 = vmatpush.msrb.mxu1 %v123_v43  ;;  %488 = vmatpush.msra.mxu2 %v34_v45 }
  0x5e   :  { %511 = vmatpush.msra.mxu0 %v162_v46  ;;  %447 = vmatmul.f32.gmra.mxu3 %v1209_v44 }
  0x5f   :  { %524 = vmatpush.msrb.mxu1 %v115_v47  ;;  %489 = vmatpush.msra.mxu2 %v26_v48 }
  0x60   :  { %512 = vmatpush.msra.mxu0 %v154_v49  ;;  %490 = vmatmul.f32.vlgmr.msra.gmra.mxu2 %v1145_v26 }
  0x61   :  { %525 = vmatpush.msrb.mxu1 %v107_v50  ;;  %551 = vmatpush.msrb.mxu3 %v211_v51 }
  0x62   :  { %566 = vmatpush.msrb.mxu0 %v148_v52  ;;  %594 = vmatpush.msrb.mxu2 %v236_v53 }
  0x63   :  { %526 = vmatpush.msrb.mxu1 %v99_v54  ;;  %552 = vmatpush.msrb.mxu3 %v203_v55 }
  0x64   :  { %567 = vmatpush.msrb.mxu0 %v140_v56  ;;  %827 = vmatmul.msk.f32.gmra.mxu1 %vm237_vm0, %v1186_v38  ;;  %v842_v56 = vmov 0  }
  0x65   :  { %527 = vmatpush.msrb.mxu1 %v91_v57  ;;  %553 = vmatpush.msrb.mxu3 %v195_v58 }
  0x66   :  { %568 = vmatpush.msrb.mxu0 %v132_v59  ;;  %595 = vmatpush.msrb.mxu2 %v228_v60 }
  0x67   :  { %828 = vmatmul.msk.f32.vlgmr.msra.gmra.mxu0 %vm237_vm0, %v1123_v20  ;;  %528 = vmatpush.msrb.mxu1 %v83_v61 }
  0x68   :  { %554 = vmatpush.msrb.mxu3 %v187_v62  ;;  %569 = vmatpush.msrb.mxu0 %v124_v63 }
  0x69   :  { %493 = vmatmul.f32.gmra.mxu2 %v1209_v44  ;;  %529 = vmatpush.msrb.mxu1 %v75_v0 }
  0x6a   :  { %555 = vmatpush.msrb.mxu3 %v179_v1  ;;  %570 = vmatpush.msrb.mxu0 %v116_v2 }
  0x6b   :  { %596 = vmatpush.msrb.mxu2 %v220_v3  ;;  %530 = vmatpush.msrb.mxu1 %v67_v4 }
  0x6c   :  { %556 = vmatpush.msrb.mxu3 %v171_v5  ;;  %571 = vmatpush.msrb.mxu0 %v108_v6 }
  0x6d   :  { %597 = vmatpush.msrb.mxu2 %v212_v7  ;;  %531 = vmatpush.msrb.mxu1 %v59_v8 }
  0x6e   :  { %557 = vmatpush.msrb.mxu3 %v163_v9  ;;  %572 = vmatpush.msrb.mxu0 %v100_v10 }
  0x6f   :  { %598 = vmatpush.msrb.mxu2 %v204_v11  ;;  %829 = vmatmul.msk.f32.gmra.mxu0 %vm237_vm0, %v1186_v38 }
  0x70   :  { %532 = vmatpush.msrb.mxu1 %v51_v12  ;;  %558 = vmatpush.msrb.mxu3 %v155_v13 }
  0x71   :  { %573 = vmatpush.msrb.mxu0 %v92_v14  ;;  %599 = vmatpush.msrb.mxu2 %v196_v15 }
  0x72   :  { %830 = vmatmul.msk.f32.vlgmr.msrb.gmra.mxu3 %vm237_vm0, %v1123_v20  ;;  %533 = vmatpush.msrb.mxu1 %v43_v16 }
  0x73   :  { %574 = vmatpush.msrb.mxu0 %v84_v17  ;;  %600 = vmatpush.msrb.mxu2 %v188_v18 }
  0x74   :  { %534 = vmatpush.msrb.mxu1 %v35_v19  ;;  %836 = vset.pattern.permute.xlu0 %v842_v56 }
  0x75   :  { %575 = vmatpush.msrb.mxu0 %v76_v21  ;;  %601 = vmatpush.msrb.mxu2 %v180_v22 }
  0x76   :  { %535 = vmatpush.msrb.mxu1 %v27_v23  ;;  %837 = vset.pattern.permute.xlu1 %v842_v56 }
  0x77   :  { %576 = vmatpush.msrb.mxu0 %v68_v24  ;;  %602 = vmatpush.msrb.mxu2 %v172_v25 }
  0x78   :  { %536 = vmatmul.f32.vlgmr.msrb.gmra.mxu1 %v1145_v26  ;;  %835 = vset.pattern.permute.xlu2 %v842_v56  ;;  %v726_v56 = vld [vmem:[%s1756_s2] sm:$0xff] }
  0x79   :  { %577 = vmatpush.msrb.mxu0 %v60_v27  ;;  %603 = vmatpush.msrb.mxu2 %v164_v28 }
  0x7a   :  { %831 = vmatmul.msk.f32.gmra.mxu3 %vm237_vm0, %v1186_v38  ;;  %730 = vperm.xlu2 %835, %v726_v56  }
  0x7b   :  { %578 = vmatpush.msrb.mxu0 %v52_v29  ;;  %604 = vmatpush.msrb.mxu2 %v156_v30 }
  0x7c   :  { %832 = vmatmul.msk.f32.vlgmr.msrb.gmra.mxu2 %vm237_vm0, %v1123_v20 }
  0x7d   :  { %579 = vmatpush.msrb.mxu0 %v44_v31 }
  0x7f   :  { %580 = vmatpush.msrb.mxu0 %v36_v32 }
  0x80   :  { %539 = vmatmul.f32.gmra.mxu1 %v1209_v44 }
  0x81   :  { %581 = vmatpush.msrb.mxu0 %v28_v33 }
  0x82   :  { %582 = vmatmul.f32.vlgmr.msrb.gmra.mxu0 %v1145_v26 }
  0x84   :  { %833 = vmatmul.msk.f32.gmra.mxu2 %vm237_vm0, %v1186_v38 }
  0x8a   :  { %585 = vmatmul.f32.gmra.mxu0 %v1209_v44 }
  0xaf   :  { %v330_v34 = vpop.f32.mrf.mxu3 }
  0xb0   :  { %v284_v20 = vpop.f32.mrf.mxu1 }
  0xb2   :  { %v261_v37 = vpop.f32.mrf.mxu0  ;;  %v307_v39 = vpop.f32.mrf.mxu2 }
  0xb3   :  { %v1584_v51 = vadd.f32 %v284_v20, %v261_v37  ;;  %v1586_v44 = vadd.f32 %v330_v34, %v307_v39 }
  0xb5   :  { %v630_v57 = vmul.f32 %v1584_v51, %v1584_v51  ;;  %v631_v58 = vmul.f32 %v1586_v44, %v1586_v44  ;;  %v612_v60 = vadd.f32 %v1586_v44, %v1584_v51 }
  0xb7   :  { %v646_v63 = vadd.f32 %v631_v58, %v630_v57 }
  0xb9   :  { %v333_v36 = vpop.f32.mrf.mxu3 }
  0xba   :  { %v287_v35 = vpop.f32.mrf.mxu1 }
  0xbc   :  { %v310_v43 = vpop.f32.mrf.mxu2 }
  0xbd   :  { %v264_v42 = vpop.f32.mrf.mxu0  ;;  %v1598_v62 = vadd.f32 %v333_v36, %v310_v43 }
  0xbe   :  { %v1596_v61 = vadd.f32 %v287_v35, %v264_v42 }
  0xbf   :  { %v639_v7 = vmul.f32 %v1598_v62, %v1598_v62 }
  0xc0   :  { %v638_v6 = vmul.f32 %v1596_v61, %v1596_v61  ;;  %v621_v14 = vadd.f32 %v1598_v62, %v1596_v61 }
  0xc2   :  { %v376_v41 = vpop.f32.mrf.mxu3  ;;  %v655_v18 = vadd.f32 %v639_v7, %v638_v6  ;;  %v754_v6 = vld [vmem:[%s1757_s3] sm:$0xff]  ;;  %v755_v7 = vld [vmem:[%s1757_s3 + $0x8] sm:$0xff] }
  0xc4   :  { %v353_v40 = vpop.f32.mrf.mxu1 }
  0xc5   :  { %v422_v48 = vpop.f32.mrf.mxu2  ;;  %v1592_v59 = vadd.f32 %v376_v41, %v353_v40 }
  0xc7   :  { %v399_v47 = vpop.f32.mrf.mxu0  ;;  %v632_v0 = vmul.f32 %v1592_v59, %v1592_v59  ;;  %v613_v4 = vadd.f32 %v612_v60, %v1592_v59 }
  0xc8   :  { %v1602_v1 = vadd.f32 %v422_v48, %v399_v47 }
  0xc9   :  { %v647_v11 = vadd.f32 %v646_v63, %v632_v0 }
  0xca   :  { %v633_v12 = vmul.f32 %v1602_v1, %v1602_v1  ;;  %v614_v15 = vadd.f32 %v613_v4, %v1602_v1  ;;  %v727_v4 = vld [vmem:[%s1756_s2 + $0x8] sm:$0xff] }
  0xcb   :  { %735 = vperm.xlu2 %835, %v727_v4  }
  0xcc   :  { %v648_v22 = vadd.f32 %v647_v11, %v633_v12 }
  0xcf   :  { %v379_v46 = vpop.f32.mrf.mxu3 }
  0xd0   :  { %v356_v45 = vpop.f32.mrf.mxu1 }
  0xd1   :  { %v1611_v8 = vadd.f32 %v379_v46, %v356_v45 }
  0xd3   :  { %v425_v38 = vpop.f32.mrf.mxu2  ;;  %v640_v19 = vmul.f32 %v1611_v8, %v1611_v8  ;;  %v622_v25 = vadd.f32 %v621_v14, %v1611_v8 }
  0xd5   :  { %v402_v50 = vpop.f32.mrf.mxu0  ;;  %v656_v33 = vadd.f32 %v655_v18, %v640_v19 }
  0xd6   :  { %v1626_v21 = vadd.f32 %v425_v38, %v402_v50 }
  0xd8   :  { %v445_v26 = vpop.f32.mrf.mxu3  ;;  %v641_v20 = vmul.f32 %v1626_v21, %v1626_v21  ;;  %v623_v41 = vadd.f32 %v622_v25, %v1626_v21 }
  0xd9   :  { %v468_v49 = vpop.f32.mrf.mxu1 }
  0xda   :  { %v1605_v5 = vadd.f32 %v468_v49, %v445_v26  ;;  %v657_v48 = vadd.f32 %v656_v33, %v641_v20 }
  0xdc   :  { %v634_v16 = vmul.f32 %v1605_v5, %v1605_v5  ;;  %v615_v23 = vadd.f32 %v614_v15, %v1605_v5 }
  0xde   :  { %v649_v32 = vadd.f32 %v648_v22, %v634_v16 }
  0xe1   :  { %v448_v52 = vpop.f32.mrf.mxu3  ;;  %v471_v53 = vpop.f32.mrf.mxu1 }
  0xe2   :  { %v1632_v27 = vadd.f32 %v471_v53, %v448_v52 }
  0xe3   :  { %v491_v54 = vpop.f32.mrf.mxu2 }
  0xe4   :  { %v514_v55 = vpop.f32.mrf.mxu0  ;;  %v642_v42 = vmul.f32 %v1632_v27, %v1632_v27  ;;  %v624_v26 = vadd.f32 %v623_v41, %v1632_v27 }
  0xe5   :  { %v1615_v13 = vadd.f32 %v514_v55, %v491_v54 }
  0xe6   :  { %v658_v38 = vadd.f32 %v657_v48, %v642_v42 }
  0xe7   :  { %v635_v24 = vmul.f32 %v1615_v13, %v1615_v13  ;;  %v616_v30 = vadd.f32 %v615_v23, %v1615_v13 }
  0xe9   :  { %v650_v40 = vadd.f32 %v649_v32, %v635_v24 }
  0xec   :  { %v494_v9 = vpop.f32.mrf.mxu2  ;;  %v517_v10 = vpop.f32.mrf.mxu0 }
  0xed   :  { %v1639_v36 = vadd.f32 %v517_v10, %v494_v9 }
  0xef   :  { %v643_v49 = vmul.f32 %v1639_v36, %v1639_v36  ;;  %v625_v52 = vadd.f32 %v624_v26, %v1639_v36 }
  0xf1   :  { %v659_v60 = vadd.f32 %v658_v38, %v643_v49 }
  0xf5   :  { %v537_v2 = vpop.f32.mrf.mxu1  ;;  %v560_v3 = vpop.f32.mrf.mxu3 }
  0xf6   :  { %v1622_v17 = vadd.f32 %v560_v3, %v537_v2 }
  0xf8   :  { %v636_v31 = vmul.f32 %v1622_v17, %v1622_v17  ;;  %v617_v39 = vadd.f32 %v616_v30, %v1622_v17 }
  0xfa   :  { %v651_v47 = vadd.f32 %v650_v40, %v636_v31 }
  0xfd   :  { %v540_v28 = vpop.f32.mrf.mxu1  ;;  %v563_v29 = vpop.f32.mrf.mxu3 }
  0xfe   :  { %v1647_v43 = vadd.f32 %v563_v29, %v540_v28 }
  0xff   :  { %v583_v34 = vpop.f32.mrf.mxu0  ;;  %v606_v35 = vpop.f32.mrf.mxu2 }
 0x100   :  { %v1641_v37 = vadd.f32 %v606_v35, %v583_v34  ;;  %v644_v53 = vmul.f32 %v1647_v43, %v1647_v43  ;;  %v626_v58 = vadd.f32 %v625_v52, %v1647_v43 }
 0x102   :  { %v618_v45 = vadd.f32 %v617_v39, %v1641_v37  ;;  %v637_v46 = vmul.f32 %v1641_v37, %v1641_v37  ;;  %v660_v2 = vadd.f32 %v659_v60, %v644_v53 }
 0x104   :  { %619 = vadd.xlane.f32.xlu0 %v618_v45  ;;  %v652_v50 = vadd.f32 %v651_v47, %v637_v46 }
 0x106   :  { %653 = vadd.xlane.f32.xlu1 %v652_v50 }
 0x107   :  { %v586_v54 = vpop.f32.mrf.mxu0  ;;  %v609_v55 = vpop.f32.mrf.mxu2 }
 0x108   :  { %v1661_v57 = vadd.f32 %v609_v55, %v586_v54 }
 0x10a   :  { %v627_v63 = vadd.f32 %v626_v58, %v1661_v57  ;;  %v645_v0 = vmul.f32 %v1661_v57, %v1661_v57 }
 0x10c   :  { %628 = vadd.xlane.f32.xlu0 %v627_v63  ;;  %v661_v3 = vadd.f32 %v660_v2, %v645_v0 }
 0x10e   :  { %662 = vadd.xlane.f32.xlu1 %v661_v3 }
 0x120   :  { %758 = vperm.xlu0 %836, %v754_v6  }
 0x127   :  { %763 = vperm.xlu1 %837, %v755_v7  }
 0x177   :  { %v620_v9 = vpop.xlane.xlu0 %619 }
 0x178   :  { %v664_v10 = vmul.f32 0.0009765625, %v620_v9 }
 0x179   :  { %v654_v11 = vpop.xlane.xlu1 %653 }
 0x17a   :  { %v666_v12 = vmul.f32 0.0009765625, %v654_v11  ;;  %v668_v14 = vmul.f32 %v664_v10, %v664_v10  ;;  %v672_v33 = vsub.f32 %v1584_v51, %v664_v10  ;;  %v673_v20 = vsub.f32 %v1586_v44, %v664_v10 }
 0x17b   :  { %v674_v34 = vsub.f32 %v1592_v59, %v664_v10  ;;  %v675_v35 = vsub.f32 %v1602_v1, %v664_v10  ;;  %v676_v39 = vsub.f32 %v1605_v5, %v664_v10  ;;  %v677_v41 = vsub.f32 %v1615_v13, %v664_v10 }
 0x17c   :  { %v670_v15 = vsub.f32 %v666_v12, %v668_v14  ;;  %v678_v42 = vsub.f32 %v1622_v17, %v664_v10  ;;  %v679_v44 = vsub.f32 %v1641_v37, %v664_v10 }
 0x17e   :  { %v688_v16 = vadd.f32 1e-05, %v670_v15 }
 0x17f   :  { %v629_v18 = vpop.xlane.xlu0 %628 }
 0x180   :  { %838 = vrsqrt.f32 %v688_v16  ;;  %v1676_v19 = vmul.f32 0.0009765625, %v629_v18  ;;  %vm696_vm2 = vweird.f32 %v688_v16 }
 0x181   :  { %v663_v22 = vpop.xlane.xlu1 %662 }
 0x182   :  { %v667_v23 = vmul.f32 0.0009765625, %v663_v22  ;;  %v669_v24 = vmul.f32 %v1676_v19, %v1676_v19  ;;  %v680_v46 = vsub.f32 %v1596_v61, %v1676_v19  ;;  %v681_v51 = vsub.f32 %v1598_v62, %v1676_v19 }
 0x183   :  { %v682_v5 = vsub.f32 %v1611_v8, %v1676_v19  ;;  %v683_v13 = vsub.f32 %v1626_v21, %v1676_v19  ;;  %v684_v17 = vsub.f32 %v1632_v27, %v1676_v19  ;;  %v685_v61 = vsub.f32 %v1639_v36, %v1676_v19  ;;  %v731_v8 = vpop.permute.xlu2 %730 }
 0x184   :  { %v671_v25 = vsub.f32 %v667_v23, %v669_v24  ;;  %v686_v62 = vsub.f32 %v1647_v43, %v1676_v19  ;;  %v687_v37 = vsub.f32 %v1661_v57, %v1676_v19 }
 0x186   :  { %v839_v28 = vpop.eup %838  ;;  %v689_v29 = vadd.f32 1e-05, %v671_v25 }
 0x187   :  { %v691_v30 = vmul.f32 %v839_v28, %v688_v16  ;;  %vm697_vm1 = vweird.f32 %v839_v28 }
 0x188   :  { %840 = vrsqrt.f32 %v689_v29  ;;  %vm698_vm3 = vmor %vm696_vm2, %vm697_vm1  ;;  %vm706_vm4 = vweird.f32 %v689_v29 }
 0x189   :  { %v692_v31 = vmul.f32 %v839_v28, %v691_v30 }
 0x18b   :  { %v693_v32 = vmul.f32 0.5, %v692_v31  ;;  %v736_v30 = vpop.permute.xlu2 %735 }
 0x18d   :  { %v694_v40 = vsub.f32 1.5, %v693_v32 }
 0x18e   :  { %v841_v45 = vpop.eup %840 }
 0x18f   :  { %v695_v59 = vmul.f32 %v839_v28, %v694_v40  ;;  %v701_v1 = vmul.f32 %v841_v45, %v689_v29  ;;  %vm707_vm5 = vweird.f32 %v841_v45 }
 0x190   :  { %vm708_vm6 = vmor %vm706_vm4, %vm707_vm5 }
 0x191   :  { %v699_v47 = vsel %vm698_vm3, %v839_v28, %v695_v59  ;;  %v702_v48 = vmul.f32 %v841_v45, %v701_v1 }
 0x192   :  { %v710_v26 = vmul.f32 %v699_v47, %v672_v33  ;;  %v711_v21 = vmul.f32 %v699_v47, %v673_v20  ;;  %v712_v49 = vmul.f32 %v699_v47, %v674_v34  ;;  %v713_v50 = vmul.f32 %v699_v47, %v675_v35  ;;  %v759_v36 = vpop.permute.xlu0 %758 }
 0x193   :  { %v703_v38 = vmul.f32 0.5, %v702_v48  ;;  %v714_v27 = vmul.f32 %v699_v47, %v676_v39  ;;  %v715_v52 = vmul.f32 %v699_v47, %v677_v41  ;;  %v716_v53 = vmul.f32 %v699_v47, %v678_v42 }
 0x194   :  { %v717_v54 = vmul.f32 %v699_v47, %v679_v44  ;;  %v738_v55 = vmul.f32 %v731_v8, %v710_v26  ;;  %v739_v43 = vmul.f32 %v731_v8, %v711_v21  ;;  %v740_v56 = vmul.f32 %v731_v8, %v712_v49 }
 0x195   :  { %v704_v58 = vsub.f32 1.5, %v703_v38  ;;  %v741_v57 = vmul.f32 %v731_v8, %v713_v50  ;;  %v742_v60 = vmul.f32 %v731_v8, %v714_v27  ;;  %v743_v63 = vmul.f32 %v731_v8, %v715_v52 }
 0x196   :  { %v744_v0 = vmul.f32 %v731_v8, %v716_v53  ;;  %v745_v2 = vmul.f32 %v731_v8, %v717_v54  ;;  %v766_v3 = vadd.f32 %v759_v36, %v738_v55  ;;  %v767_v4 = vadd.f32 %v759_v36, %v739_v43 }
 0x197   :  { %v705_v6 = vmul.f32 %v841_v45, %v704_v58  ;;  %v768_v7 = vadd.f32 %v759_v36, %v740_v56  ;;  %v769_v9 = vadd.f32 %v759_v36, %v741_v57  ;;  %v770_v10 = vadd.f32 %v759_v36, %v742_v60 }
 0x198   :  { %v771_v11 = vadd.f32 %v759_v36, %v743_v63  ;;  %v772_v12 = vadd.f32 %v759_v36, %v744_v0  ;;  %v773_v14 = vadd.f32 %v759_v36, %v745_v2  ;;  %v782_v15 = vmax.f32 %v766_v3, 0.0 }
 0x199   :  { %v709_v16 = vsel %vm708_vm6, %v841_v45, %v705_v6  ;;  %v783_v18 = vmax.f32 %v767_v4, 0.0  ;;  %v784_v19 = vmax.f32 %v768_v7, 0.0  ;;  %v785_v22 = vmax.f32 %v769_v9, 0.0  ;;  %v764_v40 = vpop.permute.xlu1 %763 }
 0x19a   :  { %v718_v23 = vmul.f32 %v709_v16, %v680_v46  ;;  %v719_v24 = vmul.f32 %v709_v16, %v681_v51  ;;  %v720_v25 = vmul.f32 %v709_v16, %v682_v5  ;;  %v721_v28 = vmul.f32 %v709_v16, %v683_v13  ;;  %798 = vst [vmem:[%s1758_s4] sm:$0xff] %v782_v15 }
 0x19b   :  { %v722_v31 = vmul.f32 %v709_v16, %v684_v17  ;;  %v723_v29 = vmul.f32 %v709_v16, %v685_v61  ;;  %v724_v32 = vmul.f32 %v709_v16, %v686_v62  ;;  %v725_v33 = vmul.f32 %v709_v16, %v687_v37  ;;  %799 = vst [vmem:[%s1758_s4 + $0x8] sm:$0xff] %v783_v18 }
 0x19c   :  { %v746_v20 = vmul.f32 %v736_v30, %v718_v23  ;;  %v747_v34 = vmul.f32 %v736_v30, %v719_v24  ;;  %v748_v35 = vmul.f32 %v736_v30, %v720_v25  ;;  %v749_v39 = vmul.f32 %v736_v30, %v721_v28  ;;  %800 = vst [vmem:[%s1758_s4 + $0x10] sm:$0xff] %v784_v19 }
 0x19d   :  { %v750_v41 = vmul.f32 %v736_v30, %v722_v31  ;;  %v751_v42 = vmul.f32 %v736_v30, %v723_v29  ;;  %v752_v45 = vmul.f32 %v736_v30, %v724_v32  ;;  %v753_v46 = vmul.f32 %v736_v30, %v725_v33  ;;  %801 = vst [vmem:[%s1758_s4 + $0x18] sm:$0xff] %v785_v22 }
 0x19e   :  { %v786_v51 = vmax.f32 %v770_v10, 0.0  ;;  %v787_v44 = vmax.f32 %v771_v11, 0.0  ;;  %v788_v59 = vmax.f32 %v772_v12, 0.0  ;;  %v789_v1 = vmax.f32 %v773_v14, 0.0 }
 0x19f   :  { %v774_v5 = vadd.f32 %v764_v40, %v746_v20  ;;  %v775_v13 = vadd.f32 %v764_v40, %v747_v34  ;;  %v776_v17 = vadd.f32 %v764_v40, %v748_v35  ;;  %v777_v61 = vadd.f32 %v764_v40, %v749_v39 }
 0x1a0   :  { %802 = vst [vmem:[%s1758_s4 + $0x20] sm:$0xff] %v786_v51  ;;  %v778_v62 = vadd.f32 %v764_v40, %v750_v41  ;;  %v779_v37 = vadd.f32 %v764_v40, %v751_v42  ;;  %v780_v8 = vadd.f32 %v764_v40, %v752_v45  ;;  %v781_v21 = vadd.f32 %v764_v40, %v753_v46 }
 0x1a1   :  { %803 = vst [vmem:[%s1758_s4 + $0x28] sm:$0xff] %v787_v44  ;;  %v790_v47 = vmax.f32 %v774_v5, 0.0  ;;  %v791_v48 = vmax.f32 %v775_v13, 0.0  ;;  %v792_v26 = vmax.f32 %v776_v17, 0.0  ;;  %v793_v49 = vmax.f32 %v777_v61, 0.0 }
 0x1a2   :  { %804 = vst [vmem:[%s1758_s4 + $0x30] sm:$0xff] %v788_v59  ;;  %v794_v50 = vmax.f32 %v778_v62, 0.0  ;;  %v795_v38 = vmax.f32 %v779_v37, 0.0  ;;  %v796_v27 = vmax.f32 %v780_v8, 0.0  ;;  %v797_v52 = vmax.f32 %v781_v21, 0.0 }
 0x1a3   :  { %805 = vst [vmem:[%s1758_s4 + $0x38] sm:$0xff] %v789_v1 }
 0x1a4   :  { %806 = vst [vmem:[%s1758_s4 + $0x40] sm:$0xff] %v790_v47 }
 0x1a5   :  { %807 = vst [vmem:[%s1758_s4 + $0x48] sm:$0xff] %v791_v48 }
 0x1a6   :  { %808 = vst [vmem:[%s1758_s4 + $0x50] sm:$0xff] %v792_v26 }
 0x1a7   :  { %809 = vst [vmem:[%s1758_s4 + $0x58] sm:$0xff] %v793_v49 }
 0x1a8   :  { %810 = vst [vmem:[%s1758_s4 + $0x60] sm:$0xff] %v794_v50 }
 0x1a9   :  { %811 = vst [vmem:[%s1758_s4 + $0x68] sm:$0xff] %v795_v38 }
 0x1aa   :  { %812 = vst [vmem:[%s1758_s4 + $0x70] sm:$0xff] %v796_v27 }
 0x1ab   :  { %813 = vst [vmem:[%s1758_s4 + $0x78] sm:$0xff] %v797_v52 }

// kernel: encoder_forward.6
= control target key start
LH: loop header
LB: loop body
LE: loop exit
PB: predicated region body
PF: predicated region fallthrough
CT: control target
= control target key end

     0   :  { %vm87_vm0 = vcmask 392192   ;;  %v388_v52 = vmov 0   ;;  %s691_s1 = inlined_call_operand.vmem [shape: f32[432,128], index: 1, kind: input, shape index: {}]   ;;  %s692_s0 = inlined_call_operand.vmem [shape: f32[32,432], index: 0, kind: input, shape index: {}]   ;;  %s693_s2 = inlined_call_operand.vmem [shape: f32[32,1], index: 2, kind: input, shape index: {}]   ;;  %s694_s3 = inlined_call_operand.vmem [shape: f32[32,1], index: 3, kind: input, shape index: {}]   ;;  %s695_s4 = inlined_call_operand.vmem [shape: f32[32,128], index: 4, kind: output, shape index: {}]  }
   0x1   :  { %v80_v0 = vld [vmem:[%s691_s1 + $0x178] sm:$0xff]  ;;  %v79_v1 = vld [vmem:[%s691_s1 + $0x170] sm:$0xff]  ;;  %v78_v5 = vld [vmem:[%s691_s1 + $0x168] sm:$0xff]  ;;  %377 = vset.pattern.permute.xlu2 %v388_v52  ;;  %378 = vset.pattern.permute.xlu0 %v388_v52 }
   0x2   :  { %v48_v2 = vld [vmem:[%s691_s1 + $0x78] sm:$0xff]  ;;  %158 = vmatpush.msra.mxu2 %v80_v0  ;;  %v47_v4 = vld [vmem:[%s691_s1 + $0x70] sm:$0xff]  ;;  %v46_v7 = vld [vmem:[%s691_s1 + $0x68] sm:$0xff]  ;;  %379 = vset.pattern.permute.xlu1 %v388_v52 }
   0x3   :  { %100 = vmatpush.msra.mxu0 %v48_v2  ;;  %v64_v3 = vld [vmem:[%s691_s1 + $0xf8] sm:$0xff]  ;;  %v63_v6 = vld [vmem:[%s691_s1 + $0xf0] sm:$0xff]  ;;  %v62_v8 = vld [vmem:[%s691_s1 + $0xe8] sm:$0xff] }
   0x4   :  { %129 = vmatpush.msra.mxu1 %v64_v3  ;;  %159 = vmatpush.msra.mxu2 %v79_v1  ;;  %v77_v9 = vld [vmem:[%s691_s1 + $0x160] sm:$0xff]  ;;  %v76_v12 = vld [vmem:[%s691_s1 + $0x158] sm:$0xff]  ;;  %v75_v15 = vld [vmem:[%s691_s1 + $0x150] sm:$0xff] }
   0x5   :  { %101 = vmatpush.msra.mxu0 %v47_v4  ;;  %v45_v10 = vld [vmem:[%s691_s1 + $0x60] sm:$0xff]  ;;  %v44_v13 = vld [vmem:[%s691_s1 + $0x58] sm:$0xff]  ;;  %v43_v16 = vld [vmem:[%s691_s1 + $0x50] sm:$0xff] }
   0x6   :  { %130 = vmatpush.msra.mxu1 %v63_v6  ;;  %160 = vmatpush.msra.mxu2 %v78_v5  ;;  %v61_v11 = vld [vmem:[%s691_s1 + $0xe0] sm:$0xff]  ;;  %v60_v14 = vld [vmem:[%s691_s1 + $0xd8] sm:$0xff]  ;;  %v59_v17 = vld [vmem:[%s691_s1 + $0xd0] sm:$0xff] }
   0x7   :  { %102 = vmatpush.msra.mxu0 %v46_v7  ;;  %v74_v18 = vld [vmem:[%s691_s1 + $0x148] sm:$0xff]  ;;  %v73_v22 = vld [vmem:[%s691_s1 + $0x140] sm:$0xff]  ;;  %v84_v26 = vld [vmem:[%s691_s1 + $0x198] sm:$0xff] }
   0x8   :  { %131 = vmatpush.msra.mxu1 %v62_v8  ;;  %161 = vmatpush.msra.mxu2 %v77_v9  ;;  %v42_v19 = vld [vmem:[%s691_s1 + $0x48] sm:$0xff]  ;;  %v41_v23 = vld [vmem:[%s691_s1 + $0x40] sm:$0xff]  ;;  %v72_v27 = vld [vmem:[%s691_s1 + $0x138] sm:$0xff] }
   0x9   :  { %103 = vmatpush.msra.mxu0 %v45_v10  ;;  %v86_v20 = vld [vmem:[%s691_s1 + $0x1a8] sm:$0xff]  ;;  %v85_v24 = vld [vmem:[%s691_s1 + $0x1a0] sm:$0xff]  ;;  %v40_v28 = vld [vmem:[%s691_s1 + $0x38] sm:$0xff] }
   0xa   :  { %132 = vmatpush.msra.mxu1 %v61_v11  ;;  %162 = vmatpush.msra.mxu2 %v76_v12  ;;  %v58_v21 = vld [vmem:[%s691_s1 + $0xc8] sm:$0xff]  ;;  %v57_v25 = vld [vmem:[%s691_s1 + $0xc0] sm:$0xff]  ;;  %v56_v29 = vld [vmem:[%s691_s1 + $0xb8] sm:$0xff] }
   0xb   :  { %104 = vmatpush.msra.mxu0 %v44_v13  ;;  %197 = vmatpush.msra.mxu3 %v86_v20  ;;  %v83_v30 = vld [vmem:[%s691_s1 + $0x190] sm:$0xff]  ;;  %v82_v34 = vld [vmem:[%s691_s1 + $0x188] sm:$0xff]  ;;  %v81_v38 = vld [vmem:[%s691_s1 + $0x180] sm:$0xff] }
   0xc   :  { %133 = vmatpush.msra.mxu1 %v60_v14  ;;  %163 = vmatpush.msra.mxu2 %v75_v15  ;;  %v71_v31 = vld [vmem:[%s691_s1 + $0x130] sm:$0xff]  ;;  %v70_v35 = vld [vmem:[%s691_s1 + $0x128] sm:$0xff]  ;;  %v69_v39 = vld [vmem:[%s691_s1 + $0x120] sm:$0xff] }
   0xd   :  { %105 = vmatpush.msra.mxu0 %v43_v16  ;;  %198 = vmatpush.msra.mxu3 %v85_v24  ;;  %v39_v32 = vld [vmem:[%s691_s1 + $0x30] sm:$0xff]  ;;  %v38_v36 = vld [vmem:[%s691_s1 + $0x28] sm:$0xff]  ;;  %v37_v40 = vld [vmem:[%s691_s1 + $0x20] sm:$0xff] }
   0xe   :  { %134 = vmatpush.msra.mxu1 %v59_v17  ;;  %164 = vmatpush.msra.mxu2 %v74_v18  ;;  %v55_v33 = vld [vmem:[%s691_s1 + $0xb0] sm:$0xff]  ;;  %v54_v37 = vld [vmem:[%s691_s1 + $0xa8] sm:$0xff]  ;;  %v53_v41 = vld [vmem:[%s691_s1 + $0xa0] sm:$0xff] }
   0xf   :  { %106 = vmatpush.msra.mxu0 %v42_v19  ;;  %199 = vmatpush.msra.mxu3 %v84_v26  ;;  %v20_v42 = vld [vmem:[%s692_s0 + $0x18] sm:$0xff]  ;;  %v67_v46 = vld [vmem:[%s691_s1 + $0x110] sm:$0xff]  ;;  %v304_v49 = vld [vmem:[%s693_s2] sm:$0xff] }
  0x10   :  { %135 = vmatpush.msra.mxu1 %v58_v21  ;;  %165 = vmatpush.msra.mxu2 %v73_v22  ;;  %v68_v43 = vld [vmem:[%s691_s1 + $0x118] sm:$0xff]  ;;  %v35_v47 = vld [vmem:[%s691_s1 + $0x10] sm:$0xff]  ;;  %v66_v50 = vld [vmem:[%s691_s1 + $0x108] sm:$0xff] }
  0x11   :  { %107 = vmatpush.msra.mxu0 %v41_v23  ;;  %200 = vmatpush.msra.mxu3 %v83_v30  ;;  %v36_v44 = vld [vmem:[%s691_s1 + $0x18] sm:$0xff]  ;;  %v51_v48 = vld [vmem:[%s691_s1 + $0x90] sm:$0xff]  ;;  %v34_v51 = vld [vmem:[%s691_s1 + $0x8] sm:$0xff] }
  0x12   :  { %136 = vmatpush.msra.mxu1 %v57_v25  ;;  %166 = vmatpush.msra.mxu2 %v72_v27  ;;  %v52_v45 = vld [vmem:[%s691_s1 + $0x98] sm:$0xff]  ;;  %v50_v53 = vld [vmem:[%s691_s1 + $0x88] sm:$0xff]  ;;  %v65_v54 = vld [vmem:[%s691_s1 + $0x100] sm:$0xff] }
  0x13   :  { %108 = vmatpush.msra.mxu0 %v40_v28  ;;  %201 = vmatpush.msra.mxu3 %v82_v34  ;;  %v33_v55 = vld [vmem:[%s691_s1] sm:$0xff]  ;;  %v19_v56 = vld [vmem:[%s692_s0 + $0x10] sm:$0xff]  ;;  %v18_v59 = vld [vmem:[%s692_s0 + $0x8] sm:$0xff] }
  0x14   :  { %137 = vmatpush.msra.mxu1 %v56_v29  ;;  %167 = vmatpush.msra.mxu2 %v71_v31  ;;  %v49_v57 = vld [vmem:[%s691_s1 + $0x80] sm:$0xff]  ;;  %v24_v60 = vld [vmem:[%s692_s0 + $0x38] sm:$0xff]  ;;  %v23_v61 = vld [vmem:[%s692_s0 + $0x30] sm:$0xff] }
  0x15   :  { %109 = vmatpush.msra.mxu0 %v39_v32  ;;  %202 = vmatpush.msra.mxu3 %v81_v38  ;;  %v17_v58 = vld [vmem:[%s692_s0] sm:$0xff]  ;;  %v22_v63 = vld [vmem:[%s692_s0 + $0x28] sm:$0xff]  ;;  %v28_v0 = vld [vmem:[%s692_s0 + $0x58] sm:$0xff] }
  0x16   :  { %138 = vmatpush.msra.mxu1 %v55_v33  ;;  %168 = vmatpush.msra.mxu2 %v70_v35  ;;  %v21_v62 = vld [vmem:[%s692_s0 + $0x20] sm:$0xff]  ;;  %v27_v1 = vld [vmem:[%s692_s0 + $0x50] sm:$0xff]  ;;  %v26_v3 = vld [vmem:[%s692_s0 + $0x48] sm:$0xff] }
  0x17   :  { %110 = vmatpush.msra.mxu0 %v38_v36  ;;  %372 = vmatmul.msk.f32.vlgmr.msra.gmra.mxu3 %vm87_vm0, %v20_v42  ;;  %v25_v2 = vld [vmem:[%s692_s0 + $0x40] sm:$0xff]  ;;  %v32_v4 = vld [vmem:[%s692_s0 + $0x78] sm:$0xff]  ;;  %v31_v5 = vld [vmem:[%s692_s0 + $0x70] sm:$0xff] }
  0x18   :  { %139 = vmatpush.msra.mxu1 %v54_v37  ;;  %169 = vmatpush.msra.mxu2 %v69_v39  ;;  %v29_v6 = vld [vmem:[%s692_s0 + $0x60] sm:$0xff]  ;;  %v30_v7 = vld [vmem:[%s692_s0 + $0x68] sm:$0xff]  ;;  %v307_v32 = vld [vmem:[%s693_s2 + $0x18] sm:$0xff] }
  0x19   :  { %111 = vmatpush.msra.mxu0 %v37_v40  ;;  %310 = vperm.xlu2 %377, %v304_v49   ;;  %v305_v33 = vld [vmem:[%s693_s2 + $0x8] sm:$0xff]  ;;  %v306_v34 = vld [vmem:[%s693_s2 + $0x10] sm:$0xff]  ;;  %v332_v35 = vld [vmem:[%s694_s3] sm:$0xff] }
  0x1a   :  { %140 = vmatpush.msra.mxu1 %v53_v41  ;;  %170 = vmatpush.msra.mxu2 %v68_v43  ;;  %v333_v36 = vld [vmem:[%s694_s3 + $0x8] sm:$0xff]  ;;  %v334_v37 = vld [vmem:[%s694_s3 + $0x10] sm:$0xff] }
  0x1b   :  { %112 = vmatpush.msra.mxu0 %v36_v44 }
  0x1c   :  { %141 = vmatpush.msra.mxu1 %v52_v45  ;;  %171 = vmatpush.msra.mxu2 %v67_v46 }
  0x1d   :  { %113 = vmatpush.msra.mxu0 %v35_v47 }
  0x1e   :  { %142 = vmatpush.msra.mxu1 %v51_v48  ;;  %172 = vmatpush.msra.mxu2 %v66_v50 }
  0x1f   :  { %114 = vmatpush.msra.mxu0 %v34_v51  ;;  %373 = vmatmul.msk.f32.gmra.mxu3 %vm87_vm0, %v24_v60 }
  0x20   :  { %143 = vmatpush.msra.mxu1 %v50_v53  ;;  %173 = vmatpush.msra.mxu2 %v65_v54  ;;  %v335_v53 = vld [vmem:[%s694_s3 + $0x18] sm:$0xff] }
  0x21   :  { %115 = vmatpush.msra.mxu0 %v33_v55  ;;  %174 = vmatmul.f32.vlgmr.msra.gmra.mxu2 %v19_v56 }
  0x22   :  { %144 = vmatpush.msra.mxu1 %v49_v57  ;;  %116 = vmatmul.f32.vlgmr.msra.gmra.mxu0 %v17_v58 }
  0x23   :  { %145 = vmatmul.f32.vlgmr.msra.gmra.mxu1 %v18_v59 }
  0x27   :  { %374 = vmatmul.msk.f32.gmra.mxu3 %vm87_vm0, %v28_v0 }
  0x29   :  { %177 = vmatmul.f32.gmra.mxu2 %v23_v61 }
  0x2a   :  { %119 = vmatmul.f32.gmra.mxu0 %v21_v62 }
  0x2b   :  { %148 = vmatmul.f32.gmra.mxu1 %v22_v63 }
  0x2f   :  { %375 = vmatmul.msk.f32.gmra.mxu3 %vm87_vm0, %v32_v4 }
  0x31   :  { %180 = vmatmul.f32.gmra.mxu2 %v27_v1 }
  0x32   :  { %122 = vmatmul.f32.gmra.mxu0 %v25_v2 }
  0x33   :  { %151 = vmatmul.f32.gmra.mxu1 %v26_v3 }
  0x39   :  { %183 = vmatmul.f32.gmra.mxu2 %v31_v5 }
  0x3a   :  { %125 = vmatmul.f32.gmra.mxu0 %v29_v6 }
  0x3b   :  { %154 = vmatmul.f32.gmra.mxu1 %v30_v7 }
  0x73   :  { %v311_v46 = vpop.permute.xlu2 %310 }
  0x9a   :  { %v204_v10 = vpop.f32.mrf.mxu3 }
  0x9f   :  { %v117_v8 = vpop.f32.mrf.mxu0 }
  0xa0   :  { %v146_v9 = vpop.f32.mrf.mxu1 }
  0xa1   :  { %v147_v11 = vadd.f32 %v146_v9, %v117_v8 }
  0xa2   :  { %v207_v19 = vpop.f32.mrf.mxu3 }
  0xa4   :  { %v175_v12 = vpop.f32.mrf.mxu2 }
  0xa5   :  { %v176_v13 = vadd.f32 %v175_v12, %v147_v11 }
  0xa7   :  { %v631_v14 = vadd.f32 %v204_v10, %v176_v13  ;;  %v120_v15 = vpop.f32.mrf.mxu0 }
  0xa8   :  { %v149_v16 = vpop.f32.mrf.mxu1 }
  0xa9   :  { %216 = vadd.xlane.f32.xlu0 %v631_v14  ;;  %v150_v17 = vadd.f32 %v149_v16, %v120_v15  ;;  %v224_v18 = vmul.f32 %v631_v14, %v631_v14 }
  0xaa   :  { %v210_v28 = vpop.f32.mrf.mxu3 }
  0xab   :  { %228 = vadd.xlane.f32.xlu2 %v224_v18 }
  0xac   :  { %v178_v20 = vpop.f32.mrf.mxu2 }
  0xad   :  { %v179_v21 = vadd.f32 %v178_v20, %v150_v17 }
  0xaf   :  { %v636_v22 = vadd.f32 %v207_v19, %v179_v21  ;;  %v123_v23 = vpop.f32.mrf.mxu0 }
  0xb0   :  { %v152_v24 = vpop.f32.mrf.mxu1 }
  0xb1   :  { %218 = vadd.xlane.f32.xlu0 %v636_v22  ;;  %v153_v25 = vadd.f32 %v152_v24, %v123_v23  ;;  %v225_v26 = vmul.f32 %v636_v22, %v636_v22 }
  0xb2   :  { %v213_v43 = vpop.f32.mrf.mxu3 }
  0xb3   :  { %230 = vadd.xlane.f32.xlu2 %v225_v26 }
  0xb4   :  { %v181_v27 = vpop.f32.mrf.mxu2 }
  0xb5   :  { %v182_v29 = vadd.f32 %v181_v27, %v153_v25 }
  0xb7   :  { %v641_v30 = vadd.f32 %v210_v28, %v182_v29  ;;  %v126_v38 = vpop.f32.mrf.mxu0 }
  0xb8   :  { %v155_v39 = vpop.f32.mrf.mxu1 }
  0xb9   :  { %220 = vadd.xlane.f32.xlu1 %v641_v30  ;;  %v226_v31 = vmul.f32 %v641_v30, %v641_v30  ;;  %v156_v40 = vadd.f32 %v155_v39, %v126_v38 }
  0xbb   :  { %232 = vadd.xlane.f32.xlu0 %v226_v31 }
  0xbc   :  { %v184_v41 = vpop.f32.mrf.mxu2 }
  0xbd   :  { %v185_v42 = vadd.f32 %v184_v41, %v156_v40 }
  0xbf   :  { %v664_v44 = vadd.f32 %v213_v43, %v185_v42 }
  0xc1   :  { %v227_v45 = vmul.f32 %v664_v44, %v664_v44 }
  0xcb   :  { %325 = vperm.xlu2 %377, %v307_v32  }
  0xcf   :  { %315 = vperm.xlu0 %378, %v305_v33  }
  0xd2   :  { %320 = vperm.xlu1 %379, %v306_v34  }
  0xd3   :  { %338 = vperm.xlu2 %377, %v332_v35  }
  0xda   :  { %343 = vperm.xlu1 %379, %v333_v36  }
  0xdb   :  { %348 = vperm.xlu2 %377, %v334_v37  }
 0x104   :  { %222 = vadd.xlane.f32.xlu1 %v664_v44 }
 0x10c   :  { %234 = vadd.xlane.f32.xlu1 %v227_v45 }
 0x11c   :  { %v217_v47 = vpop.xlane.xlu0 %216 }
 0x11d   :  { %v236_v48 = vmul.f32 0.0078125, %v217_v47 }
 0x11e   :  { %v229_v49 = vpop.xlane.xlu2 %228 }
 0x11f   :  { %v244_v50 = vmul.f32 %v236_v48, %v236_v48  ;;  %v240_v51 = vmul.f32 0.0078125, %v229_v49  ;;  %v252_v15 = vsub.f32 %v631_v14, %v236_v48 }
 0x121   :  { %v248_v52 = vsub.f32 %v240_v51, %v244_v50 }
 0x123   :  { %v256_v54 = vadd.f32 1e-05, %v248_v52 }
 0x124   :  { %v219_v55 = vpop.xlane.xlu0 %218 }
 0x125   :  { %380 = vrsqrt.f32 %v256_v54  ;;  %v237_v56 = vmul.f32 0.0078125, %v219_v55  ;;  %353 = vperm.xlu1 %379, %v335_v53   ;;  %vm266_vm2 = vweird.f32 %v256_v54 }
 0x126   :  { %v231_v57 = vpop.xlane.xlu2 %230 }
 0x127   :  { %v245_v58 = vmul.f32 %v237_v56, %v237_v56  ;;  %v241_v59 = vmul.f32 0.0078125, %v231_v57  ;;  %v253_v35 = vsub.f32 %v636_v22, %v237_v56 }
 0x129   :  { %v249_v60 = vsub.f32 %v241_v59, %v245_v58 }
 0x12b   :  { %v381_v61 = vpop.eup %380  ;;  %v257_v62 = vadd.f32 1e-05, %v249_v60 }
 0x12c   :  { %v261_v63 = vmul.f32 %v381_v61, %v256_v54  ;;  %v221_v0 = vpop.xlane.xlu1 %220  ;;  %vm267_vm1 = vweird.f32 %v381_v61 }
 0x12d   :  { %382 = vrsqrt.f32 %v257_v62  ;;  %v238_v1 = vmul.f32 0.0078125, %v221_v0  ;;  %vm268_vm3 = vmor %vm266_vm2, %vm267_vm1  ;;  %vm276_vm5 = vweird.f32 %v257_v62 }
 0x12e   :  { %v262_v2 = vmul.f32 %v381_v61, %v261_v63  ;;  %v233_v3 = vpop.xlane.xlu0 %232  ;;  %v672_v7 = vpop.permute.xlu2 %325 }
 0x12f   :  { %v246_v4 = vmul.f32 %v238_v1, %v238_v1  ;;  %v242_v5 = vmul.f32 0.0078125, %v233_v3  ;;  %v254_v36 = vsub.f32 %v641_v30, %v238_v1 }
 0x130   :  { %v263_v6 = vmul.f32 0.5, %v262_v2 }
 0x131   :  { %v250_v8 = vsub.f32 %v242_v5, %v246_v4 }
 0x132   :  { %v264_v9 = vsub.f32 1.5, %v263_v6 }
 0x133   :  { %v383_v10 = vpop.eup %382  ;;  %v258_v11 = vadd.f32 1e-05, %v250_v8 }
 0x134   :  { %v271_v12 = vmul.f32 %v383_v10, %v257_v62  ;;  %v265_v13 = vmul.f32 %v381_v61, %v264_v9  ;;  %vm277_vm4 = vweird.f32 %v383_v10 }
 0x135   :  { %384 = vrsqrt.f32 %v258_v11  ;;  %vm278_vm7 = vmor %vm276_vm5, %vm277_vm4  ;;  %vm286_vm8 = vweird.f32 %v258_v11 }
 0x136   :  { %v272_v16 = vmul.f32 %v383_v10, %v271_v12  ;;  %v269_v17 = vsel %vm268_vm3, %v381_v61, %v265_v13  ;;  %v339_v21 = vpop.permute.xlu2 %338 }
 0x137   :  { %v300_v18 = vmul.f32 %v269_v17, %v252_v15 }
 0x138   :  { %v273_v19 = vmul.f32 0.5, %v272_v16 }
 0x139   :  { %v328_v20 = vmul.f32 %v311_v46, %v300_v18 }
 0x13a   :  { %v274_v26 = vsub.f32 1.5, %v273_v19 }
 0x13b   :  { %v385_v23 = vpop.eup %384  ;;  %v356_v24 = vadd.f32 %v339_v21, %v328_v20 }
 0x13c   :  { %v281_v25 = vmul.f32 %v385_v23, %v258_v11  ;;  %v275_v14 = vmul.f32 %v383_v10, %v274_v26  ;;  %vm287_vm6 = vweird.f32 %v385_v23 }
 0x13d   :  { %v360_v27 = vmax.f32 %v356_v24, 0.0  ;;  %vm288_vm9 = vmor %vm286_vm8, %vm287_vm6 }
 0x13e   :  { %v282_v28 = vmul.f32 %v385_v23, %v281_v25  ;;  %v279_v32 = vsel %vm278_vm7, %v383_v10, %v275_v14  ;;  %v349_v42 = vpop.permute.xlu2 %348 }
 0x13f   :  { %364 = vst [vmem:[%s695_s4] sm:$0xff] %v360_v27  ;;  %v301_v38 = vmul.f32 %v279_v32, %v253_v35 }
 0x140   :  { %v283_v29 = vmul.f32 0.5, %v282_v28 }
 0x141   :  { %v316_v40 = vpop.permute.xlu0 %315 }
 0x142   :  { %v284_v31 = vsub.f32 1.5, %v283_v29  ;;  %v329_v43 = vmul.f32 %v316_v40, %v301_v38 }
 0x144   :  { %v321_v33 = vpop.permute.xlu1 %320  ;;  %v285_v34 = vmul.f32 %v385_v23, %v284_v31 }
 0x146   :  { %v289_v37 = vsel %vm288_vm9, %v385_v23, %v285_v34 }
 0x147   :  { %v302_v39 = vmul.f32 %v289_v37, %v254_v36 }
 0x149   :  { %v330_v41 = vmul.f32 %v321_v33, %v302_v39 }
 0x14b   :  { %v358_v45 = vadd.f32 %v349_v42, %v330_v41 }
 0x14c   :  { %v344_v46 = vpop.permute.xlu1 %343 }
 0x14d   :  { %v362_v47 = vmax.f32 %v358_v45, 0.0  ;;  %v357_v48 = vadd.f32 %v344_v46, %v329_v43 }
 0x14f   :  { %366 = vst [vmem:[%s695_s4 + $0x10] sm:$0xff] %v362_v47  ;;  %v361_v49 = vmax.f32 %v357_v48, 0.0 }
 0x151   :  { %365 = vst [vmem:[%s695_s4 + $0x8] sm:$0xff] %v361_v49 }
 0x177   :  { %v223_v22 = vpop.xlane.xlu1 %222 }
 0x178   :  { %v239_v30 = vmul.f32 0.0078125, %v223_v22 }
 0x17a   :  { %v247_v51 = vmul.f32 %v239_v30, %v239_v30  ;;  %v255_v61 = vsub.f32 %v664_v44, %v239_v30 }
 0x17f   :  { %v235_v50 = vpop.xlane.xlu1 %234 }
 0x180   :  { %v243_v52 = vmul.f32 0.0078125, %v235_v50 }
 0x182   :  { %v251_v53 = vsub.f32 %v243_v52, %v247_v51 }
 0x184   :  { %v259_v54 = vadd.f32 1e-05, %v251_v53 }
 0x186   :  { %386 = vrsqrt.f32 %v259_v54  ;;  %vm296_vm11 = vweird.f32 %v259_v54 }
 0x18c   :  { %v387_v55 = vpop.eup %386 }
 0x18d   :  { %v291_v56 = vmul.f32 %v387_v55, %v259_v54  ;;  %vm297_vm10 = vweird.f32 %v387_v55 }
 0x18e   :  { %vm298_vm12 = vmor %vm296_vm11, %vm297_vm10 }
 0x18f   :  { %v292_v57 = vmul.f32 %v387_v55, %v291_v56 }
 0x191   :  { %v293_v58 = vmul.f32 0.5, %v292_v57 }
 0x193   :  { %v294_v59 = vsub.f32 1.5, %v293_v58 }
 0x195   :  { %v295_v60 = vmul.f32 %v387_v55, %v294_v59 }
 0x197   :  { %v299_v62 = vsel %vm298_vm12, %v387_v55, %v295_v60  ;;  %v354_v1 = vpop.permute.xlu1 %353 }
 0x198   :  { %v303_v63 = vmul.f32 %v299_v62, %v255_v61 }
 0x19a   :  { %v331_v0 = vmul.f32 %v672_v7, %v303_v63 }
 0x19c   :  { %v359_v2 = vadd.f32 %v354_v1, %v331_v0 }
 0x19e   :  { %v363_v3 = vmax.f32 %v359_v2, 0.0 }
 0x1a0   :  { %367 = vst [vmem:[%s695_s4 + $0x18] sm:$0xff] %v363_v3 }

// kernel: encoder_forward.7
= control target key start
LH: loop header
LB: loop body
LE: loop exit
PB: predicated region body
PF: predicated region fallthrough
CT: control target
= control target key end

     0   :  { %s1569_s0 = inlined_call_operand.vmem [shape: f32[2,2048], index: 0, kind: input, shape index: {}]   ;;  %s1570_s1 = inlined_call_operand.vmem [shape: f32[2048,2], index: 1, kind: input, shape index: {}]   ;;  %s1571_s2 = inlined_call_operand.vmem [shape: f32[1,2], index: 2, kind: input, shape index: {}]   ;;  %s1572_s3 = inlined_call_operand.vmem [shape: f32[1,2], index: 3, kind: input, shape index: {}]   ;;  %s1573_s4 = inlined_call_operand.hbm [shape: f32[2,2], index: 4, kind: output, shape index: {}]  }
   0x1   :  { %v37_v0 = vld [vmem:[%s1570_s1 + $0x78] sm:$0xff]  ;;  %v36_v2 = vld [vmem:[%s1570_s1 + $0x70] sm:$0xff]  ;;  %v35_v6 = vld [vmem:[%s1570_s1 + $0x68] sm:$0xff] }
   0x2   :  { %v69_v1 = vld [vmem:[%s1570_s1 + $0x178] sm:$0xff]  ;;  %319 = vmatpush.msra.mxu0 %v37_v0  ;;  %v68_v4 = vld [vmem:[%s1570_s1 + $0x170] sm:$0xff]  ;;  %v67_v8 = vld [vmem:[%s1570_s1 + $0x168] sm:$0xff] }
   0x3   :  { %359 = vmatpush.msra.mxu2 %v69_v1  ;;  %v53_v3 = vld [vmem:[%s1570_s1 + $0xf8] sm:$0xff]  ;;  %v52_v7 = vld [vmem:[%s1570_s1 + $0xf0] sm:$0xff]  ;;  %v51_v10 = vld [vmem:[%s1570_s1 + $0xe8] sm:$0xff] }
   0x4   :  { %v85_v5 = vld [vmem:[%s1570_s1 + $0x1f8] sm:$0xff]  ;;  %339 = vmatpush.msra.mxu1 %v53_v3  ;;  %320 = vmatpush.msra.mxu0 %v36_v2  ;;  %v84_v9 = vld [vmem:[%s1570_s1 + $0x1f0] sm:$0xff]  ;;  %v34_v11 = vld [vmem:[%s1570_s1 + $0x60] sm:$0xff] }
   0x5   :  { %379 = vmatpush.msra.mxu3 %v85_v5  ;;  %360 = vmatpush.msra.mxu2 %v68_v4  ;;  %v66_v12 = vld [vmem:[%s1570_s1 + $0x160] sm:$0xff]  ;;  %v83_v13 = vld [vmem:[%s1570_s1 + $0x1e8] sm:$0xff]  ;;  %v33_v16 = vld [vmem:[%s1570_s1 + $0x58] sm:$0xff] }
   0x6   :  { %340 = vmatpush.msra.mxu1 %v52_v7  ;;  %321 = vmatpush.msra.mxu0 %v35_v6  ;;  %v50_v14 = vld [vmem:[%s1570_s1 + $0xe0] sm:$0xff]  ;;  %v65_v17 = vld [vmem:[%s1570_s1 + $0x158] sm:$0xff]  ;;  %v32_v20 = vld [vmem:[%s1570_s1 + $0x50] sm:$0xff] }
   0x7   :  { %380 = vmatpush.msra.mxu3 %v84_v9  ;;  %361 = vmatpush.msra.mxu2 %v67_v8  ;;  %v82_v15 = vld [vmem:[%s1570_s1 + $0x1e0] sm:$0xff]  ;;  %v49_v18 = vld [vmem:[%s1570_s1 + $0xd8] sm:$0xff]  ;;  %v64_v21 = vld [vmem:[%s1570_s1 + $0x150] sm:$0xff] }
   0x8   :  { %341 = vmatpush.msra.mxu1 %v51_v10  ;;  %322 = vmatpush.msra.mxu0 %v34_v11  ;;  %v81_v19 = vld [vmem:[%s1570_s1 + $0x1d8] sm:$0xff]  ;;  %v48_v22 = vld [vmem:[%s1570_s1 + $0xd0] sm:$0xff]  ;;  %v31_v24 = vld [vmem:[%s1570_s1 + $0x48] sm:$0xff] }
   0x9   :  { %381 = vmatpush.msra.mxu3 %v83_v13  ;;  %362 = vmatpush.msra.mxu2 %v66_v12  ;;  %v80_v23 = vld [vmem:[%s1570_s1 + $0x1d0] sm:$0xff]  ;;  %v63_v25 = vld [vmem:[%s1570_s1 + $0x148] sm:$0xff]  ;;  %v30_v28 = vld [vmem:[%s1570_s1 + $0x40] sm:$0xff] }
   0xa   :  { %342 = vmatpush.msra.mxu1 %v50_v14  ;;  %323 = vmatpush.msra.mxu0 %v33_v16  ;;  %v47_v26 = vld [vmem:[%s1570_s1 + $0xc8] sm:$0xff]  ;;  %v62_v29 = vld [vmem:[%s1570_s1 + $0x140] sm:$0xff]  ;;  %v29_v32 = vld [vmem:[%s1570_s1 + $0x38] sm:$0xff] }
   0xb   :  { %382 = vmatpush.msra.mxu3 %v82_v15  ;;  %363 = vmatpush.msra.mxu2 %v65_v17  ;;  %v79_v27 = vld [vmem:[%s1570_s1 + $0x1c8] sm:$0xff]  ;;  %v46_v30 = vld [vmem:[%s1570_s1 + $0xc0] sm:$0xff]  ;;  %v61_v33 = vld [vmem:[%s1570_s1 + $0x138] sm:$0xff] }
   0xc   :  { %343 = vmatpush.msra.mxu1 %v49_v18  ;;  %324 = vmatpush.msra.mxu0 %v32_v20  ;;  %v78_v31 = vld [vmem:[%s1570_s1 + $0x1c0] sm:$0xff]  ;;  %v45_v34 = vld [vmem:[%s1570_s1 + $0xb8] sm:$0xff]  ;;  %v28_v36 = vld [vmem:[%s1570_s1 + $0x30] sm:$0xff] }
   0xd   :  { %383 = vmatpush.msra.mxu3 %v81_v19  ;;  %364 = vmatpush.msra.mxu2 %v64_v21  ;;  %v77_v35 = vld [vmem:[%s1570_s1 + $0x1b8] sm:$0xff]  ;;  %v60_v37 = vld [vmem:[%s1570_s1 + $0x130] sm:$0xff]  ;;  %v27_v40 = vld [vmem:[%s1570_s1 + $0x28] sm:$0xff] }
   0xe   :  { %344 = vmatpush.msra.mxu1 %v48_v22  ;;  %325 = vmatpush.msra.mxu0 %v31_v24  ;;  %v44_v38 = vld [vmem:[%s1570_s1 + $0xb0] sm:$0xff]  ;;  %v59_v41 = vld [vmem:[%s1570_s1 + $0x128] sm:$0xff]  ;;  %v26_v44 = vld [vmem:[%s1570_s1 + $0x20] sm:$0xff] }
   0xf   :  { %384 = vmatpush.msra.mxu3 %v80_v23  ;;  %365 = vmatpush.msra.mxu2 %v63_v25  ;;  %v76_v39 = vld [vmem:[%s1570_s1 + $0x1b0] sm:$0xff]  ;;  %v43_v42 = vld [vmem:[%s1570_s1 + $0xa8] sm:$0xff]  ;;  %v58_v45 = vld [vmem:[%s1570_s1 + $0x120] sm:$0xff] }
  0x10   :  { %345 = vmatpush.msra.mxu1 %v47_v26  ;;  %326 = vmatpush.msra.mxu0 %v30_v28  ;;  %v75_v43 = vld [vmem:[%s1570_s1 + $0x1a8] sm:$0xff]  ;;  %v42_v46 = vld [vmem:[%s1570_s1 + $0xa0] sm:$0xff]  ;;  %v25_v48 = vld [vmem:[%s1570_s1 + $0x18] sm:$0xff] }
  0x11   :  { %385 = vmatpush.msra.mxu3 %v79_v27  ;;  %366 = vmatpush.msra.mxu2 %v62_v29  ;;  %v74_v47 = vld [vmem:[%s1570_s1 + $0x1a0] sm:$0xff]  ;;  %v57_v49 = vld [vmem:[%s1570_s1 + $0x118] sm:$0xff]  ;;  %v24_v52 = vld [vmem:[%s1570_s1 + $0x10] sm:$0xff] }
  0x12   :  { %346 = vmatpush.msra.mxu1 %v46_v30  ;;  %327 = vmatpush.msra.mxu0 %v29_v32  ;;  %v41_v50 = vld [vmem:[%s1570_s1 + $0x98] sm:$0xff]  ;;  %v56_v53 = vld [vmem:[%s1570_s1 + $0x110] sm:$0xff]  ;;  %v23_v56 = vld [vmem:[%s1570_s1 + $0x8] sm:$0xff] }
  0x13   :  { %386 = vmatpush.msra.mxu3 %v78_v31  ;;  %367 = vmatpush.msra.mxu2 %v61_v33  ;;  %v73_v51 = vld [vmem:[%s1570_s1 + $0x198] sm:$0xff]  ;;  %v40_v54 = vld [vmem:[%s1570_s1 + $0x90] sm:$0xff]  ;;  %v55_v57 = vld [vmem:[%s1570_s1 + $0x108] sm:$0xff] }
  0x14   :  { %347 = vmatpush.msra.mxu1 %v45_v34  ;;  %328 = vmatpush.msra.mxu0 %v28_v36  ;;  %v72_v55 = vld [vmem:[%s1570_s1 + $0x190] sm:$0xff]  ;;  %v39_v58 = vld [vmem:[%s1570_s1 + $0x88] sm:$0xff]  ;;  %v22_v60 = vld [vmem:[%s1570_s1] sm:$0xff] }
  0x15   :  { %387 = vmatpush.msra.mxu3 %v77_v35  ;;  %368 = vmatpush.msra.mxu2 %v60_v37  ;;  %v71_v59 = vld [vmem:[%s1570_s1 + $0x188] sm:$0xff]  ;;  %v54_v61 = vld [vmem:[%s1570_s1 + $0x100] sm:$0xff]  ;;  %v101_v62 = vld [vmem:[%s1570_s1 + $0x278] sm:$0xff] }
  0x16   :  { %348 = vmatpush.msra.mxu1 %v44_v38  ;;  %329 = vmatpush.msra.mxu0 %v27_v40  ;;  %v133_v63 = vld [vmem:[%s1570_s1 + $0x378] sm:$0xff]  ;;  %v38_v0 = vld [vmem:[%s1570_s1 + $0x80] sm:$0xff]  ;;  %v100_v2 = vld [vmem:[%s1570_s1 + $0x270] sm:$0xff] }
  0x17   :  { %388 = vmatpush.msra.mxu3 %v76_v39  ;;  %369 = vmatpush.msra.mxu2 %v59_v41  ;;  %v70_v1 = vld [vmem:[%s1570_s1 + $0x180] sm:$0xff]  ;;  %v117_v3 = vld [vmem:[%s1570_s1 + $0x2f8] sm:$0xff]  ;;  %v132_v4 = vld [vmem:[%s1570_s1 + $0x370] sm:$0xff] }
  0x18   :  { %349 = vmatpush.msra.mxu1 %v43_v42  ;;  %330 = vmatpush.msra.mxu0 %v26_v44  ;;  %v149_v5 = vld [vmem:[%s1570_s1 + $0x3f8] sm:$0xff]  ;;  %v99_v6 = vld [vmem:[%s1570_s1 + $0x268] sm:$0xff]  ;;  %v116_v7 = vld [vmem:[%s1570_s1 + $0x2f0] sm:$0xff] }
  0x19   :  { %389 = vmatpush.msra.mxu3 %v75_v43  ;;  %370 = vmatpush.msra.mxu2 %v58_v45  ;;  %v131_v8 = vld [vmem:[%s1570_s1 + $0x368] sm:$0xff]  ;;  %v148_v9 = vld [vmem:[%s1570_s1 + $0x3f0] sm:$0xff]  ;;  %v98_v10 = vld [vmem:[%s1570_s1 + $0x260] sm:$0xff] }
  0x1a   :  { %350 = vmatpush.msra.mxu1 %v42_v46  ;;  %331 = vmatpush.msra.mxu0 %v25_v48  ;;  %v115_v11 = vld [vmem:[%s1570_s1 + $0x2e8] sm:$0xff]  ;;  %v130_v12 = vld [vmem:[%s1570_s1 + $0x360] sm:$0xff]  ;;  %v97_v14 = vld [vmem:[%s1570_s1 + $0x258] sm:$0xff] }
  0x1b   :  { %390 = vmatpush.msra.mxu3 %v74_v47  ;;  %371 = vmatpush.msra.mxu2 %v57_v49  ;;  %v147_v13 = vld [vmem:[%s1570_s1 + $0x3e8] sm:$0xff]  ;;  %v114_v15 = vld [vmem:[%s1570_s1 + $0x2e0] sm:$0xff]  ;;  %v129_v16 = vld [vmem:[%s1570_s1 + $0x358] sm:$0xff] }
  0x1c   :  { %351 = vmatpush.msra.mxu1 %v41_v50  ;;  %332 = vmatpush.msra.mxu0 %v24_v52  ;;  %v146_v17 = vld [vmem:[%s1570_s1 + $0x3e0] sm:$0xff]  ;;  %v96_v18 = vld [vmem:[%s1570_s1 + $0x250] sm:$0xff]  ;;  %v113_v19 = vld [vmem:[%s1570_s1 + $0x2d8] sm:$0xff] }
  0x1d   :  { %391 = vmatpush.msra.mxu3 %v73_v51  ;;  %372 = vmatpush.msra.mxu2 %v56_v53  ;;  %v128_v20 = vld [vmem:[%s1570_s1 + $0x350] sm:$0xff]  ;;  %v145_v21 = vld [vmem:[%s1570_s1 + $0x3d8] sm:$0xff]  ;;  %v18_v22 = vld [vmem:[%s1569_s0] sm:$0xff] }
  0x1e   :  { %352 = vmatpush.msra.mxu1 %v40_v54  ;;  %333 = vmatpush.msra.mxu0 %v23_v56  ;;  %v95_v23 = vld [vmem:[%s1570_s1 + $0x248] sm:$0xff]  ;;  %v112_v24 = vld [vmem:[%s1570_s1 + $0x2d0] sm:$0xff]  ;;  %282 = vst [vmem:[#allocation1] ss:$4 sm:$0xff] %v18_v22  ;;  %v94_v27 = vld [vmem:[%s1570_s1 + $0x240] sm:$0xff] }
  0x1f   :  { %392 = vmatpush.msra.mxu3 %v72_v55  ;;  %373 = vmatpush.msra.mxu2 %v55_v57  ;;  %v127_v25 = vld [vmem:[%s1570_s1 + $0x348] sm:$0xff]  ;;  %v144_v26 = vld [vmem:[%s1570_s1 + $0x3d0] sm:$0xff]  ;;  %v126_v29 = vld [vmem:[%s1570_s1 + $0x340] sm:$0xff] }
  0x20   :  { %353 = vmatpush.msra.mxu1 %v39_v58  ;;  %334 = vmatpush.msra.mxu0 %v22_v60  ;;  %v111_v28 = vld [vmem:[%s1570_s1 + $0x2c8] sm:$0xff]  ;;  %v93_v31 = vld [vmem:[%s1570_s1 + $0x238] sm:$0xff]  ;;  %v110_v32 = vld [vmem:[%s1570_s1 + $0x2c0] sm:$0xff] }
  0x21   :  { %393 = vmatpush.msra.mxu3 %v71_v59  ;;  %374 = vmatpush.msra.mxu2 %v54_v61  ;;  %v143_v30 = vld [vmem:[%s1570_s1 + $0x3c8] sm:$0xff]  ;;  %v125_v33 = vld [vmem:[%s1570_s1 + $0x338] sm:$0xff]  ;;  %v142_v34 = vld [vmem:[%s1570_s1 + $0x3c0] sm:$0xff] }
  0x22   :  { %399 = vmatpush.msrb.mxu0 %v101_v62  ;;  %354 = vmatpush.msra.mxu1 %v38_v0  ;;  %v92_v35 = vld [vmem:[%s1570_s1 + $0x230] sm:$0xff]  ;;  %v109_v36 = vld [vmem:[%s1570_s1 + $0x2b8] sm:$0xff]  ;;  %v19_v39 = vld [vmem:[%s1569_s0 + $0x8] sm:$0xff] }
  0x23   :  { %439 = vmatpush.msrb.mxu2 %v133_v63  ;;  %394 = vmatpush.msra.mxu3 %v70_v1  ;;  %v124_v37 = vld [vmem:[%s1570_s1 + $0x330] sm:$0xff]  ;;  %v141_v38 = vld [vmem:[%s1570_s1 + $0x3b8] sm:$0xff]  ;;  %v91_v40 = vld [vmem:[%s1570_s1 + $0x228] sm:$0xff]  ;;  %284 = vst [vmem:[#allocation1 + $0x20] ss:$4 sm:$0xff] %v19_v39 }
  0x24   :  { %400 = vmatpush.msrb.mxu0 %v100_v2  ;;  %419 = vmatpush.msrb.mxu1 %v117_v3  ;;  %v108_v41 = vld [vmem:[%s1570_s1 + $0x2b0] sm:$0xff]  ;;  %v123_v43 = vld [vmem:[%s1570_s1 + $0x328] sm:$0xff]  ;;  %v90_v49 = vld [vmem:[%s1570_s1 + $0x220] sm:$0xff] }
  0x25   :  { %440 = vmatpush.msrb.mxu2 %v132_v4  ;;  %459 = vmatpush.msrb.mxu3 %v149_v5  ;;  %v20_v42 = vld [vmem:[%s1569_s0 + $0x10] sm:$0xff]  ;;  %v1080_v45 = vld.sshfl [vmem:[#allocation1] sm:$0xff pattern:$0x73625140]  ;;  %v107_v50 = vld [vmem:[%s1570_s1 + $0x2a8] sm:$0xff] }
  0x26   :  { %401 = vmatpush.msrb.mxu0 %v99_v6  ;;  %420 = vmatpush.msrb.mxu1 %v116_v7  ;;  %v287_v44 = vld.sshfl [vmem:[#allocation1 + $0x10] sm:$0xff pattern:$0x73625140]  ;;  %v1082_v46 = vld.sshfl [vmem:[#allocation1 + $0x18] sm:$0xff pattern:$0x73625140] }
  0x27   :  { %441 = vmatpush.msrb.mxu2 %v131_v8  ;;  %460 = vmatpush.msrb.mxu3 %v148_v9  ;;  %v1084_v47 = vld.sshfl [vmem:[#allocation1 + $0x8] sm:$0xff pattern:$0x73625140]  ;;  %v140_v48 = vld [vmem:[%s1570_s1 + $0x3b0] sm:$0xff]  ;;  %v122_v51 = vld [vmem:[%s1570_s1 + $0x320] sm:$0xff] }
  0x28   :  { %402 = vmatpush.msrb.mxu0 %v98_v10  ;;  %421 = vmatpush.msrb.mxu1 %v115_v11  ;;  %293 = vst [vmem:[#allocation1] ss:$4 sm:$0xff] %v20_v42  ;;  %v139_v52 = vld [vmem:[%s1570_s1 + $0x3a8] sm:$0xff]  ;;  %v89_v53 = vld [vmem:[%s1570_s1 + $0x218] sm:$0xff]  ;;  %v106_v54 = vld [vmem:[%s1570_s1 + $0x2a0] sm:$0xff] }
  0x29   :  { %442 = vmatpush.msrb.mxu2 %v130_v12  ;;  %461 = vmatpush.msrb.mxu3 %v147_v13  ;;  %v121_v55 = vld [vmem:[%s1570_s1 + $0x318] sm:$0xff]  ;;  %v138_v56 = vld [vmem:[%s1570_s1 + $0x3a0] sm:$0xff]  ;;  %v88_v57 = vld [vmem:[%s1570_s1 + $0x210] sm:$0xff] }
  0x2a   :  { %403 = vmatpush.msrb.mxu0 %v97_v14  ;;  %422 = vmatpush.msrb.mxu1 %v114_v15  ;;  %v105_v58 = vld [vmem:[%s1570_s1 + $0x298] sm:$0xff]  ;;  %v1122_v60 = vld.sshfl [vmem:[#allocation1 + $0x30] sm:$0xff pattern:$0x73625140]  ;;  %v87_v2 = vld [vmem:[%s1570_s1 + $0x208] sm:$0xff] }
  0x2b   :  { %443 = vmatpush.msrb.mxu2 %v129_v16  ;;  %462 = vmatpush.msrb.mxu3 %v146_v17  ;;  %v21_v59 = vld [vmem:[%s1569_s0 + $0x18] sm:$0xff]  ;;  %v1124_v61 = vld.sshfl [vmem:[#allocation1 + $0x20] sm:$0xff pattern:$0x73625140]  ;;  %v120_v0 = vld [vmem:[%s1570_s1 + $0x310] sm:$0xff] }
  0x2c   :  { %404 = vmatpush.msrb.mxu0 %v96_v18  ;;  %423 = vmatpush.msrb.mxu1 %v113_v19  ;;  %v1126_v62 = vld.sshfl [vmem:[#allocation1 + $0x38] sm:$0xff pattern:$0x73625140]  ;;  %v1128_v63 = vld.sshfl [vmem:[#allocation1 + $0x28] sm:$0xff pattern:$0x73625140] }
  0x2d   :  { %444 = vmatpush.msrb.mxu2 %v128_v20  ;;  %463 = vmatpush.msrb.mxu3 %v145_v21  ;;  %v137_v1 = vld [vmem:[%s1570_s1 + $0x398] sm:$0xff]  ;;  %294 = vst [vmem:[#allocation1 + $0x20] ss:$4 sm:$0xff] %v21_v59  ;;  %v104_v3 = vld [vmem:[%s1570_s1 + $0x290] sm:$0xff]  ;;  %v119_v4 = vld [vmem:[%s1570_s1 + $0x308] sm:$0xff] }
  0x2e   :  { %405 = vmatpush.msrb.mxu0 %v95_v23  ;;  %424 = vmatpush.msrb.mxu1 %v112_v24  ;;  %v136_v5 = vld [vmem:[%s1570_s1 + $0x390] sm:$0xff]  ;;  %v86_v6 = vld [vmem:[%s1570_s1 + $0x200] sm:$0xff]  ;;  %v103_v7 = vld [vmem:[%s1570_s1 + $0x288] sm:$0xff] }
  0x2f   :  { %445 = vmatpush.msrb.mxu2 %v127_v25  ;;  %464 = vmatpush.msrb.mxu3 %v144_v26  ;;  %v118_v8 = vld [vmem:[%s1570_s1 + $0x300] sm:$0xff]  ;;  %v135_v9 = vld [vmem:[%s1570_s1 + $0x388] sm:$0xff]  ;;  %v165_v10 = vld [vmem:[%s1570_s1 + $0x478] sm:$0xff] }
  0x30   :  { %406 = vmatpush.msrb.mxu0 %v94_v27  ;;  %425 = vmatpush.msrb.mxu1 %v111_v28  ;;  %v197_v11 = vld [vmem:[%s1570_s1 + $0x578] sm:$0xff]  ;;  %v102_v12 = vld [vmem:[%s1570_s1 + $0x280] sm:$0xff]  ;;  %v164_v14 = vld [vmem:[%s1570_s1 + $0x470] sm:$0xff] }
  0x31   :  { %446 = vmatpush.msrb.mxu2 %v126_v29  ;;  %465 = vmatpush.msrb.mxu3 %v143_v30  ;;  %v134_v13 = vld [vmem:[%s1570_s1 + $0x380] sm:$0xff]  ;;  %v181_v15 = vld [vmem:[%s1570_s1 + $0x4f8] sm:$0xff]  ;;  %v196_v16 = vld [vmem:[%s1570_s1 + $0x570] sm:$0xff] }
  0x32   :  { %407 = vmatpush.msrb.mxu0 %v93_v31  ;;  %426 = vmatpush.msrb.mxu1 %v110_v32  ;;  %v213_v17 = vld [vmem:[%s1570_s1 + $0x5f8] sm:$0xff]  ;;  %v163_v18 = vld [vmem:[%s1570_s1 + $0x468] sm:$0xff]  ;;  %v180_v19 = vld [vmem:[%s1570_s1 + $0x4f0] sm:$0xff] }
  0x33   :  { %447 = vmatpush.msrb.mxu2 %v125_v33  ;;  %466 = vmatpush.msrb.mxu3 %v142_v34  ;;  %v195_v20 = vld [vmem:[%s1570_s1 + $0x568] sm:$0xff]  ;;  %v212_v21 = vld [vmem:[%s1570_s1 + $0x5f0] sm:$0xff]  ;;  %v162_v22 = vld [vmem:[%s1570_s1 + $0x460] sm:$0xff] }
  0x34   :  { %408 = vmatpush.msrb.mxu0 %v92_v35  ;;  %427 = vmatpush.msrb.mxu1 %v109_v36  ;;  %v179_v23 = vld [vmem:[%s1570_s1 + $0x4e8] sm:$0xff]  ;;  %v194_v24 = vld [vmem:[%s1570_s1 + $0x560] sm:$0xff]  ;;  %v161_v26 = vld [vmem:[%s1570_s1 + $0x458] sm:$0xff] }
  0x35   :  { %448 = vmatpush.msrb.mxu2 %v124_v37  ;;  %467 = vmatpush.msrb.mxu3 %v141_v38  ;;  %v211_v25 = vld [vmem:[%s1570_s1 + $0x5e8] sm:$0xff]  ;;  %v178_v27 = vld [vmem:[%s1570_s1 + $0x4e0] sm:$0xff] }
  0x36   :  { %409 = vmatpush.msrb.mxu0 %v91_v40  ;;  %428 = vmatpush.msrb.mxu1 %v108_v41 }
  0x37   :  { %449 = vmatpush.msrb.mxu2 %v123_v43  ;;  %468 = vmatpush.msrb.mxu3 %v140_v48 }
  0x38   :  { %410 = vmatpush.msrb.mxu0 %v90_v49  ;;  %429 = vmatpush.msrb.mxu1 %v107_v50 }
  0x39   :  { %450 = vmatpush.msrb.mxu2 %v122_v51  ;;  %469 = vmatpush.msrb.mxu3 %v139_v52 }
  0x3a   :  { %411 = vmatpush.msrb.mxu0 %v89_v53  ;;  %430 = vmatpush.msrb.mxu1 %v106_v54 }
  0x3b   :  { %451 = vmatpush.msrb.mxu2 %v121_v55  ;;  %470 = vmatpush.msrb.mxu3 %v138_v56 }
  0x3c   :  { %412 = vmatpush.msrb.mxu0 %v88_v57  ;;  %431 = vmatpush.msrb.mxu1 %v105_v58 }
  0x3d   :  { %452 = vmatpush.msrb.mxu2 %v120_v0  ;;  %471 = vmatpush.msrb.mxu3 %v137_v1 }
  0x3e   :  { %413 = vmatpush.msrb.mxu0 %v87_v2  ;;  %432 = vmatpush.msrb.mxu1 %v104_v3 }
  0x3f   :  { %453 = vmatpush.msrb.mxu2 %v119_v4  ;;  %472 = vmatpush.msrb.mxu3 %v136_v5 }
  0x40   :  { %375 = vmatmul.f32.vlgmr.msra.gmra.mxu2 %v287_v44  ;;  %414 = vmatpush.msrb.mxu0 %v86_v6 }
  0x41   :  { %433 = vmatpush.msrb.mxu1 %v103_v7  ;;  %454 = vmatpush.msrb.mxu2 %v118_v8 }
  0x42   :  { %473 = vmatpush.msrb.mxu3 %v135_v9  ;;  %335 = vmatmul.f32.vlgmr.msra.gmra.mxu0 %v1080_v45 }
  0x43   :  { %395 = vmatmul.f32.vlgmr.msra.gmra.mxu3 %v1082_v46  ;;  %479 = vmatpush.msra.mxu0 %v165_v10 }
  0x44   :  { %519 = vmatpush.msra.mxu2 %v197_v11  ;;  %434 = vmatpush.msrb.mxu1 %v102_v12 }
  0x45   :  { %474 = vmatpush.msrb.mxu3 %v134_v13  ;;  %355 = vmatmul.f32.vlgmr.msra.gmra.mxu1 %v1084_v47 }
  0x46   :  { %480 = vmatpush.msra.mxu0 %v164_v14  ;;  %499 = vmatpush.msra.mxu1 %v181_v15 }
  0x47   :  { %520 = vmatpush.msra.mxu2 %v196_v16  ;;  %539 = vmatpush.msra.mxu3 %v213_v17 }
  0x48   :  { %481 = vmatpush.msra.mxu0 %v163_v18  ;;  %500 = vmatpush.msra.mxu1 %v180_v19 }
  0x49   :  { %521 = vmatpush.msra.mxu2 %v195_v20  ;;  %540 = vmatpush.msra.mxu3 %v212_v21 }
  0x4a   :  { %455 = vmatmul.f32.vlgmr.msrb.gmra.mxu2 %v1122_v60  ;;  %482 = vmatpush.msra.mxu0 %v162_v22 }
  0x4b   :  { %9 = vsyncpa [#allocation3], 0  ;;  %501 = vmatpush.msra.mxu1 %v179_v23  ;;  %522 = vmatpush.msra.mxu2 %v194_v24  ;;  %v193_v28 = vld [vmem:[%s1570_s1 + $0x558] sm:$0xff]  ;;  %v210_v29 = vld [vmem:[%s1570_s1 + $0x5e0] sm:$0xff]  ;;  %vm639_vm0 = vcmask 9216   ;;  %s730_s7 = smov [#allocation2]  }
  0x4c   :  { %541 = vmatpush.msra.mxu3 %v211_v25  ;;  %415 = vmatmul.f32.vlgmr.msrb.gmra.mxu0 %v1124_v61  ;;  %v160_v30 = vld [vmem:[%s1570_s1 + $0x450] sm:$0xff]  ;;  %v177_v31 = vld [vmem:[%s1570_s1 + $0x4d8] sm:$0xff]  ;;  %v159_v34 = vld [vmem:[%s1570_s1 + $0x448] sm:$0xff]  ;;  %s688_s8 = sshll.u32 %s730_s7, 4  ;;  %s690_s11 = sshll.u32 %s1573_s4, 4  ;;  %s689_s8 = int_to_ptr.vmem [resolvable:$true] %s688_s8  ;;  %s691_s11 = int_to_ptr.hbm [resolvable:$true] %s690_s11 }
  0x4d   :  { %475 = vmatmul.f32.vlgmr.msrb.gmra.mxu3 %v1126_v62  ;;  %483 = vmatpush.msra.mxu0 %v161_v26  ;;  %v192_v32 = vld [vmem:[%s1570_s1 + $0x550] sm:$0xff]  ;;  %v209_v33 = vld [vmem:[%s1570_s1 + $0x5d8] sm:$0xff]  ;;  %v191_v36 = vld [vmem:[%s1570_s1 + $0x548] sm:$0xff] }
  0x4e   :  { %502 = vmatpush.msra.mxu1 %v178_v27  ;;  %523 = vmatpush.msra.mxu2 %v193_v28  ;;  %v176_v35 = vld [vmem:[%s1570_s1 + $0x4d0] sm:$0xff]  ;;  %v158_v38 = vld [vmem:[%s1570_s1 + $0x440] sm:$0xff]  ;;  %v175_v39 = vld [vmem:[%s1570_s1 + $0x4c8] sm:$0xff] }
  0x4f   :  { %542 = vmatpush.msra.mxu3 %v210_v29  ;;  %435 = vmatmul.f32.vlgmr.msrb.gmra.mxu1 %v1128_v63  ;;  %v208_v37 = vld [vmem:[%s1570_s1 + $0x5d0] sm:$0xff]  ;;  %v190_v40 = vld [vmem:[%s1570_s1 + $0x540] sm:$0xff]  ;;  %v207_v41 = vld [vmem:[%s1570_s1 + $0x5c8] sm:$0xff] }
  0x50   :  { %484 = vmatpush.msra.mxu0 %v160_v30  ;;  %503 = vmatpush.msra.mxu1 %v177_v31  ;;  %v157_v42 = vld [vmem:[%s1570_s1 + $0x438] sm:$0xff]  ;;  %v174_v43 = vld [vmem:[%s1570_s1 + $0x4c0] sm:$0xff]  ;;  %v156_v46 = vld [vmem:[%s1570_s1 + $0x430] sm:$0xff] }
  0x51   :  { %524 = vmatpush.msra.mxu2 %v192_v32  ;;  %543 = vmatpush.msra.mxu3 %v209_v33  ;;  %v189_v44 = vld [vmem:[%s1570_s1 + $0x538] sm:$0xff]  ;;  %v206_v45 = vld [vmem:[%s1570_s1 + $0x5c0] sm:$0xff]  ;;  %v188_v48 = vld [vmem:[%s1570_s1 + $0x530] sm:$0xff] }
  0x52   :  { %485 = vmatpush.msra.mxu0 %v159_v34  ;;  %504 = vmatpush.msra.mxu1 %v176_v35  ;;  %v173_v47 = vld [vmem:[%s1570_s1 + $0x4b8] sm:$0xff]  ;;  %v155_v50 = vld [vmem:[%s1570_s1 + $0x428] sm:$0xff]  ;;  %v172_v51 = vld [vmem:[%s1570_s1 + $0x4b0] sm:$0xff] }
  0x53   :  { %525 = vmatpush.msra.mxu2 %v191_v36  ;;  %544 = vmatpush.msra.mxu3 %v208_v37  ;;  %v205_v49 = vld [vmem:[%s1570_s1 + $0x5b8] sm:$0xff]  ;;  %v187_v52 = vld [vmem:[%s1570_s1 + $0x528] sm:$0xff]  ;;  %v204_v53 = vld [vmem:[%s1570_s1 + $0x5b0] sm:$0xff] }
  0x54   :  { %486 = vmatpush.msra.mxu0 %v158_v38  ;;  %505 = vmatpush.msra.mxu1 %v175_v39  ;;  %v154_v54 = vld [vmem:[%s1570_s1 + $0x420] sm:$0xff]  ;;  %v171_v55 = vld [vmem:[%s1570_s1 + $0x4a8] sm:$0xff]  ;;  %v153_v58 = vld [vmem:[%s1570_s1 + $0x418] sm:$0xff] }
  0x55   :  { %526 = vmatpush.msra.mxu2 %v190_v40  ;;  %545 = vmatpush.msra.mxu3 %v207_v41  ;;  %v186_v56 = vld [vmem:[%s1570_s1 + $0x520] sm:$0xff]  ;;  %v203_v57 = vld [vmem:[%s1570_s1 + $0x5a8] sm:$0xff]  ;;  %v185_v60 = vld [vmem:[%s1570_s1 + $0x518] sm:$0xff] }
  0x56   :  { %487 = vmatpush.msra.mxu0 %v157_v42  ;;  %506 = vmatpush.msra.mxu1 %v174_v43  ;;  %v170_v59 = vld [vmem:[%s1570_s1 + $0x4a0] sm:$0xff]  ;;  %v152_v62 = vld [vmem:[%s1570_s1 + $0x410] sm:$0xff]  ;;  %v169_v63 = vld [vmem:[%s1570_s1 + $0x498] sm:$0xff] }
  0x57   :  { %527 = vmatpush.msra.mxu2 %v189_v44  ;;  %546 = vmatpush.msra.mxu3 %v206_v45  ;;  %v202_v61 = vld [vmem:[%s1570_s1 + $0x5a0] sm:$0xff]  ;;  %v184_v0 = vld [vmem:[%s1570_s1 + $0x510] sm:$0xff]  ;;  %v201_v1 = vld [vmem:[%s1570_s1 + $0x598] sm:$0xff] }
  0x58   :  { %488 = vmatpush.msra.mxu0 %v156_v46  ;;  %507 = vmatpush.msra.mxu1 %v173_v47  ;;  %v151_v2 = vld [vmem:[%s1570_s1 + $0x408] sm:$0xff]  ;;  %v168_v3 = vld [vmem:[%s1570_s1 + $0x490] sm:$0xff]  ;;  %v150_v6 = vld [vmem:[%s1570_s1 + $0x400] sm:$0xff] }
  0x59   :  { %528 = vmatpush.msra.mxu2 %v188_v48  ;;  %547 = vmatpush.msra.mxu3 %v205_v49  ;;  %v183_v4 = vld [vmem:[%s1570_s1 + $0x508] sm:$0xff]  ;;  %v200_v5 = vld [vmem:[%s1570_s1 + $0x590] sm:$0xff]  ;;  %v182_v8 = vld [vmem:[%s1570_s1 + $0x500] sm:$0xff] }
  0x5a   :  { %489 = vmatpush.msra.mxu0 %v155_v50  ;;  %508 = vmatpush.msra.mxu1 %v172_v51  ;;  %v167_v7 = vld [vmem:[%s1570_s1 + $0x488] sm:$0xff]  ;;  %v295_v10 = vld.sshfl [vmem:[#allocation1] sm:$0xff pattern:$0x73625140]  ;;  %v229_v12 = vld [vmem:[%s1570_s1 + $0x678] sm:$0xff] }
  0x5b   :  { %529 = vmatpush.msra.mxu2 %v187_v52  ;;  %548 = vmatpush.msra.mxu3 %v204_v53  ;;  %v199_v9 = vld [vmem:[%s1570_s1 + $0x588] sm:$0xff]  ;;  %v297_v11 = vld.sshfl [vmem:[#allocation1 + $0x10] sm:$0xff pattern:$0x73625140]  ;;  %v261_v13 = vld [vmem:[%s1570_s1 + $0x778] sm:$0xff] }
  0x5c   :  { %490 = vmatpush.msra.mxu0 %v154_v54  ;;  %509 = vmatpush.msra.mxu1 %v171_v55  ;;  %v166_v14 = vld [vmem:[%s1570_s1 + $0x480] sm:$0xff]  ;;  %v296_v16 = vld.sshfl [vmem:[#allocation1 + $0x8] sm:$0xff pattern:$0x73625140]  ;;  %v228_v18 = vld [vmem:[%s1570_s1 + $0x670] sm:$0xff] }
  0x5d   :  { %530 = vmatpush.msra.mxu2 %v186_v56  ;;  %549 = vmatpush.msra.mxu3 %v203_v57  ;;  %v198_v15 = vld [vmem:[%s1570_s1 + $0x580] sm:$0xff]  ;;  %v298_v17 = vld.sshfl [vmem:[#allocation1 + $0x18] sm:$0xff pattern:$0x73625140]  ;;  %v260_v20 = vld [vmem:[%s1570_s1 + $0x770] sm:$0xff] }
  0x5e   :  { %491 = vmatpush.msra.mxu0 %v153_v58  ;;  %510 = vmatpush.msra.mxu1 %v170_v59  ;;  %v245_v19 = vld [vmem:[%s1570_s1 + $0x6f8] sm:$0xff]  ;;  %v227_v22 = vld [vmem:[%s1570_s1 + $0x668] sm:$0xff]  ;;  %v244_v23 = vld [vmem:[%s1570_s1 + $0x6f0] sm:$0xff] }
  0x5f   :  { %531 = vmatpush.msra.mxu2 %v185_v60  ;;  %550 = vmatpush.msra.mxu3 %v202_v61  ;;  %v277_v21 = vld [vmem:[%s1570_s1 + $0x7f8] sm:$0xff]  ;;  %v259_v24 = vld [vmem:[%s1570_s1 + $0x768] sm:$0xff]  ;;  %v276_v25 = vld [vmem:[%s1570_s1 + $0x7f0] sm:$0xff] }
  0x60   :  { %492 = vmatpush.msra.mxu0 %v152_v62  ;;  %511 = vmatpush.msra.mxu1 %v169_v63  ;;  %v226_v26 = vld [vmem:[%s1570_s1 + $0x660] sm:$0xff]  ;;  %v243_v27 = vld [vmem:[%s1570_s1 + $0x6e8] sm:$0xff]  ;;  %v225_v30 = vld [vmem:[%s1570_s1 + $0x658] sm:$0xff] }
  0x61   :  { %532 = vmatpush.msra.mxu2 %v184_v0  ;;  %551 = vmatpush.msra.mxu3 %v201_v1  ;;  %v258_v28 = vld [vmem:[%s1570_s1 + $0x760] sm:$0xff]  ;;  %v275_v29 = vld [vmem:[%s1570_s1 + $0x7e8] sm:$0xff]  ;;  %v257_v32 = vld [vmem:[%s1570_s1 + $0x758] sm:$0xff] }
  0x62   :  { %493 = vmatpush.msra.mxu0 %v151_v2  ;;  %512 = vmatpush.msra.mxu1 %v168_v3  ;;  %v242_v31 = vld [vmem:[%s1570_s1 + $0x6e0] sm:$0xff]  ;;  %v224_v34 = vld [vmem:[%s1570_s1 + $0x650] sm:$0xff]  ;;  %v241_v35 = vld [vmem:[%s1570_s1 + $0x6d8] sm:$0xff] }
  0x63   :  { %533 = vmatpush.msra.mxu2 %v183_v4  ;;  %552 = vmatpush.msra.mxu3 %v200_v5  ;;  %v274_v33 = vld [vmem:[%s1570_s1 + $0x7e0] sm:$0xff]  ;;  %v256_v36 = vld [vmem:[%s1570_s1 + $0x750] sm:$0xff]  ;;  %v273_v37 = vld [vmem:[%s1570_s1 + $0x7d8] sm:$0xff] }
  0x64   :  { %494 = vmatpush.msra.mxu0 %v150_v6  ;;  %513 = vmatpush.msra.mxu1 %v167_v7  ;;  %v223_v38 = vld [vmem:[%s1570_s1 + $0x648] sm:$0xff]  ;;  %v240_v39 = vld [vmem:[%s1570_s1 + $0x6d0] sm:$0xff]  ;;  %v222_v42 = vld [vmem:[%s1570_s1 + $0x640] sm:$0xff] }
  0x65   :  { %534 = vmatpush.msra.mxu2 %v182_v8  ;;  %553 = vmatpush.msra.mxu3 %v199_v9  ;;  %v255_v40 = vld [vmem:[%s1570_s1 + $0x748] sm:$0xff]  ;;  %v272_v41 = vld [vmem:[%s1570_s1 + $0x7d0] sm:$0xff]  ;;  %v254_v44 = vld [vmem:[%s1570_s1 + $0x740] sm:$0xff] }
  0x66   :  { %495 = vmatmul.f32.vlgmr.msra.gmra.mxu0 %v295_v10  ;;  %535 = vmatmul.f32.vlgmr.msra.gmra.mxu2 %v297_v11  ;;  %v239_v43 = vld [vmem:[%s1570_s1 + $0x6c8] sm:$0xff]  ;;  %v221_v46 = vld [vmem:[%s1570_s1 + $0x638] sm:$0xff]  ;;  %v238_v47 = vld [vmem:[%s1570_s1 + $0x6c0] sm:$0xff] }
  0x67   :  { %559 = vmatpush.msrb.mxu0 %v229_v12  ;;  %599 = vmatpush.msrb.mxu2 %v261_v13  ;;  %v271_v45 = vld [vmem:[%s1570_s1 + $0x7c8] sm:$0xff]  ;;  %v253_v48 = vld [vmem:[%s1570_s1 + $0x738] sm:$0xff]  ;;  %v270_v49 = vld [vmem:[%s1570_s1 + $0x7c0] sm:$0xff] }
  0x68   :  { %514 = vmatpush.msra.mxu1 %v166_v14  ;;  %554 = vmatpush.msra.mxu3 %v198_v15  ;;  %v220_v50 = vld [vmem:[%s1570_s1 + $0x630] sm:$0xff]  ;;  %v237_v51 = vld [vmem:[%s1570_s1 + $0x6b8] sm:$0xff]  ;;  %v219_v54 = vld [vmem:[%s1570_s1 + $0x628] sm:$0xff] }
  0x69   :  { %515 = vmatmul.f32.vlgmr.msra.gmra.mxu1 %v296_v16  ;;  %555 = vmatmul.f32.vlgmr.msra.gmra.mxu3 %v298_v17  ;;  %v252_v52 = vld [vmem:[%s1570_s1 + $0x730] sm:$0xff]  ;;  %v269_v53 = vld [vmem:[%s1570_s1 + $0x7b8] sm:$0xff]  ;;  %v251_v56 = vld [vmem:[%s1570_s1 + $0x728] sm:$0xff] }
  0x6a   :  { %560 = vmatpush.msrb.mxu0 %v228_v18  ;;  %579 = vmatpush.msrb.mxu1 %v245_v19  ;;  %v236_v55 = vld [vmem:[%s1570_s1 + $0x6b0] sm:$0xff]  ;;  %v218_v58 = vld [vmem:[%s1570_s1 + $0x620] sm:$0xff]  ;;  %v235_v59 = vld [vmem:[%s1570_s1 + $0x6a8] sm:$0xff] }
  0x6b   :  { %600 = vmatpush.msrb.mxu2 %v260_v20  ;;  %619 = vmatpush.msrb.mxu3 %v277_v21  ;;  %v268_v57 = vld [vmem:[%s1570_s1 + $0x7b0] sm:$0xff]  ;;  %v250_v60 = vld [vmem:[%s1570_s1 + $0x720] sm:$0xff]  ;;  %v267_v61 = vld [vmem:[%s1570_s1 + $0x7a8] sm:$0xff] }
  0x6c   :  { %561 = vmatpush.msrb.mxu0 %v227_v22  ;;  %580 = vmatpush.msrb.mxu1 %v244_v23  ;;  %v217_v62 = vld [vmem:[%s1570_s1 + $0x618] sm:$0xff]  ;;  %v234_v63 = vld [vmem:[%s1570_s1 + $0x6a0] sm:$0xff]  ;;  %v216_v2 = vld [vmem:[%s1570_s1 + $0x610] sm:$0xff] }
  0x6d   :  { %601 = vmatpush.msrb.mxu2 %v259_v24  ;;  %620 = vmatpush.msrb.mxu3 %v276_v25  ;;  %v249_v0 = vld [vmem:[%s1570_s1 + $0x718] sm:$0xff]  ;;  %v266_v1 = vld [vmem:[%s1570_s1 + $0x7a0] sm:$0xff]  ;;  %v248_v4 = vld [vmem:[%s1570_s1 + $0x710] sm:$0xff] }
  0x6e   :  { %562 = vmatpush.msrb.mxu0 %v226_v26  ;;  %581 = vmatpush.msrb.mxu1 %v243_v27  ;;  %v233_v3 = vld [vmem:[%s1570_s1 + $0x698] sm:$0xff]  ;;  %v215_v6 = vld [vmem:[%s1570_s1 + $0x608] sm:$0xff]  ;;  %v232_v7 = vld [vmem:[%s1570_s1 + $0x690] sm:$0xff] }
  0x6f   :  { %602 = vmatpush.msrb.mxu2 %v258_v28  ;;  %621 = vmatpush.msrb.mxu3 %v275_v29  ;;  %v265_v5 = vld [vmem:[%s1570_s1 + $0x798] sm:$0xff]  ;;  %v247_v8 = vld [vmem:[%s1570_s1 + $0x708] sm:$0xff]  ;;  %v264_v9 = vld [vmem:[%s1570_s1 + $0x790] sm:$0xff] }
  0x70   :  { %563 = vmatpush.msrb.mxu0 %v225_v30  ;;  %582 = vmatpush.msrb.mxu1 %v242_v31  ;;  %v214_v10 = vld [vmem:[%s1570_s1 + $0x600] sm:$0xff]  ;;  %v231_v11 = vld [vmem:[%s1570_s1 + $0x688] sm:$0xff]  ;;  %v301_v15 = vld.sshfl [vmem:[#allocation1 + $0x30] sm:$0xff pattern:$0x73625140] }
  0x71   :  { %603 = vmatpush.msrb.mxu2 %v257_v32  ;;  %622 = vmatpush.msrb.mxu3 %v274_v33  ;;  %v246_v12 = vld [vmem:[%s1570_s1 + $0x700] sm:$0xff]  ;;  %v263_v13 = vld [vmem:[%s1570_s1 + $0x788] sm:$0xff]  ;;  %v302_v19 = vld.sshfl [vmem:[#allocation1 + $0x38] sm:$0xff pattern:$0x73625140] }
  0x72   :  { %564 = vmatpush.msrb.mxu0 %v224_v34  ;;  %583 = vmatpush.msrb.mxu1 %v241_v35  ;;  %v299_v14 = vld.sshfl [vmem:[#allocation1 + $0x20] sm:$0xff pattern:$0x73625140]  ;;  %v300_v18 = vld.sshfl [vmem:[#allocation1 + $0x28] sm:$0xff pattern:$0x73625140] }
  0x73   :  { %604 = vmatpush.msrb.mxu2 %v256_v36  ;;  %623 = vmatpush.msrb.mxu3 %v273_v37  ;;  %v230_v16 = vld [vmem:[%s1570_s1 + $0x680] sm:$0xff] }
  0x74   :  { %565 = vmatpush.msrb.mxu0 %v223_v38  ;;  %584 = vmatpush.msrb.mxu1 %v240_v39  ;;  %v262_v17 = vld [vmem:[%s1570_s1 + $0x780] sm:$0xff] }
  0x75   :  { %605 = vmatpush.msrb.mxu2 %v255_v40  ;;  %624 = vmatpush.msrb.mxu3 %v272_v41 }
  0x76   :  { %566 = vmatpush.msrb.mxu0 %v222_v42  ;;  %585 = vmatpush.msrb.mxu1 %v239_v43 }
  0x77   :  { %606 = vmatpush.msrb.mxu2 %v254_v44  ;;  %625 = vmatpush.msrb.mxu3 %v271_v45 }
  0x78   :  { %567 = vmatpush.msrb.mxu0 %v221_v46  ;;  %586 = vmatpush.msrb.mxu1 %v238_v47 }
  0x79   :  { %607 = vmatpush.msrb.mxu2 %v253_v48  ;;  %626 = vmatpush.msrb.mxu3 %v270_v49 }
  0x7a   :  { %568 = vmatpush.msrb.mxu0 %v220_v50  ;;  %587 = vmatpush.msrb.mxu1 %v237_v51 }
  0x7b   :  { %608 = vmatpush.msrb.mxu2 %v252_v52  ;;  %627 = vmatpush.msrb.mxu3 %v269_v53 }
  0x7c   :  { %569 = vmatpush.msrb.mxu0 %v219_v54  ;;  %588 = vmatpush.msrb.mxu1 %v236_v55 }
  0x7d   :  { %609 = vmatpush.msrb.mxu2 %v251_v56  ;;  %628 = vmatpush.msrb.mxu3 %v268_v57 }
  0x7e   :  { %570 = vmatpush.msrb.mxu0 %v218_v58  ;;  %589 = vmatpush.msrb.mxu1 %v235_v59 }
  0x7f   :  { %610 = vmatpush.msrb.mxu2 %v250_v60  ;;  %629 = vmatpush.msrb.mxu3 %v267_v61 }
  0x80   :  { %571 = vmatpush.msrb.mxu0 %v217_v62  ;;  %590 = vmatpush.msrb.mxu1 %v234_v63 }
  0x81   :  { %611 = vmatpush.msrb.mxu2 %v249_v0  ;;  %630 = vmatpush.msrb.mxu3 %v266_v1 }
  0x82   :  { %572 = vmatpush.msrb.mxu0 %v216_v2  ;;  %591 = vmatpush.msrb.mxu1 %v233_v3 }
  0x83   :  { %612 = vmatpush.msrb.mxu2 %v248_v4  ;;  %631 = vmatpush.msrb.mxu3 %v265_v5 }
  0x84   :  { %573 = vmatpush.msrb.mxu0 %v215_v6  ;;  %592 = vmatpush.msrb.mxu1 %v232_v7 }
  0x85   :  { %613 = vmatpush.msrb.mxu2 %v247_v8  ;;  %632 = vmatpush.msrb.mxu3 %v264_v9 }
  0x86   :  { %574 = vmatpush.msrb.mxu0 %v214_v10  ;;  %593 = vmatpush.msrb.mxu1 %v231_v11 }
  0x87   :  { %614 = vmatpush.msrb.mxu2 %v246_v12  ;;  %633 = vmatpush.msrb.mxu3 %v263_v13 }
  0x88   :  { %575 = vmatmul.f32.vlgmr.msrb.gmra.mxu0 %v299_v14  ;;  %615 = vmatmul.f32.vlgmr.msrb.gmra.mxu2 %v301_v15  ;;  %v700_v14 = vld [vmem:[%s1571_s2] ss:$0 sm:$0xff] }
  0x89   :  { %594 = vmatpush.msrb.mxu1 %v230_v16  ;;  %634 = vmatpush.msrb.mxu3 %v262_v17  ;;  %v701_v17 = vld [vmem:[%s1572_s3] ss:$0 sm:$0xff] }
  0x8a   :  { %595 = vmatmul.f32.vlgmr.msrb.gmra.mxu1 %v300_v18  ;;  %635 = vmatmul.f32.vlgmr.msrb.gmra.mxu3 %v302_v19 }
  0xbf   :  { %v336_v21 = vpop.f32.mrf.mxu0 }
  0xc2   :  { %v356_v20 = vpop.f32.mrf.mxu1 }
  0xc3   :  { %v357_v22 = vadd.f32 %v356_v20, %v336_v21  ;;  %v376_v23 = vpop.f32.mrf.mxu2 }
  0xc5   :  { %v377_v24 = vadd.f32 %v376_v23, %v357_v22 }
  0xc6   :  { %v396_v25 = vpop.f32.mrf.mxu3 }
  0xc7   :  { %v397_v26 = vadd.f32 %v396_v25, %v377_v24 }
  0xc9   :  { %v416_v27 = vpop.f32.mrf.mxu0 }
  0xca   :  { %v417_v28 = vadd.f32 %v416_v27, %v397_v26 }
  0xcc   :  { %v436_v29 = vpop.f32.mrf.mxu1 }
  0xcd   :  { %v437_v30 = vadd.f32 %v436_v29, %v417_v28  ;;  %v456_v31 = vpop.f32.mrf.mxu2 }
  0xcf   :  { %v457_v32 = vadd.f32 %v456_v31, %v437_v30 }
  0xd0   :  { %v476_v33 = vpop.f32.mrf.mxu3 }
  0xd1   :  { %v477_v35 = vadd.f32 %v476_v33, %v457_v32 }
  0xe3   :  { %v496_v34 = vpop.f32.mrf.mxu0 }
  0xe4   :  { %v497_v36 = vadd.f32 %v496_v34, %v477_v35 }
  0xe6   :  { %v516_v37 = vpop.f32.mrf.mxu1 }
  0xe7   :  { %v517_v39 = vadd.f32 %v516_v37, %v497_v36 }
  0xe9   :  { %v536_v38 = vpop.f32.mrf.mxu2 }
  0xea   :  { %v537_v40 = vadd.f32 %v536_v38, %v517_v39 }
  0xec   :  { %v556_v41 = vpop.f32.mrf.mxu3 }
  0xed   :  { %v557_v42 = vadd.f32 %v556_v41, %v537_v40 }
 0x105   :  { %v576_v43 = vpop.f32.mrf.mxu0 }
 0x106   :  { %v577_v44 = vadd.f32 %v576_v43, %v557_v42 }
 0x107   :  { %v596_v45 = vpop.f32.mrf.mxu1 }
 0x108   :  { %v597_v46 = vadd.f32 %v596_v45, %v577_v44 }
 0x10b   :  { %v616_v47 = vpop.f32.mrf.mxu2 }
 0x10c   :  { %v617_v48 = vadd.f32 %v616_v47, %v597_v46 }
 0x10d   :  { %v636_v49 = vpop.f32.mrf.mxu3 }
 0x10e   :  { %v637_v50 = vadd.f32 %v636_v49, %v617_v48 }
 0x110   :  { %v640_v51 = vsel %vm639_vm0, %v637_v50, 0.0  ;;  %v647_v52 = vmul.f32 %v637_v50, %v637_v50 }
 0x111   :  { %v641_v53 = vrot.slane %v640_v51, 4 }
 0x112   :  { %v648_v54 = vsel %vm639_vm0, %v647_v52, 0.0 }
 0x113   :  { %v642_v55 = vadd.f32 %v641_v53, %v640_v51  ;;  %v649_v56 = vrot.slane %v648_v54, 4 }
 0x115   :  { %v643_v57 = vrot.slane %v642_v55, 2  ;;  %v650_v58 = vadd.f32 %v649_v56, %v648_v54 }
 0x117   :  { %v644_v59 = vadd.f32 %v643_v57, %v642_v55  ;;  %v651_v60 = vrot.slane %v650_v58, 2 }
 0x119   :  { %v645_v61 = vrot.slane %v644_v59, 1  ;;  %v652_v62 = vadd.f32 %v651_v60, %v650_v58 }
 0x11b   :  { %v646_v63 = vadd.f32 %v645_v61, %v644_v59  ;;  %v653_v0 = vrot.slane %v652_v62, 1 }
 0x11d   :  { %v654_v1 = vadd.f32 %v653_v0, %v652_v62  ;;  %v655_v2 = vmul.f32 0.5, %v646_v63 }
 0x11f   :  { %v656_v3 = vmul.f32 0.5, %v654_v1  ;;  %v657_v4 = vmul.f32 %v655_v2, %v655_v2  ;;  %v659_v13 = vsub.f32 %v637_v50, %v655_v2 }
 0x121   :  { %v658_v5 = vsub.f32 %v656_v3, %v657_v4 }
 0x123   :  { %v660_v6 = vadd.f32 1e-05, %v658_v5 }
 0x125   :  { %702 = vrsqrt.f32 %v660_v6  ;;  %vm667_vm2 = vweird.f32 %v660_v6 }
 0x12b   :  { %v703_v7 = vpop.eup %702 }
 0x12c   :  { %v662_v8 = vmul.f32 %v703_v7, %v660_v6  ;;  %vm668_vm1 = vweird.f32 %v703_v7 }
 0x12d   :  { %vm669_vm3 = vmor %vm667_vm2, %vm668_vm1 }
 0x12e   :  { %v663_v9 = vmul.f32 %v703_v7, %v662_v8 }
 0x130   :  { %v664_v10 = vmul.f32 0.5, %v663_v9 }
 0x132   :  { %v665_v11 = vsub.f32 1.5, %v664_v10 }
 0x134   :  { %v666_v12 = vmul.f32 %v703_v7, %v665_v11 }
 0x136   :  { %v670_v15 = vsel %vm669_vm3, %v703_v7, %v666_v12 }
 0x137   :  { %v671_v16 = vmul.f32 %v670_v15, %v659_v13 }
 0x139   :  { %v676_v18 = vmul.f32 %v700_v14, %v671_v16 }
 0x13b   :  { %v681_v19 = vadd.f32 %v701_v17, %v676_v18 }
 0x13d   :  { %682 = vst.msk [vmem:[#allocation2] sm:$0x3] %vm639_vm0, %v681_v19 }
 0x13e   :  { %693 = dma.vmem_to_hbm [thread:$0]  %s689_s8, 32, %s691_s11, [#allocation3]  }
 0x13f   :  { %728 = dma.done.wait [#allocation3], 32  }
 0x140   :  { %729 = vsyncadd [#allocation3], 4294967264 }
 0x141   :  { %698 = vsyncpa [#allocation3], 1 }

</bundles_post_ra>
